<compile_context>
chip_gen: v7x
topology: tpu7x:2x2x1
jax: 0.10.0
libtpu: 0.0.40
codegen_flags: <defaults>
</compile_context>

<pallas_src>
import functools
import math

import jax
import jax.numpy as jnp
from jax.experimental import pallas as pl
from jax.experimental.pallas import tpu as pltpu


# ----------------------------------------------------------------------------
# Fused SAE forward kernel, grid = (B // tb, d_sae // ts).
#   encode:  per (i, s) tile  enc = relu(x @ W_enc[:, s] + b_enc_eff[s])
#   decode:  acc += enc @ W_dec[s, :]; at s == last: dec = acc*inv_norm + b_dec
# When acc_in_out=True (f32 output) the decoded output block itself is the
# accumulator (it is resident across the reduction axis).
# ----------------------------------------------------------------------------
def _sae_fwd_kernel(x_ref, w_enc_ref, b_enc_ref, b_dec_ref, inv_norm_ref,
                    w_dec_ref, dec_ref, enc_ref, *scratch, acc_in_out):
    acc_ref = dec_ref if acc_in_out else scratch[0]
    s = pl.program_id(1)

    @pl.when(s == 0)
    def _():
        acc_ref[...] = jnp.zeros_like(acc_ref)

    # Encode: (tb, d_in) @ (d_in, ts) -> (tb, ts); f32 accumulate on the MXU.
    # x is pre-cast to compute dtype and b_dec is folded into b_enc_eff (f32).
    pre = jnp.dot(x_ref[...], w_enc_ref[...],
                  preferred_element_type=jnp.float32) + b_enc_ref[...]
    enc = jnp.maximum(pre, 0.0)                         # relu (f32 epilogue)
    enc_ref[...] = enc.astype(enc_ref.dtype)

    # Decode partial sum: (tb, ts) @ (ts, d_in) -> f32 accumulator.
    acc_ref[...] += jnp.dot(enc.astype(w_dec_ref.dtype), w_dec_ref[...],
                            preferred_element_type=jnp.float32)

    @pl.when(s == pl.num_programs(1) - 1)
    def _():
        # Column norm of W_dec commutes with the matmul: apply it here.
        dec_ref[...] = (acc_ref[...] * inv_norm_ref[...]
                        + b_dec_ref[...]).astype(dec_ref.dtype)


# ----------------------------------------------------------------------------
# VMEM-budget-driven tile selection (respects the (8, 128) tiling constraint).
# ----------------------------------------------------------------------------
def _detect_vmem_capacity():
    try:
        info = pltpu.get_tpu_info()
        cap = getattr(info, "vmem_capacity_bytes", None)
        if cap:
            return int(cap)
    except Exception:
        pass
    return 64 * 1024 * 1024  # conservative (v7x per-TC VMEM)


def _aligned_divisor(total, cap, align):
    t = (min(cap, total) // align) * align
    while t >= align:
        if total % t == 0:
            return t
        t -= align
    return None


def _pick_dim_tile(total, cap):
    if total <= cap:
        return total                      # full extent: always legal
    for align in (256, 128, 8):           # prefer MXU-friendly tiles
        t = _aligned_divisor(total, cap, align)
        if t is not None:
            return t
    return total                          # no aligned divisor; full extent


def _choose_tiles(B, d_in, d_sae, ce, oe, budget, acc_in_out):
    # Per-unit-tb bytes: acts (2 buffers), decoded out (2 buffers), acc scratch.
    per_tb = 2 * d_in * ce + 2 * d_in * oe + (0 if acc_in_out else 4 * d_in)
    tb_cap = max(128, min(512, (budget // 2) // max(per_tb, 1)))
    tb = _pick_dim_tile(B, tb_cap)

    fixed = tb * per_tb
    # Per-unit-ts bytes: W_enc + W_dec tiles (2 buffers each), encoded out, b_enc.
    per_ts = 4 * d_in * ce + 2 * tb * oe + 2 * 4
    ts_cap = max(128, (budget - fixed) // max(per_ts, 1))
    ts = _pick_dim_tile(d_sae, ts_cap)
    return tb, ts


# ----------------------------------------------------------------------------
# Wrapper: forward(acts, output_features=True) -> (decoded, encoded)
# ----------------------------------------------------------------------------
def sae_forward(acts, w_enc, b_enc, b_dec, w_dec, *,
                tb=None, ts=None, compute_dtype=jnp.bfloat16,
                inv_norm=None, vmem_limit_bytes=None):
    B, d_in = acts.shape
    d_in_w, d_sae = w_enc.shape
    assert d_in_w == d_in and w_dec.shape == (d_sae, d_in)

    out_dtype = acts.dtype
    acc_in_out = (out_dtype == jnp.float32)

    # Fold the W_dec column normalization (norm over dim=0, i.e. over d_sae)
    # into the decode epilogue: enc @ (W_dec/(n+eps)) == (enc @ W_dec)*(1/(n+eps)).
    # Pass inv_norm precomputed when weights are reused across calls.
    if inv_norm is None:
        w32 = w_dec.astype(jnp.float32)
        inv_norm = 1.0 / (jnp.sqrt(jnp.sum(w32 * w32, axis=0, keepdims=True))
                          + 1e-8)
    inv_norm = inv_norm.reshape(1, d_in).astype(jnp.float32)

    b_dec2 = b_dec.reshape(1, d_in).astype(jnp.float32)
    # Fold b_dec into an effective encoder bias (f32):
    #   relu((x - b_dec) @ W_enc + b_enc) == relu(x @ W_enc + (b_enc - b_dec @ W_enc))
    b_enc_eff = (b_enc.astype(jnp.float32).reshape(1, d_sae)
                 - b_dec.astype(jnp.float32) @ w_enc.astype(jnp.float32))

    # Operands streamed in the matmul compute dtype (halves DMA traffic if bf16).
    x_c = acts.astype(compute_dtype)
    w_enc_c = w_enc.astype(compute_dtype)
    w_dec_c = w_dec.astype(compute_dtype)

    ce = jnp.dtype(compute_dtype).itemsize
    oe = jnp.dtype(out_dtype).itemsize

    vmem_cap = _detect_vmem_capacity()
    if vmem_limit_bytes is None:
        vmem_limit_bytes = min(int(0.85 * vmem_cap), 100 * 1024 * 1024)
    tile_budget = int(0.8 * vmem_limit_bytes)

    if tb is None or ts is None:
        tb_auto, ts_auto = _choose_tiles(B, d_in, d_sae, ce, oe,
                                         tile_budget, acc_in_out)
        tb = tb_auto if tb is None else tb
        ts = ts_auto if ts is None else ts
    assert B % tb == 0 and d_sae % ts == 0

    kernel = functools.partial(_sae_fwd_kernel, acc_in_out=acc_in_out)
    scratch = [] if acc_in_out else [pltpu.VMEM((tb, d_in), jnp.float32)]

    decoded, encoded = pl.pallas_call(
        kernel,
        out_shape=(jax.ShapeDtypeStruct((B, d_in), out_dtype),
                   jax.ShapeDtypeStruct((B, d_sae), out_dtype)),
        grid_spec=pltpu.PrefetchScalarGridSpec(
            num_scalar_prefetch=0,
            grid=(B // tb, d_sae // ts),          # (batch, d_sae) — reduction last
            in_specs=[
                pl.BlockSpec((tb, d_in), lambda i, s: (i, 0)),   # acts tile
                pl.BlockSpec((d_in, ts), lambda i, s: (0, s)),   # W_enc tile
                pl.BlockSpec((1, ts),    lambda i, s: (0, s)),   # b_enc_eff tile
                pl.BlockSpec((1, d_in),  lambda i, s: (0, 0)),   # b_dec
                pl.BlockSpec((1, d_in),  lambda i, s: (0, 0)),   # inv col norm
                pl.BlockSpec((ts, d_in), lambda i, s: (s, 0)),   # W_dec tile
            ],
            out_specs=[
                pl.BlockSpec((tb, d_in), lambda i, s: (i, 0)),   # decoded (acc)
                pl.BlockSpec((tb, ts),   lambda i, s: (i, s)),   # encoded
            ],
            scratch_shapes=scratch,
        ),
        compiler_params=pltpu.CompilerParams(
            dimension_semantics=("parallel", "arbitrary"),
            vmem_limit_bytes=int(vmem_limit_bytes)),
    )(x_c, w_enc_c, b_enc_eff, b_dec2, inv_norm, w_dec_c)
    return decoded, encoded


# ----------------------------------------------------------------------------
# Deterministic parameter init (mirrors the module __init__).
# ----------------------------------------------------------------------------
def init_params(key, d_in, d_sae, dtype=jnp.float32):
    k_enc, k_dec = jax.random.split(key)
    # kaiming_uniform_(W_enc, mode='fan_in', nonlinearity='relu'):
    # fan_in = W_enc.size(1) = d_sae; bound = sqrt(2) * sqrt(3 / fan_in)
    bound = math.sqrt(6.0 / d_sae)
    w_enc = jax.random.uniform(k_enc, (d_in, d_sae), dtype,
                               minval=-bound, maxval=bound)
    # orthogonal_(W_dec): semi-orthogonal (d_sae, d_in) via QR of a Gaussian.
    g = jax.random.normal(k_dec, (d_sae, d_in), dtype)
    w_dec, _ = jnp.linalg.qr(g)
    w_dec = w_dec.astype(dtype)
    b_enc = jnp.zeros((d_sae,), dtype)
    b_dec = jnp.zeros((d_in,), dtype)
    return w_enc, w_dec, b_enc, b_dec


def reference_forward(acts, w_enc, b_enc, b_dec, w_dec):
    x = acts.astype(jnp.float32)
    enc = jnp.maximum((x - b_dec) @ w_enc + b_enc, 0.0)
    w_dec_n = w_dec / (jnp.linalg.norm(w_dec, axis=0, keepdims=True) + 1e-8)
    dec = enc @ w_dec_n + b_dec
    return dec, enc


if __name__ == "__main__":
    # Small but tile-friendly shapes.
    B, d_in, d_sae = 256, 128, 1024
    key = jax.random.PRNGKey(0)
    k_x, k_p, k_be, k_bd = jax.random.split(key, 4)

    acts = jax.random.normal(k_x, (B, d_in), jnp.float32)
    w_enc, w_dec, b_enc, b_dec = init_params(k_p, d_in, d_sae)
    # Module inits biases to zero; use small non-zero values to exercise the
    # full (x - b_dec) / (+ b_dec) data path.
    b_enc = 0.01 * jax.random.normal(k_be, (d_sae,), jnp.float32)
    b_enc = b_enc.astype(jnp.float32)
    b_dec = 0.01 * jax.random.normal(k_bd, (d_in,), jnp.float32)
    b_dec = b_dec.astype(jnp.float32)

    ref_dec, ref_enc = reference_forward(acts, w_enc, b_enc, b_dec, w_dec)

    # --- Test A: exact-semantics check (f32 compute, auto tiles) -------------
    fwd_f32 = jax.jit(functools.partial(sae_forward, compute_dtype=jnp.float32))
    dec_a, enc_a = fwd_f32(acts, w_enc, b_enc, b_dec, w_dec)
    jax.block_until_ready((dec_a, enc_a))
    assert dec_a.shape == (B, d_in) and enc_a.shape == (B, d_sae)
    assert jnp.allclose(enc_a, ref_enc, atol=1e-4, rtol=1e-4), (
        float(jnp.max(jnp.abs(enc_a - ref_enc))))
    assert jnp.allclose(dec_a, ref_dec, atol=1e-4, rtol=1e-4), (
        float(jnp.max(jnp.abs(dec_a - ref_dec))))

    # --- Test B: bf16 compute (default), forced tiling grid = (2, 4) ---------
    fwd_bf16 = jax.jit(functools.partial(sae_forward, tb=128, ts=256))
    dec_b, enc_b = fwd_bf16(acts, w_enc, b_enc, b_dec, w_dec)
    jax.block_until_ready((dec_b, enc_b))
    assert jnp.allclose(enc_b, ref_enc, atol=5e-2, rtol=5e-2), (
        float(jnp.max(jnp.abs(enc_b - ref_enc))))
    assert jnp.allclose(dec_b, ref_dec, atol=5e-2, rtol=5e-2), (
        float(jnp.max(jnp.abs(dec_b - ref_dec))))

    # --- Test C: bf16 activations/output (exercises the scratch-acc path) ----
    fwd_def = jax.jit(sae_forward)
    dec_c, enc_c = fwd_def(acts.astype(jnp.bfloat16), w_enc, b_enc, b_dec, w_dec)
    jax.block_until_ready((dec_c, enc_c))
    assert dec_c.dtype == jnp.bfloat16 and enc_c.dtype == jnp.bfloat16
    assert jnp.allclose(enc_c.astype(jnp.float32), ref_enc, atol=6e-2, rtol=6e-2), (
        float(jnp.max(jnp.abs(enc_c.astype(jnp.float32) - ref_enc))))
    assert jnp.allclose(dec_c.astype(jnp.float32), ref_dec, atol=6e-2, rtol=6e-2), (
        float(jnp.max(jnp.abs(dec_c.astype(jnp.float32) - ref_dec))))

    print("KERNEL_OK")
</pallas_src>

<mosaic_0001>
module attributes {stable_mosaic.version = 11 : i64} {
  func.func @_sae_fwd_kernel(%arg0: i32, %arg1: i32, %arg2: memref<256x128xf32, #tpu.memory_space<vmem>>, %arg3: memref<128x1024xf32, #tpu.memory_space<vmem>>, %arg4: memref<1x1024xf32, #tpu.memory_space<vmem>>, %arg5: memref<1x128xf32, #tpu.memory_space<vmem>>, %arg6: memref<1x128xf32, #tpu.memory_space<vmem>>, %arg7: memref<1024x128xf32, #tpu.memory_space<vmem>>, %arg8: memref<256x128xf32, #tpu.memory_space<vmem>>, %arg9: memref<256x1024xf32, #tpu.memory_space<vmem>>) attributes {dimension_semantics = [#tpu.dimension_semantics<parallel>, #tpu.dimension_semantics<arbitrary>], iteration_bounds = array<i64: 1, 1>, scalar_prefetch = 0 : i64, scratch_operands = 0 : i64, tpu.core_type = #tpu.core_type<tc>, window_params = [{transform_indices = @transform_0, window_bounds = array<i64: 256, 128>}, {transform_indices = @transform_1, window_bounds = array<i64: 128, 1024>}, {transform_indices = @transform_2, window_bounds = array<i64: 1, 1024>}, {pipeline_mode = #tpu.pipeline_mode<synchronous>, transform_indices = @transform_3, window_bounds = array<i64: 1, 128>}, {pipeline_mode = #tpu.pipeline_mode<synchronous>, transform_indices = @transform_4, window_bounds = array<i64: 1, 128>}, {transform_indices = @transform_5, window_bounds = array<i64: 1024, 128>}, {transform_indices = @transform_6, window_bounds = array<i64: 256, 128>}, {transform_indices = @transform_7, window_bounds = array<i64: 256, 1024>}]} {
    %c0_i32 = arith.constant 0 : i32
    %0 = arith.cmpi eq, %arg1, %c0_i32 : i32
    %1 = arith.extui %0 : i1 to i32
    %c0_i32_0 = arith.constant 0 : i32
    %2 = arith.cmpi ne, %1, %c0_i32_0 : i32
    scf.if %2 {
      %cst_18 = arith.constant 0.000000e+00 : f32
      %20 = vector.broadcast %cst_18 : f32 to vector<256x128xf32>
      %c0_19 = arith.constant 0 : index
      %c0_20 = arith.constant 0 : index
      %21 = vector.load %arg8[%c0_19, %c0_20] : memref<256x128xf32, #tpu.memory_space<vmem>>, vector<256x128xf32>
      tpu.vector_store %arg8[%c0_19, %c0_20], %20 {strides = array<i32>} : memref<256x128xf32, #tpu.memory_space<vmem>>, vector<256x128xf32>,
    } else {
    }
    %c0 = arith.constant 0 : index
    %c0_1 = arith.constant 0 : index
    %3 = vector.load %arg2[%c0, %c0_1] : memref<256x128xf32, #tpu.memory_space<vmem>>, vector<256x128xf32>
    %c0_2 = arith.constant 0 : index
    %c0_3 = arith.constant 0 : index
    %4 = vector.load %arg3[%c0_2, %c0_3] : memref<128x1024xf32, #tpu.memory_space<vmem>>, vector<128x1024xf32>
    %cst = arith.constant dense<0.000000e+00> : vector<256x1024xf32>
    %5 = tpu.matmul %3, %4, %cst {dimension_numbers = #tpu.dot_dimension_numbers<[1], [0], [0], [1], [0, 0, 1, 1], [], []>} : vector<256x128xf32>, vector<128x1024xf32>, vector<256x1024xf32> -> vector<256x1024xf32>
    %c0_4 = arith.constant 0 : index
    %c0_5 = arith.constant 0 : index
    %6 = vector.load %arg4[%c0_4, %c0_5] : memref<1x1024xf32, #tpu.memory_space<vmem>>, vector<1x1024xf32>
    %7 = vector.broadcast %6 : vector<1x1024xf32> to vector<256x1024xf32>
    %8 = arith.addf %5, %7 : vector<256x1024xf32>
    %cst_6 = arith.constant 0.000000e+00 : f32
    %9 = vector.broadcast %cst_6 : f32 to vector<256x1024xf32>
    %10 = arith.maximumf %8, %9 : vector<256x1024xf32>
    %c0_7 = arith.constant 0 : index
    %c0_8 = arith.constant 0 : index
    %11 = vector.load %arg9[%c0_7, %c0_8] : memref<256x1024xf32, #tpu.memory_space<vmem>>, vector<256x1024xf32>
    tpu.vector_store %arg9[%c0_7, %c0_8], %10 {strides = array<i32>} : memref<256x1024xf32, #tpu.memory_space<vmem>>, vector<256x1024xf32>,
    %c0_9 = arith.constant 0 : index
    %c0_10 = arith.constant 0 : index
    %12 = vector.load %arg8[%c0_9, %c0_10] : memref<256x128xf32, #tpu.memory_space<vmem>>, vector<256x128xf32>
    %c0_11 = arith.constant 0 : index
    %c0_12 = arith.constant 0 : index
    %13 = vector.load %arg7[%c0_11, %c0_12] : memref<1024x128xf32, #tpu.memory_space<vmem>>, vector<1024x128xf32>
    %cst_13 = arith.constant dense<0.000000e+00> : vector<256x128xf32>
    %14 = tpu.matmul %10, %13, %cst_13 {dimension_numbers = #tpu.dot_dimension_numbers<[1], [0], [0], [1], [0, 0, 1, 1], [], []>} : vector<256x1024xf32>, vector<1024x128xf32>, vector<256x128xf32> -> vector<256x128xf32>
    %15 = arith.addf %12, %14 : vector<256x128xf32>
    %c0_14 = arith.constant 0 : index
    %c0_15 = arith.constant 0 : index
    %16 = vector.load %arg8[%c0_14, %c0_15] : memref<256x128xf32, #tpu.memory_space<vmem>>, vector<256x128xf32>
    tpu.vector_store %arg8[%c0_14, %c0_15], %15 {strides = array<i32>} : memref<256x128xf32, #tpu.memory_space<vmem>>, vector<256x128xf32>,
    %c0_i32_16 = arith.constant 0 : i32
    %17 = arith.cmpi eq, %arg1, %c0_i32_16 : i32
    %18 = arith.extui %17 : i1 to i32
    %c0_i32_17 = arith.constant 0 : i32
    %19 = arith.cmpi ne, %18, %c0_i32_17 : i32
    scf.if %19 {
      %c0_18 = arith.constant 0 : index
      %c0_19 = arith.constant 0 : index
      %20 = vector.load %arg8[%c0_18, %c0_19] : memref<256x128xf32, #tpu.memory_space<vmem>>, vector<256x128xf32>
      %c0_20 = arith.constant 0 : index
      %c0_21 = arith.constant 0 : index
      %21 = vector.load %arg6[%c0_20, %c0_21] : memref<1x128xf32, #tpu.memory_space<vmem>>, vector<1x128xf32>
      %22 = vector.broadcast %21 : vector<1x128xf32> to vector<256x128xf32>
      %23 = arith.mulf %20, %22 : vector<256x128xf32>
      %c0_22 = arith.constant 0 : index
      %c0_23 = arith.constant 0 : index
      %24 = vector.load %arg5[%c0_22, %c0_23] : memref<1x128xf32, #tpu.memory_space<vmem>>, vector<1x128xf32>
      %25 = vector.broadcast %24 : vector<1x128xf32> to vector<256x128xf32>
      %26 = arith.addf %23, %25 : vector<256x128xf32>
      %c0_24 = arith.constant 0 : index
      %c0_25 = arith.constant 0 : index
      %27 = vector.load %arg8[%c0_24, %c0_25] : memref<256x128xf32, #tpu.memory_space<vmem>>, vector<256x128xf32>
      tpu.vector_store %arg8[%c0_24, %c0_25], %26 {strides = array<i32>} : memref<256x128xf32, #tpu.memory_space<vmem>>, vector<256x128xf32>,
    } else {
    }
    return
  }
  func.func @transform_0(%arg0: i32, %arg1: i32) -> (i32, i32) {
    %c0_i32 = arith.constant 0 : i32
    %c0_i32_0 = arith.constant 0 : i32
    return %arg0, %c0_i32 : i32, i32
  }
  func.func @transform_1(%arg0: i32, %arg1: i32) -> (i32, i32) {
    %c0_i32 = arith.constant 0 : i32
    %c0_i32_0 = arith.constant 0 : i32
    return %c0_i32, %arg1 : i32, i32
  }
  func.func @transform_2(%arg0: i32, %arg1: i32) -> (i32, i32) {
    %c0_i32 = arith.constant 0 : i32
    %c0_i32_0 = arith.constant 0 : i32
    return %c0_i32, %arg1 : i32, i32
  }
  func.func @transform_3(%arg0: i32, %arg1: i32) -> (i32, i32) {
    %c0_i32 = arith.constant 0 : i32
    %c0_i32_0 = arith.constant 0 : i32
    %c0_i32_1 = arith.constant 0 : i32
    return %c0_i32, %c0_i32_0 : i32, i32
  }
  func.func @transform_4(%arg0: i32, %arg1: i32) -> (i32, i32) {
    %c0_i32 = arith.constant 0 : i32
    %c0_i32_0 = arith.constant 0 : i32
    %c0_i32_1 = arith.constant 0 : i32
    return %c0_i32, %c0_i32_0 : i32, i32
  }
  func.func @transform_5(%arg0: i32, %arg1: i32) -> (i32, i32) {
    %c0_i32 = arith.constant 0 : i32
    %c0_i32_0 = arith.constant 0 : i32
    return %arg1, %c0_i32 : i32, i32
  }
  func.func @transform_6(%arg0: i32, %arg1: i32) -> (i32, i32) {
    %c0_i32 = arith.constant 0 : i32
    %c0_i32_0 = arith.constant 0 : i32
    return %arg0, %c0_i32 : i32, i32
  }
  func.func @transform_7(%arg0: i32, %arg1: i32) -> (i32, i32) {
    %c0_i32 = arith.constant 0 : i32
    return %arg0, %arg1 : i32, i32
  }
}

</mosaic_0001>

<bundles_post_ra>
// kernel: sub.0
= control target key start
LH: loop header
LB: loop body
LE: loop exit
PB: predicated region body
PF: predicated region fallthrough
CT: control target
= control target key end

     0   :  { %s34_s0 = inlined_call_operand.vmem [shape: f32[1024], index: 0, kind: input, shape index: {}]   ;;  %s35_s1 = inlined_call_operand.vmem [shape: f32[1024], index: 1, kind: input, shape index: {}]   ;;  %s36_s2 = inlined_call_operand.vmem [shape: f32[1024], index: 2, kind: output, shape index: {}]  }
   0x1   :  { %v3_v0 = vld [vmem:[%s34_s0] sm:$0xff] }
   0x2   :  { %v4_v1 = vld [vmem:[%s35_s1] sm:$0xff] }
   0x3   :  { %v7_v2 = vsub.f32 %v3_v0, %v4_v1 }
   0x5   :  { %9 = vst [vmem:[%s36_s2] sm:$0xff] %v7_v2 }

// kernel: sae_forward.1
= control target key start
LH: loop header
LB: loop body
LE: loop exit
PB: predicated region body
PF: predicated region fallthrough
CT: control target
= control target key end

     0   :  { %13 = vsyncpa [#allocation3], 0  ;;  %s7018_s0 = inlined_call_operand.hbm [shape: f32[256,128], index: 0, kind: input, shape index: {}]   ;;  %s7019_s1 = inlined_call_operand.vmem [shape: f32[128,1024], index: 1, kind: input, shape index: {}]   ;;  %s7020_s2 = inlined_call_operand.vmem [shape: f32[1,1024], index: 2, kind: input, shape index: {}]   ;;  %s7021_s3 = inlined_call_operand.vmem [shape: f32[1,128], index: 3, kind: input, shape index: {}]   ;;  %s7022_s4 = inlined_call_operand.vmem [shape: f32[1,128], index: 4, kind: input, shape index: {}]   ;;  %s7023_s5 = inlined_call_operand.vmem [shape: f32[1024,128], index: 5, kind: input, shape index: {}]   ;;  %s7024_s6 = inlined_call_operand.hbm [shape: f32[256,128], index: 6, kind: output, shape index: {0}]   ;;  %s7025_s7 = inlined_call_operand.hbm [shape: f32[256,1024], index: 7, kind: output, shape index: {1}]  }
   0x1   :  { %14 = vsyncpa [#allocation4], 0 }
   0x2   :  { %15 = vsyncpa [#allocation7], 0  ;;  %s3525_s24 = smov [#allocation2]   ;;  %s3453_s28 = scalar_lea.hbm %s7018_s0, 4096 }
   0x3   :  { %s21_s25 = sshll.u32 %s3525_s24, 4  ;;  %p3454_p0 = scmp.ne.s32.totalorder %s7018_s0, %s3453_s28  ;;  %s22_s25 = int_to_ptr.vmem [resolvable:$true] %s21_s25 }
   0x4   :  { %p3457_p1 = scmp.lt.u32.totalorder %s3453_s28, %s7018_s0 }
   0x6   :  { %p3459_p2 = pnand %p3457_p1, %p3454_p0 }
   0x8   :  { %3462 = shalt.err (!%p3459_p2)
}
   0x9   :  { %s3463_s10 = scalar_lea.vmem %s22_s25, 4096  ;;  %p3468_p4 = scmp.lt.s32.totalorder %s22_s25, %s22_s25 }
   0xa   :  { %p3464_p3 = scmp.ne.s32.totalorder %s22_s25, %s3463_s10  ;;  %p3469_p5 = scmp.lt.s32.totalorder %s3463_s10, %s3463_s10 }
   0xc   :  { %p3470_p6 = por %p3469_p5, %p3468_p4 }
   0xe   :  { %p3471_p7 = pnand %p3470_p6, %p3464_p3 }
  0x10   :  { %3474 = shalt.err (!%p3471_p7)
}
  0x11   :  { %s3526_s11 = smov 128   ;;  %s3527_s12 = smov 8  }
  0x12   :  { %27 = dma.hbm_to_vmem [thread:$0]  %s7018_s0, 4096, %s22_s25, [#allocation3], %s3526_s11, %s3526_s11, %s3527_s12  }
  0x13   :  { %3519 = dma.done.wait [#allocation3], 4096  }
  0x14   :  { %3520 = vsyncadd [#allocation3], 4294963200  ;;  %v3528_v0 = vmov 0.0   ;;  %v110_v1 = vld [vmem:[%s7019_s1 + $0x8] sm:$0xff]  ;;  %v112_v3 = vld [vmem:[%s7019_s1 + $0x18] sm:$0xff]  ;;  %s3530_s15 = smov [#allocation6]  }
  0x15   :  { %343 = vmatprep.mubr.f32.mxu0 %v3528_v0  ;;  %600 = vmatprep.mubr.f32.mxu1 %v3528_v0  ;;  %v118_v2 = vld [vmem:[%s7019_s1 + $0x48] sm:$0xff]  ;;  %v120_v5 = vld [vmem:[%s7019_s1 + $0x58] sm:$0xff]  ;;  %v109_v6 = vld [vmem:[%s7019_s1] sm:$0xff]  ;;  %s3105_s16 = sshll.u32 %s3530_s15, 4  ;;  %s3106_s16 = int_to_ptr.vmem [resolvable:$true] %s3105_s16 }
  0x16   :  { %v3123_v4 = vpack.c.bf16 %v118_v2, %v110_v1  ;;  %v117_v7 = vld [vmem:[%s7019_s1 + $0x40] sm:$0xff]  ;;  %v3155_v8 = vpack.c.bf16 %v120_v5, %v112_v3  ;;  %v111_v10 = vld [vmem:[%s7019_s1 + $0x10] sm:$0xff]  ;;  %v126_v12 = vld [vmem:[%s7019_s1 + $0x88] sm:$0xff]  ;;  %p3480_p9 = scmp.lt.s32.totalorder %s3106_s16, %s3106_s16 }
  0x17   :  { %v3125_v9 = vpack.c.bf16 %v117_v7, %v109_v6  ;;  %v119_v11 = vld [vmem:[%s7019_s1 + $0x50] sm:$0xff]  ;;  %v134_v14 = vld [vmem:[%s7019_s1 + $0xc8] sm:$0xff]  ;;  %v128_v15 = vld [vmem:[%s7019_s1 + $0x98] sm:$0xff] }
  0x18   :  { %3124 = vmatprep.subr.bf16.mxu0 %v3123_v4  ;;  %v3157_v13 = vpack.c.bf16 %v119_v11, %v111_v10  ;;  %v136_v16 = vld [vmem:[%s7019_s1 + $0xd8] sm:$0xff]  ;;  %3156 = vmatprep.subr.bf16.mxu1 %v3155_v8  ;;  %v3127_v17 = vpack.c.bf16 %v134_v14, %v126_v12  ;;  %v125_v19 = vld [vmem:[%s7019_s1 + $0x80] sm:$0xff]  ;;  %v127_v21 = vld [vmem:[%s7019_s1 + $0x90] sm:$0xff] }
  0x19   :  { %3126 = vmatpush1.bf16.msra.mxu0 %v3125_v9  ;;  %v3159_v18 = vpack.c.bf16 %v136_v16, %v128_v15  ;;  %v133_v20 = vld [vmem:[%s7019_s1 + $0xc0] sm:$0xff]  ;;  %v135_v23 = vld [vmem:[%s7019_s1 + $0xd0] sm:$0xff]  ;;  %v142_v24 = vld [vmem:[%s7019_s1 + $0x108] sm:$0xff] }
  0x1a   :  { %3158 = vmatpush1.bf16.msra.mxu1 %v3157_v13  ;;  %v3129_v22 = vpack.c.bf16 %v133_v20, %v125_v19  ;;  %v150_v25 = vld [vmem:[%s7019_s1 + $0x148] sm:$0xff]  ;;  %3128 = vmatprep.subr.bf16.mxu0 %v3127_v17  ;;  %v3161_v26 = vpack.c.bf16 %v135_v23, %v127_v21  ;;  %v144_v28 = vld [vmem:[%s7019_s1 + $0x118] sm:$0xff]  ;;  %v141_v30 = vld [vmem:[%s7019_s1 + $0x100] sm:$0xff] }
  0x1b   :  { %3160 = vmatprep.subr.bf16.mxu1 %v3159_v18  ;;  %v3131_v27 = vpack.c.bf16 %v150_v25, %v142_v24  ;;  %v152_v29 = vld [vmem:[%s7019_s1 + $0x158] sm:$0xff]  ;;  %v149_v32 = vld [vmem:[%s7019_s1 + $0x140] sm:$0xff]  ;;  %v143_v33 = vld [vmem:[%s7019_s1 + $0x110] sm:$0xff] }
  0x1c   :  { %v3163_v31 = vpack.c.bf16 %v152_v29, %v144_v28  ;;  %v151_v34 = vld [vmem:[%s7019_s1 + $0x150] sm:$0xff]  ;;  %v3133_v35 = vpack.c.bf16 %v149_v32, %v141_v30  ;;  %v158_v36 = vld [vmem:[%s7019_s1 + $0x188] sm:$0xff]  ;;  %v160_v38 = vld [vmem:[%s7019_s1 + $0x198] sm:$0xff] }
  0x1d   :  { %3130 = vmatpush1.bf16.msra.mxu0 %v3129_v22  ;;  %v166_v37 = vld [vmem:[%s7019_s1 + $0x1c8] sm:$0xff]  ;;  %v3165_v39 = vpack.c.bf16 %v151_v34, %v143_v33  ;;  %v168_v41 = vld [vmem:[%s7019_s1 + $0x1d8] sm:$0xff]  ;;  %v157_v42 = vld [vmem:[%s7019_s1 + $0x180] sm:$0xff] }
  0x1e   :  { %3162 = vmatpush1.bf16.msra.mxu1 %v3161_v26  ;;  %3132 = vmatprep.subr.bf16.mxu0 %v3131_v27  ;;  %v3135_v40 = vpack.c.bf16 %v166_v37, %v158_v36  ;;  %v165_v43 = vld [vmem:[%s7019_s1 + $0x1c0] sm:$0xff]  ;;  %v3167_v44 = vpack.c.bf16 %v168_v41, %v160_v38  ;;  %v159_v45 = vld [vmem:[%s7019_s1 + $0x190] sm:$0xff]  ;;  %v174_v47 = vld [vmem:[%s7019_s1 + $0x208] sm:$0xff] }
  0x1f   :  { %3164 = vmatprep.subr.bf16.mxu1 %v3163_v31  ;;  %v167_v46 = vld [vmem:[%s7019_s1 + $0x1d0] sm:$0xff]  ;;  %v182_v48 = vld [vmem:[%s7019_s1 + $0x248] sm:$0xff]  ;;  %v176_v49 = vld [vmem:[%s7019_s1 + $0x218] sm:$0xff]  ;;  %v3137_v51 = vpack.c.bf16 %v165_v43, %v157_v42 }
  0x20   :  { %v184_v50 = vld [vmem:[%s7019_s1 + $0x258] sm:$0xff]  ;;  %v3169_v52 = vpack.c.bf16 %v167_v46, %v159_v45  ;;  %v3139_v53 = vpack.c.bf16 %v182_v48, %v174_v47  ;;  %v173_v54 = vld [vmem:[%s7019_s1 + $0x200] sm:$0xff]  ;;  %v175_v56 = vld [vmem:[%s7019_s1 + $0x210] sm:$0xff] }
  0x21   :  { %3134 = vmatpush1.bf16.msra.mxu0 %v3133_v35  ;;  %v181_v55 = vld [vmem:[%s7019_s1 + $0x240] sm:$0xff]  ;;  %v3171_v57 = vpack.c.bf16 %v184_v50, %v176_v49  ;;  %v183_v58 = vld [vmem:[%s7019_s1 + $0x250] sm:$0xff]  ;;  %v190_v59 = vld [vmem:[%s7019_s1 + $0x288] sm:$0xff] }
  0x22   :  { %3166 = vmatpush1.bf16.msra.mxu1 %v3165_v39  ;;  %3136 = vmatprep.subr.bf16.mxu0 %v3135_v40  ;;  %v198_v60 = vld [vmem:[%s7019_s1 + $0x2c8] sm:$0xff]  ;;  %v192_v61 = vld [vmem:[%s7019_s1 + $0x298] sm:$0xff]  ;;  %v3141_v63 = vpack.c.bf16 %v181_v55, %v173_v54  ;;  %v3173_v1 = vpack.c.bf16 %v183_v58, %v175_v56  ;;  %v189_v3 = vld [vmem:[%s7019_s1 + $0x280] sm:$0xff] }
  0x23   :  { %3168 = vmatprep.subr.bf16.mxu1 %v3167_v44  ;;  %v200_v62 = vld [vmem:[%s7019_s1 + $0x2d8] sm:$0xff]  ;;  %v3143_v2 = vpack.c.bf16 %v198_v60, %v190_v59  ;;  %v197_v4 = vld [vmem:[%s7019_s1 + $0x2c0] sm:$0xff]  ;;  %v191_v5 = vld [vmem:[%s7019_s1 + $0x290] sm:$0xff] }
  0x24   :  { %v3175_v6 = vpack.c.bf16 %v200_v62, %v192_v61  ;;  %v199_v7 = vld [vmem:[%s7019_s1 + $0x2d0] sm:$0xff]  ;;  %v206_v8 = vld [vmem:[%s7019_s1 + $0x308] sm:$0xff]  ;;  %v208_v10 = vld [vmem:[%s7019_s1 + $0x318] sm:$0xff]  ;;  %v3145_v12 = vpack.c.bf16 %v197_v4, %v189_v3 }
  0x25   :  { %3138 = vmatpush1.bf16.msra.mxu0 %v3137_v51  ;;  %v214_v9 = vld [vmem:[%s7019_s1 + $0x348] sm:$0xff]  ;;  %v216_v11 = vld [vmem:[%s7019_s1 + $0x358] sm:$0xff]  ;;  %v3177_v13 = vpack.c.bf16 %v199_v7, %v191_v5  ;;  %v205_v15 = vld [vmem:[%s7019_s1 + $0x300] sm:$0xff] }
  0x26   :  { %3170 = vmatpush1.bf16.msra.mxu1 %v3169_v52  ;;  %3140 = vmatprep.subr.bf16.mxu0 %v3139_v53  ;;  %v3147_v14 = vpack.c.bf16 %v214_v9, %v206_v8  ;;  %v213_v16 = vld [vmem:[%s7019_s1 + $0x340] sm:$0xff]  ;;  %v207_v17 = vld [vmem:[%s7019_s1 + $0x310] sm:$0xff]  ;;  %v3179_v18 = vpack.c.bf16 %v216_v11, %v208_v10  ;;  %v222_v20 = vld [vmem:[%s7019_s1 + $0x388] sm:$0xff] }
  0x27   :  { %3172 = vmatprep.subr.bf16.mxu1 %v3171_v57  ;;  %v215_v19 = vld [vmem:[%s7019_s1 + $0x350] sm:$0xff]  ;;  %v230_v21 = vld [vmem:[%s7019_s1 + $0x3c8] sm:$0xff]  ;;  %v224_v22 = vld [vmem:[%s7019_s1 + $0x398] sm:$0xff]  ;;  %v3149_v24 = vpack.c.bf16 %v213_v16, %v205_v15 }
  0x28   :  { %v232_v23 = vld [vmem:[%s7019_s1 + $0x3d8] sm:$0xff]  ;;  %v3181_v25 = vpack.c.bf16 %v215_v19, %v207_v17  ;;  %v3151_v26 = vpack.c.bf16 %v230_v21, %v222_v20  ;;  %v221_v27 = vld [vmem:[%s7019_s1 + $0x380] sm:$0xff]  ;;  %v223_v29 = vld [vmem:[%s7019_s1 + $0x390] sm:$0xff] }
  0x29   :  { %3142 = vmatpush1.bf16.msra.mxu0 %v3141_v63  ;;  %v229_v28 = vld [vmem:[%s7019_s1 + $0x3c0] sm:$0xff]  ;;  %v3183_v30 = vpack.c.bf16 %v232_v23, %v224_v22  ;;  %v231_v31 = vld [vmem:[%s7019_s1 + $0x3d0] sm:$0xff]  ;;  %v114_v32 = vld [vmem:[%s7019_s1 + $0x28] sm:$0xff] }
  0x2a   :  { %3174 = vmatpush1.bf16.msra.mxu1 %v3173_v1  ;;  %3144 = vmatprep.subr.bf16.mxu0 %v3143_v2  ;;  %v122_v33 = vld [vmem:[%s7019_s1 + $0x68] sm:$0xff]  ;;  %v116_v34 = vld [vmem:[%s7019_s1 + $0x38] sm:$0xff]  ;;  %v3153_v36 = vpack.c.bf16 %v229_v28, %v221_v27  ;;  %v3185_v37 = vpack.c.bf16 %v231_v31, %v223_v29  ;;  %v113_v39 = vld [vmem:[%s7019_s1 + $0x20] sm:$0xff] }
  0x2b   :  { %3176 = vmatprep.subr.bf16.mxu1 %v3175_v6  ;;  %v124_v35 = vld [vmem:[%s7019_s1 + $0x78] sm:$0xff]  ;;  %v3187_v38 = vpack.c.bf16 %v122_v33, %v114_v32  ;;  %v121_v40 = vld [vmem:[%s7019_s1 + $0x60] sm:$0xff]  ;;  %v115_v42 = vld [vmem:[%s7019_s1 + $0x30] sm:$0xff] }
  0x2c   :  { %v3219_v41 = vpack.c.bf16 %v124_v35, %v116_v34  ;;  %v123_v43 = vld [vmem:[%s7019_s1 + $0x70] sm:$0xff]  ;;  %v130_v44 = vld [vmem:[%s7019_s1 + $0xa8] sm:$0xff]  ;;  %v3813_v46 = vld [vmem:[#allocation2] sm:$0xff]  ;;  %v3189_v47 = vpack.c.bf16 %v121_v40, %v113_v39 }
  0x2d   :  { %3146 = vmatpush1.bf16.msra.mxu0 %v3145_v12  ;;  %v138_v45 = vld [vmem:[%s7019_s1 + $0xe8] sm:$0xff]  ;;  %v132_v48 = vld [vmem:[%s7019_s1 + $0xb8] sm:$0xff]  ;;  %v3221_v50 = vpack.c.bf16 %v123_v43, %v115_v42  ;;  %v129_v52 = vld [vmem:[%s7019_s1 + $0xa0] sm:$0xff] }
  0x2e   :  { %3178 = vmatpush1.bf16.msra.mxu1 %v3177_v13  ;;  %3148 = vmatprep.subr.bf16.mxu0 %v3147_v14  ;;  %v140_v49 = vld [vmem:[%s7019_s1 + $0xf8] sm:$0xff]  ;;  %v3191_v51 = vpack.c.bf16 %v138_v45, %v130_v44  ;;  %v137_v53 = vld [vmem:[%s7019_s1 + $0xe0] sm:$0xff]  ;;  %v131_v54 = vld [vmem:[%s7019_s1 + $0xb0] sm:$0xff] }
  0x2f   :  { %3180 = vmatprep.subr.bf16.mxu1 %v3179_v18  ;;  %v3223_v55 = vpack.c.bf16 %v140_v49, %v132_v48  ;;  %v139_v56 = vld [vmem:[%s7019_s1 + $0xf0] sm:$0xff]  ;;  %v146_v57 = vld [vmem:[%s7019_s1 + $0x128] sm:$0xff]  ;;  %v148_v60 = vld [vmem:[%s7019_s1 + $0x138] sm:$0xff]  ;;  %v3193_v62 = vpack.c.bf16 %v137_v53, %v129_v52 }
  0x30   :  { %v154_v58 = vld [vmem:[%s7019_s1 + $0x168] sm:$0xff]  ;;  %v156_v61 = vld [vmem:[%s7019_s1 + $0x178] sm:$0xff]  ;;  %v3225_v63 = vpack.c.bf16 %v139_v56, %v131_v54  ;;  %v145_v2 = vld [vmem:[%s7019_s1 + $0x120] sm:$0xff] }
  0x31   :  { %3150 = vmatpush1.bf16.msra.mxu0 %v3149_v24  ;;  %v3841_v59 = vld [vmem:[#allocation2 + $0x8] sm:$0xff]  ;;  %v3195_v1 = vpack.c.bf16 %v154_v58, %v146_v57  ;;  %v153_v3 = vld [vmem:[%s7019_s1 + $0x160] sm:$0xff]  ;;  %v147_v4 = vld [vmem:[%s7019_s1 + $0x130] sm:$0xff]  ;;  %v3227_v5 = vpack.c.bf16 %v156_v61, %v148_v60 }
  0x32   :  { %3182 = vmatpush1.bf16.msra.mxu1 %v3181_v25  ;;  %3152 = vmatprep.subr.bf16.mxu0 %v3151_v26  ;;  %v155_v6 = vld [vmem:[%s7019_s1 + $0x170] sm:$0xff]  ;;  %v162_v7 = vld [vmem:[%s7019_s1 + $0x1a8] sm:$0xff]  ;;  %v164_v10 = vld [vmem:[%s7019_s1 + $0x1b8] sm:$0xff]  ;;  %v3197_v12 = vpack.c.bf16 %v153_v3, %v145_v2 }
  0x33   :  { %3184 = vmatprep.subr.bf16.mxu1 %v3183_v30  ;;  %v170_v8 = vld [vmem:[%s7019_s1 + $0x1e8] sm:$0xff]  ;;  %v3872_v9 = vld [vmem:[#allocation2 + $0x10] sm:$0xff]  ;;  %v172_v11 = vld [vmem:[%s7019_s1 + $0x1f8] sm:$0xff]  ;;  %v3229_v13 = vpack.c.bf16 %v155_v6, %v147_v4 }
  0x34   :  { %v3199_v14 = vpack.c.bf16 %v170_v8, %v162_v7  ;;  %v161_v15 = vld [vmem:[%s7019_s1 + $0x1a0] sm:$0xff]  ;;  %v163_v17 = vld [vmem:[%s7019_s1 + $0x1b0] sm:$0xff]  ;;  %v3231_v18 = vpack.c.bf16 %v172_v11, %v164_v10  ;;  %v178_v20 = vld [vmem:[%s7019_s1 + $0x228] sm:$0xff] }
  0x35   :  { %3154 = vmatpush1.bf16.msra.mxu0 %v3153_v36  ;;  %v169_v16 = vld [vmem:[%s7019_s1 + $0x1e0] sm:$0xff]  ;;  %v171_v19 = vld [vmem:[%s7019_s1 + $0x1f0] sm:$0xff]  ;;  %v186_v21 = vld [vmem:[%s7019_s1 + $0x268] sm:$0xff] }
  0x36   :  { %3186 = vmatpush1.bf16.msra.mxu1 %v3185_v37  ;;  %3188 = vmatprep.subr.bf16.mxu0 %v3187_v38  ;;  %v3902_v22 = vld [vmem:[#allocation2 + $0x18] sm:$0xff]  ;;  %v3201_v25 = vpack.c.bf16 %v169_v16, %v161_v15  ;;  %v3233_v26 = vpack.c.bf16 %v171_v19, %v163_v17  ;;  %v3203_v27 = vpack.c.bf16 %v186_v21, %v178_v20  ;;  %v177_v28 = vld [vmem:[%s7019_s1 + $0x220] sm:$0xff]  ;;  %v179_v30 = vld [vmem:[%s7019_s1 + $0x230] sm:$0xff]  ;;  %v7056_v16 = vmov 0.0|0.0  }
  0x37   :  { %3220 = vmatprep.subr.bf16.mxu1 %v3219_v41  ;;  %v180_v23 = vld [vmem:[%s7019_s1 + $0x238] sm:$0xff]  ;;  %v185_v29 = vld [vmem:[%s7019_s1 + $0x260] sm:$0xff]  ;;  %v187_v32 = vld [vmem:[%s7019_s1 + $0x270] sm:$0xff] }
  0x38   :  { %344 = vmatmul.mubr.f32.vlgmr.msra.gmra.mrb[0].mxu0 %v3813_v46  ;;  %v188_v24 = vld [vmem:[%s7019_s1 + $0x278] sm:$0xff]  ;;  %v194_v33 = vld [vmem:[%s7019_s1 + $0x2a8] sm:$0xff]  ;;  %v3932_v35 = vld [vmem:[#allocation2 + $0x20] sm:$0xff]  ;;  %v3205_v38 = vpack.c.bf16 %v185_v29, %v177_v28  ;;  %v3237_v39 = vpack.c.bf16 %v187_v32, %v179_v30 }
  0x39   :  { %601 = vmatmul.mubr.f32.vlgmr.msra.gmra.mrb[0].mxu1 %v3813_v46  ;;  %3190 = vmatpush1.bf16.msra.mxu0 %v3189_v47  ;;  %v3235_v31 = vpack.c.bf16 %v188_v24, %v180_v23  ;;  %v202_v34 = vld [vmem:[%s7019_s1 + $0x2e8] sm:$0xff]  ;;  %v196_v36 = vld [vmem:[%s7019_s1 + $0x2b8] sm:$0xff]  ;;  %v193_v41 = vld [vmem:[%s7019_s1 + $0x2a0] sm:$0xff] }
  0x3a   :  { %349 = vmatprep.mubr.f32.mxu0 %v3528_v0  ;;  %606 = vmatprep.mubr.f32.mxu1 %v3528_v0  ;;  %v204_v37 = vld [vmem:[%s7019_s1 + $0x2f8] sm:$0xff]  ;;  %v3207_v40 = vpack.c.bf16 %v202_v34, %v194_v33  ;;  %v201_v42 = vld [vmem:[%s7019_s1 + $0x2e0] sm:$0xff]  ;;  %v195_v43 = vld [vmem:[%s7019_s1 + $0x2b0] sm:$0xff] }
  0x3b   :  { %3222 = vmatpush1.bf16.msra.mxu1 %v3221_v50  ;;  %3192 = vmatprep.subr.bf16.mxu0 %v3191_v51  ;;  %v3239_v44 = vpack.c.bf16 %v204_v37, %v196_v36  ;;  %v203_v45 = vld [vmem:[%s7019_s1 + $0x2f0] sm:$0xff]  ;;  %v210_v47 = vld [vmem:[%s7019_s1 + $0x328] sm:$0xff]  ;;  %v212_v50 = vld [vmem:[%s7019_s1 + $0x338] sm:$0xff]  ;;  %v3209_v52 = vpack.c.bf16 %v201_v42, %v193_v41 }
  0x3c   :  { %350 = vmatmul.mubr.f32.gmra.mrb[2].mxu0 %v3841_v59  ;;  %3224 = vmatprep.subr.bf16.mxu1 %v3223_v55  ;;  %v218_v48 = vld [vmem:[%s7019_s1 + $0x368] sm:$0xff]  ;;  %v220_v51 = vld [vmem:[%s7019_s1 + $0x378] sm:$0xff]  ;;  %v3241_v53 = vpack.c.bf16 %v203_v45, %v195_v43  ;;  %v209_v55 = vld [vmem:[%s7019_s1 + $0x320] sm:$0xff] }
  0x3d   :  { %607 = vmatmul.mubr.f32.gmra.mrb[2].mxu1 %v3841_v59  ;;  %355 = vmatprep.mubr.f32.mxu0 %v3528_v0  ;;  %v3962_v49 = vld [vmem:[#allocation2 + $0x28] sm:$0xff]  ;;  %v3211_v54 = vpack.c.bf16 %v218_v48, %v210_v47  ;;  %v217_v56 = vld [vmem:[%s7019_s1 + $0x360] sm:$0xff]  ;;  %v211_v57 = vld [vmem:[%s7019_s1 + $0x330] sm:$0xff]  ;;  %v3243_v58 = vpack.c.bf16 %v220_v51, %v212_v50 }
  0x3e   :  { %612 = vmatprep.mubr.f32.mxu1 %v3528_v0  ;;  %3194 = vmatpush1.bf16.msra.mxu0 %v3193_v62  ;;  %v219_v60 = vld [vmem:[%s7019_s1 + $0x370] sm:$0xff]  ;;  %v226_v61 = vld [vmem:[%s7019_s1 + $0x3a8] sm:$0xff]  ;;  %v236_v2 = vld [vmem:[%s7019_s1 + $0x3f8] sm:$0xff]  ;;  %v3213_v3 = vpack.c.bf16 %v217_v56, %v209_v55 }
  0x3f   :  { %3226 = vmatpush1.bf16.msra.mxu1 %v3225_v63  ;;  %3196 = vmatprep.subr.bf16.mxu0 %v3195_v1  ;;  %v234_v62 = vld [vmem:[%s7019_s1 + $0x3e8] sm:$0xff]  ;;  %v3992_v63 = vld [vmem:[#allocation2 + $0x30] sm:$0xff]  ;;  %v228_v1 = vld [vmem:[%s7019_s1 + $0x3b8] sm:$0xff]  ;;  %v3245_v4 = vpack.c.bf16 %v219_v60, %v211_v57 }
  0x40   :  { %356 = vmatmul.mubr.f32.gmra.mrb[4].mxu0 %v3872_v9  ;;  %3228 = vmatprep.subr.bf16.mxu1 %v3227_v5  ;;  %v3215_v5 = vpack.c.bf16 %v234_v62, %v226_v61  ;;  %v225_v6 = vld [vmem:[%s7019_s1 + $0x3a0] sm:$0xff]  ;;  %v3247_v8 = vpack.c.bf16 %v236_v2, %v228_v1  ;;  %v227_v10 = vld [vmem:[%s7019_s1 + $0x3b0] sm:$0xff]  ;;  %v4030_v17 = vld [vmem:[#allocation2 + $0x48] sm:$0xff] }
  0x41   :  { %613 = vmatmul.mubr.f32.gmra.mrb[4].mxu1 %v3872_v9  ;;  %361 = vmatprep.mubr.f32.mxu0 %v3528_v0  ;;  %v233_v7 = vld [vmem:[%s7019_s1 + $0x3e0] sm:$0xff]  ;;  %v235_v11 = vld [vmem:[%s7019_s1 + $0x3f0] sm:$0xff]  ;;  %v4042_v19 = vld [vmem:[#allocation2 + $0x58] sm:$0xff] }
  0x42   :  { %618 = vmatprep.mubr.f32.mxu1 %v3528_v0  ;;  %3198 = vmatpush1.bf16.msra.mxu0 %v3197_v12  ;;  %v4016_v12 = vld [vmem:[#allocation2 + $0x38] sm:$0xff]  ;;  %v4022_v15 = vld [vmem:[#allocation2 + $0x40] sm:$0xff]  ;;  %v4054_v21 = vld [vmem:[#allocation2 + $0x68] sm:$0xff] }
  0x43   :  { %3230 = vmatpush1.bf16.msra.mxu1 %v3229_v13  ;;  %3200 = vmatprep.subr.bf16.mxu0 %v3199_v14  ;;  %v3217_v13 = vpack.c.bf16 %v233_v7, %v225_v6  ;;  %v3249_v14 = vpack.c.bf16 %v235_v11, %v227_v10  ;;  %v4048_v20 = vld [vmem:[#allocation2 + $0x60] sm:$0xff]  ;;  %v4060_v23 = vld [vmem:[#allocation2 + $0x70] sm:$0xff]  ;;  %v4066_v24 = vld [vmem:[#allocation2 + $0x78] sm:$0xff] }
  0x44   :  { %362 = vmatmul.mubr.f32.gmra.mrb[6].mxu0 %v3902_v22  ;;  %3232 = vmatprep.subr.bf16.mxu1 %v3231_v18  ;;  %v4036_v18 = vld [vmem:[#allocation2 + $0x50] sm:$0xff]  ;;  %v4090_v28 = vld [vmem:[#allocation2 + $0x98] sm:$0xff]  ;;  %v4096_v29 = vld [vmem:[#allocation2 + $0xa0] sm:$0xff] }
  0x45   :  { %619 = vmatmul.mubr.f32.gmra.mrb[6].mxu1 %v3902_v22  ;;  %367 = vmatprep.mubr.f32.mxu0 %v3528_v0  ;;  %v4102_v30 = vld [vmem:[#allocation2 + $0xa8] sm:$0xff]  ;;  %v4114_v32 = vld [vmem:[#allocation2 + $0xb8] sm:$0xff]  ;;  %v4120_v33 = vld [vmem:[#allocation2 + $0xc0] sm:$0xff] }
  0x46   :  { %624 = vmatprep.mubr.f32.mxu1 %v3528_v0  ;;  %3202 = vmatpush1.bf16.msra.mxu0 %v3201_v25  ;;  %v4072_v25 = vld [vmem:[#allocation2 + $0x80] sm:$0xff]  ;;  %v4126_v34 = vld [vmem:[#allocation2 + $0xc8] sm:$0xff]  ;;  %v4132_v36 = vld [vmem:[#allocation2 + $0xd0] sm:$0xff] }
  0x47   :  { %3234 = vmatpush1.bf16.msra.mxu1 %v3233_v26  ;;  %3204 = vmatprep.subr.bf16.mxu0 %v3203_v27  ;;  %v4078_v26 = vld [vmem:[#allocation2 + $0x88] sm:$0xff]  ;;  %v4084_v27 = vld [vmem:[#allocation2 + $0x90] sm:$0xff]  ;;  %v4138_v37 = vld [vmem:[#allocation2 + $0xd8] sm:$0xff] }
  0x48   :  { %368 = vmatmul.mubr.f32.gmra.mrb[8].mxu0 %v3932_v35  ;;  %3236 = vmatprep.subr.bf16.mxu1 %v3235_v31  ;;  %v4108_v31 = vld [vmem:[#allocation2 + $0xb0] sm:$0xff]  ;;  %v4162_v41 = vld [vmem:[#allocation2 + $0xf8] sm:$0xff]  ;;  %v1851_v42 = vld [vmem:[%s7023_s5] sm:$0xff] }
  0x49   :  { %625 = vmatmul.mubr.f32.gmra.mrb[8].mxu1 %v3932_v35  ;;  %373 = vmatprep.mubr.f32.mxu0 %v3528_v0  ;;  %v1852_v43 = vld [vmem:[%s7023_s5 + $0x8] sm:$0xff]  ;;  %v1853_v50 = vld [vmem:[%s7023_s5 + $0x10] sm:$0xff]  ;;  %v1854_v51 = vld [vmem:[%s7023_s5 + $0x18] sm:$0xff] }
  0x4a   :  { %630 = vmatprep.mubr.f32.mxu1 %v3528_v0  ;;  %3206 = vmatpush1.bf16.msra.mxu0 %v3205_v38  ;;  %v4144_v38 = vld [vmem:[#allocation2 + $0xe0] sm:$0xff]  ;;  %v1884_v45 = vld [vmem:[%s7023_s5 + $0x108] sm:$0xff]  ;;  %v3252_v47 = vpack.c.bf16 %v1852_v43, %v1851_v42  ;;  %v1857_v62 = vld [vmem:[%s7023_s5 + $0x30] sm:$0xff] }
  0x4b   :  { %3238 = vmatpush1.bf16.msra.mxu1 %v3237_v39  ;;  %3208 = vmatprep.subr.bf16.mxu0 %v3207_v40  ;;  %v4150_v39 = vld [vmem:[#allocation2 + $0xe8] sm:$0xff]  ;;  %v4156_v40 = vld [vmem:[#allocation2 + $0xf0] sm:$0xff]  ;;  %v1855_v56 = vld [vmem:[%s7023_s5 + $0x20] sm:$0xff] }
  0x4c   :  { %374 = vmatmul.mubr.f32.gmra.mrb[10].mxu0 %v3962_v49  ;;  %3240 = vmatprep.subr.bf16.mxu1 %v3239_v44  ;;  %v1883_v44 = vld [vmem:[%s7023_s5 + $0x100] sm:$0xff]  ;;  %v1856_v57 = vld [vmem:[%s7023_s5 + $0x28] sm:$0xff]  ;;  %v1858_v1 = vld [vmem:[%s7023_s5 + $0x38] sm:$0xff] }
  0x4d   :  { %631 = vmatmul.mubr.f32.gmra.mrb[10].mxu1 %v3962_v49  ;;  %379 = vmatprep.mubr.f32.mxu0 %v3528_v0  ;;  %v3300_v48 = vpack.c.bf16 %v1884_v45, %v1883_v44  ;;  %v3258_v60 = vpack.c.bf16 %v1856_v57, %v1855_v56  ;;  %v1890_v2 = vld [vmem:[%s7023_s5 + $0x138] sm:$0xff]  ;;  %v1860_v6 = vld [vmem:[%s7023_s5 + $0x48] sm:$0xff]  ;;  %v1861_v11 = vld [vmem:[%s7023_s5 + $0x50] sm:$0xff] }
  0x4e   :  { %636 = vmatprep.mubr.f32.mxu1 %v3528_v0  ;;  %3210 = vmatpush1.bf16.msra.mxu0 %v3209_v52  ;;  %v1885_v52 = vld [vmem:[%s7023_s5 + $0x110] sm:$0xff]  ;;  %v1892_v7 = vld [vmem:[%s7023_s5 + $0x148] sm:$0xff]  ;;  %v1863_v44 = vld [vmem:[%s7023_s5 + $0x60] sm:$0xff] }
  0x4f   :  { %3242 = vmatpush1.bf16.msra.mxu1 %v3241_v53  ;;  %3212 = vmatprep.subr.bf16.mxu0 %v3211_v54  ;;  %v1886_v53 = vld [vmem:[%s7023_s5 + $0x118] sm:$0xff]  ;;  %v3255_v54 = vpack.c.bf16 %v1854_v51, %v1853_v50  ;;  %v1864_v45 = vld [vmem:[%s7023_s5 + $0x68] sm:$0xff]  ;;  %v1865_v51 = vld [vmem:[%s7023_s5 + $0x70] sm:$0xff] }
  0x50   :  { %380 = vmatmul.mubr.f32.gmra.mrb[12].mxu0 %v3992_v63  ;;  %3244 = vmatprep.subr.bf16.mxu1 %v3243_v58  ;;  %v3303_v55 = vpack.c.bf16 %v1886_v53, %v1885_v52  ;;  %v1888_v58 = vld [vmem:[%s7023_s5 + $0x128] sm:$0xff]  ;;  %v1866_v52 = vld [vmem:[%s7023_s5 + $0x78] sm:$0xff]  ;;  %v1867_v56 = vld [vmem:[%s7023_s5 + $0x80] sm:$0xff] }
  0x51   :  { %637 = vmatmul.mubr.f32.gmra.mrb[12].mxu1 %v3992_v63  ;;  %385 = vmatprep.mubr.f32.mxu0 %v3528_v0  ;;  %v1898_v53 = vld [vmem:[%s7023_s5 + $0x178] sm:$0xff]  ;;  %v1868_v57 = vld [vmem:[%s7023_s5 + $0x88] sm:$0xff] }
  0x52   :  { %642 = vmatprep.mubr.f32.mxu1 %v3528_v0  ;;  %3214 = vmatpush1.bf16.msra.mxu0 %v3213_v3  ;;  %v3261_v3 = vpack.c.bf16 %v1858_v1, %v1857_v62  ;;  %v1870_v62 = vld [vmem:[%s7023_s5 + $0x98] sm:$0xff] }
  0x53   :  { %3246 = vmatpush1.bf16.msra.mxu1 %v3245_v4  ;;  %3216 = vmatprep.subr.bf16.mxu0 %v3215_v5  ;;  %v1859_v5 = vld [vmem:[%s7023_s5 + $0x40] sm:$0xff]  ;;  %v1902_v1 = vld [vmem:[%s7023_s5 + $0x198] sm:$0xff] }
  0x54   :  { %386 = vmatmul.mubr.f32.gmra.mrb[14].mxu0 %v4016_v12  ;;  %3248 = vmatprep.subr.bf16.mxu1 %v3247_v8  ;;  %v3264_v8 = vpack.c.bf16 %v1860_v6, %v1859_v5  ;;  %v1904_v5 = vld [vmem:[%s7023_s5 + $0x1a8] sm:$0xff] }
  0x55   :  { %643 = vmatmul.mubr.f32.gmra.mrb[14].mxu1 %v4016_v12  ;;  %391 = vmatprep.mubr.f32.mxu0 %v3528_v0 }
  0x56   :  { %648 = vmatprep.mubr.f32.mxu1 %v3528_v0  ;;  %3218 = vmatpush1.bf16.msra.mxu0 %v3217_v13  ;;  %v1862_v13 = vld [vmem:[%s7023_s5 + $0x58] sm:$0xff] }
  0x57   :  { %3250 = vmatpush1.bf16.msra.mxu1 %v3249_v14  ;;  %3251 = vmatprep.subr.bf16.mxu0 %v7056_v16  ;;  %v1894_v14 = vld [vmem:[%s7023_s5 + $0x158] sm:$0xff]  ;;  %v3267_v42 = vpack.c.bf16 %v1862_v13, %v1861_v11 }
  0x58   :  { %392 = vmatmul.mubr.f32.gmra.mrb[16].mxu0 %v4022_v15  ;;  %3299 = vmatprep.subr.bf16.mxu1 %v7056_v16 }
  0x59   :  { %649 = vmatmul.mubr.f32.gmra.mrb[16].mxu1 %v4022_v15  ;;  %397 = vmatprep.mubr.f32.mxu0 %v3528_v0 }
  0x5a   :  { %654 = vmatprep.mubr.f32.mxu1 %v3528_v0 }
  0x5c   :  { %398 = vmatmul.mubr.f32.gmra.mrb[18].mxu0 %v4030_v17 }
  0x5d   :  { %655 = vmatmul.mubr.f32.gmra.mrb[18].mxu1 %v4030_v17  ;;  %403 = vmatprep.mubr.f32.mxu0 %v3528_v0 }
  0x5e   :  { %660 = vmatprep.mubr.f32.mxu1 %v3528_v0 }
  0x60   :  { %404 = vmatmul.mubr.f32.gmra.mrb[20].mxu0 %v4036_v18 }
  0x61   :  { %661 = vmatmul.mubr.f32.gmra.mrb[20].mxu1 %v4036_v18  ;;  %409 = vmatprep.mubr.f32.mxu0 %v3528_v0 }
  0x62   :  { %666 = vmatprep.mubr.f32.mxu1 %v3528_v0 }
  0x64   :  { %410 = vmatmul.mubr.f32.gmra.mrb[22].mxu0 %v4042_v19 }
  0x65   :  { %667 = vmatmul.mubr.f32.gmra.mrb[22].mxu1 %v4042_v19  ;;  %415 = vmatprep.mubr.f32.mxu0 %v3528_v0 }
  0x66   :  { %672 = vmatprep.mubr.f32.mxu1 %v3528_v0 }
  0x68   :  { %416 = vmatmul.mubr.f32.gmra.mrb[24].mxu0 %v4048_v20 }
  0x69   :  { %673 = vmatmul.mubr.f32.gmra.mrb[24].mxu1 %v4048_v20  ;;  %421 = vmatprep.mubr.f32.mxu0 %v3528_v0 }
  0x6a   :  { %678 = vmatprep.mubr.f32.mxu1 %v3528_v0 }
  0x6c   :  { %422 = vmatmul.mubr.f32.gmra.mrb[26].mxu0 %v4054_v21 }
  0x6d   :  { %679 = vmatmul.mubr.f32.gmra.mrb[26].mxu1 %v4054_v21  ;;  %427 = vmatprep.mubr.f32.mxu0 %v3528_v0 }
  0x6e   :  { %684 = vmatprep.mubr.f32.mxu1 %v3528_v0 }
  0x70   :  { %428 = vmatmul.mubr.f32.gmra.mrb[28].mxu0 %v4060_v23 }
  0x71   :  { %685 = vmatmul.mubr.f32.gmra.mrb[28].mxu1 %v4060_v23  ;;  %433 = vmatprep.mubr.f32.mxu0 %v3528_v0 }
  0x72   :  { %690 = vmatprep.mubr.f32.mxu1 %v3528_v0 }
  0x74   :  { %434 = vmatmul.mubr.f32.gmra.mrb[30].mxu0 %v4066_v24 }
  0x75   :  { %691 = vmatmul.mubr.f32.gmra.mrb[30].mxu1 %v4066_v24  ;;  %439 = vmatprep.mubr.f32.mxu0 %v3528_v0 }
  0x76   :  { %696 = vmatprep.mubr.f32.mxu1 %v3528_v0 }
  0x78   :  { %440 = vmatmul.mubr.f32.gmra.mrb[32].mxu0 %v4072_v25 }
  0x79   :  { %697 = vmatmul.mubr.f32.gmra.mrb[32].mxu1 %v4072_v25  ;;  %445 = vmatprep.mubr.f32.mxu0 %v3528_v0 }
  0x7a   :  { %702 = vmatprep.mubr.f32.mxu1 %v3528_v0 }
  0x7c   :  { %446 = vmatmul.mubr.f32.gmra.mrb[34].mxu0 %v4078_v26 }
  0x7d   :  { %703 = vmatmul.mubr.f32.gmra.mrb[34].mxu1 %v4078_v26  ;;  %451 = vmatprep.mubr.f32.mxu0 %v3528_v0 }
  0x7e   :  { %708 = vmatprep.mubr.f32.mxu1 %v3528_v0 }
  0x80   :  { %452 = vmatmul.mubr.f32.gmra.mrb[36].mxu0 %v4084_v27 }
  0x81   :  { %709 = vmatmul.mubr.f32.gmra.mrb[36].mxu1 %v4084_v27  ;;  %457 = vmatprep.mubr.f32.mxu0 %v3528_v0 }
  0x82   :  { %714 = vmatprep.mubr.f32.mxu1 %v3528_v0 }
  0x84   :  { %458 = vmatmul.mubr.f32.gmra.mrb[38].mxu0 %v4090_v28 }
  0x85   :  { %715 = vmatmul.mubr.f32.gmra.mrb[38].mxu1 %v4090_v28  ;;  %463 = vmatprep.mubr.f32.mxu0 %v3528_v0 }
  0x86   :  { %720 = vmatprep.mubr.f32.mxu1 %v3528_v0 }
  0x88   :  { %464 = vmatmul.mubr.f32.gmra.mrb[40].mxu0 %v4096_v29 }
  0x89   :  { %721 = vmatmul.mubr.f32.gmra.mrb[40].mxu1 %v4096_v29  ;;  %469 = vmatprep.mubr.f32.mxu0 %v3528_v0 }
  0x8a   :  { %726 = vmatprep.mubr.f32.mxu1 %v3528_v0 }
  0x8c   :  { %470 = vmatmul.mubr.f32.gmra.mrb[42].mxu0 %v4102_v30 }
  0x8d   :  { %727 = vmatmul.mubr.f32.gmra.mrb[42].mxu1 %v4102_v30  ;;  %475 = vmatprep.mubr.f32.mxu0 %v3528_v0 }
  0x8e   :  { %732 = vmatprep.mubr.f32.mxu1 %v3528_v0 }
  0x90   :  { %476 = vmatmul.mubr.f32.gmra.mrb[44].mxu0 %v4108_v31 }
  0x91   :  { %733 = vmatmul.mubr.f32.gmra.mrb[44].mxu1 %v4108_v31  ;;  %481 = vmatprep.mubr.f32.mxu0 %v3528_v0 }
  0x92   :  { %738 = vmatprep.mubr.f32.mxu1 %v3528_v0 }
  0x94   :  { %482 = vmatmul.mubr.f32.gmra.mrb[46].mxu0 %v4114_v32 }
  0x95   :  { %739 = vmatmul.mubr.f32.gmra.mrb[46].mxu1 %v4114_v32  ;;  %487 = vmatprep.mubr.f32.mxu0 %v3528_v0 }
  0x96   :  { %744 = vmatprep.mubr.f32.mxu1 %v3528_v0 }
  0x98   :  { %488 = vmatmul.mubr.f32.gmra.mrb[48].mxu0 %v4120_v33 }
  0x99   :  { %745 = vmatmul.mubr.f32.gmra.mrb[48].mxu1 %v4120_v33  ;;  %493 = vmatprep.mubr.f32.mxu0 %v3528_v0 }
  0x9a   :  { %750 = vmatprep.mubr.f32.mxu1 %v3528_v0 }
  0x9c   :  { %494 = vmatmul.mubr.f32.gmra.mrb[50].mxu0 %v4126_v34 }
  0x9d   :  { %751 = vmatmul.mubr.f32.gmra.mrb[50].mxu1 %v4126_v34  ;;  %499 = vmatprep.mubr.f32.mxu0 %v3528_v0 }
  0x9e   :  { %756 = vmatprep.mubr.f32.mxu1 %v3528_v0 }
  0xa0   :  { %500 = vmatmul.mubr.f32.gmra.mrb[52].mxu0 %v4132_v36 }
  0xa1   :  { %757 = vmatmul.mubr.f32.gmra.mrb[52].mxu1 %v4132_v36  ;;  %505 = vmatprep.mubr.f32.mxu0 %v3528_v0 }
  0xa2   :  { %762 = vmatprep.mubr.f32.mxu1 %v3528_v0 }
  0xa4   :  { %506 = vmatmul.mubr.f32.gmra.mrb[54].mxu0 %v4138_v37 }
  0xa5   :  { %763 = vmatmul.mubr.f32.gmra.mrb[54].mxu1 %v4138_v37  ;;  %511 = vmatprep.mubr.f32.mxu0 %v3528_v0 }
  0xa6   :  { %768 = vmatprep.mubr.f32.mxu1 %v3528_v0 }
  0xa8   :  { %512 = vmatmul.mubr.f32.gmra.mrb[56].mxu0 %v4144_v38 }
  0xa9   :  { %769 = vmatmul.mubr.f32.gmra.mrb[56].mxu1 %v4144_v38  ;;  %517 = vmatprep.mubr.f32.mxu0 %v3528_v0 }
  0xaa   :  { %774 = vmatprep.mubr.f32.mxu1 %v3528_v0 }
  0xac   :  { %518 = vmatmul.mubr.f32.gmra.mrb[58].mxu0 %v4150_v39 }
  0xad   :  { %775 = vmatmul.mubr.f32.gmra.mrb[58].mxu1 %v4150_v39  ;;  %523 = vmatprep.mubr.f32.mxu0 %v3528_v0 }
  0xae   :  { %780 = vmatprep.mubr.f32.mxu1 %v3528_v0 }
  0xb0   :  { %524 = vmatmul.mubr.f32.gmra.mrb[60].mxu0 %v4156_v40 }
  0xb1   :  { %781 = vmatmul.mubr.f32.gmra.mrb[60].mxu1 %v4156_v40  ;;  %529 = vmatprep.mubr.f32.mxu0 %v3528_v0 }
  0xb2   :  { %786 = vmatprep.mubr.f32.mxu1 %v3528_v0 }
  0xb4   :  { %530 = vmatmul.mubr.f32.gmra.mrb[62].mxu0 %v4162_v41 }
  0xb5   :  { %787 = vmatmul.mubr.f32.gmra.mrb[62].mxu1 %v4162_v41  ;;  %857 = vmatprep.mubr.f32.mxu0 %v3528_v0 }
  0xb6   :  { %1114 = vmatprep.mubr.f32.mxu1 %v3528_v0 }
  0xb8   :  { %858 = vmatmul.mubr.f32.vlgmr.msra.gmra.mrb[64].mxu0 %v3813_v46 }
  0xb9   :  { %1115 = vmatmul.mubr.f32.vlgmr.msra.gmra.mrb[64].mxu1 %v3813_v46  ;;  %3253 = vmatpush1.bf16.msra.mxu0 %v3252_v47  ;;  %v1887_v46 = vld [vmem:[%s7023_s5 + $0x120] sm:$0xff]  ;;  %v1896_v47 = vld [vmem:[%s7023_s5 + $0x168] sm:$0xff] }
  0xba   :  { %863 = vmatprep.mubr.f32.mxu0 %v3528_v0  ;;  %1120 = vmatprep.mubr.f32.mxu1 %v3528_v0  ;;  %v3306_v61 = vpack.c.bf16 %v1888_v58, %v1887_v46  ;;  %v1900_v46 = vld [vmem:[%s7023_s5 + $0x188] sm:$0xff]  ;;  %v3276_v58 = vpack.c.bf16 %v1868_v57, %v1867_v56  ;;  %v1882_v56 = vld [vmem:[%s7023_s5 + $0xf8] sm:$0xff] }
  0xbb   :  { %3301 = vmatpush1.bf16.msra.mxu1 %v3300_v48  ;;  %3254 = vmatprep.subr.bf16.mxu0 %v7056_v16  ;;  %v3270_v48 = vpack.c.bf16 %v1864_v45, %v1863_v44  ;;  %v1877_v45 = vld [vmem:[%s7023_s5 + $0xd0] sm:$0xff]  ;;  %v1914_v57 = vld [vmem:[%s7023_s5 + $0x1f8] sm:$0xff] }
  0xbc   :  { %864 = vmatmul.mubr.f32.gmra.mrb[66].mxu0 %v3841_v59  ;;  %3302 = vmatprep.subr.bf16.mxu1 %v7056_v16 }
  0xbd   :  { %1121 = vmatmul.mubr.f32.gmra.mrb[66].mxu1 %v3841_v59  ;;  %869 = vmatprep.mubr.f32.mxu0 %v3528_v0  ;;  %v1889_v59 = vld [vmem:[%s7023_s5 + $0x130] sm:$0xff] }
  0xbe   :  { %1126 = vmatprep.mubr.f32.mxu1 %v3528_v0  ;;  %3256 = vmatpush1.bf16.msra.mxu0 %v3255_v54  ;;  %v3309_v4 = vpack.c.bf16 %v1890_v2, %v1889_v59  ;;  %v3273_v54 = vpack.c.bf16 %v1866_v52, %v1865_v51  ;;  %v1879_v51 = vld [vmem:[%s7023_s5 + $0xe0] sm:$0xff]  ;;  %v1880_v52 = vld [vmem:[%s7023_s5 + $0xe8] sm:$0xff] }
  0xbf   :  { %3304 = vmatpush1.bf16.msra.mxu1 %v3303_v55  ;;  %3257 = vmatprep.subr.bf16.mxu0 %v7056_v16 }
  0xc0   :  { %870 = vmatmul.mubr.f32.gmra.mrb[68].mxu0 %v3872_v9  ;;  %3305 = vmatprep.subr.bf16.mxu1 %v7056_v16 }
  0xc1   :  { %1127 = vmatmul.mubr.f32.gmra.mrb[68].mxu1 %v3872_v9  ;;  %875 = vmatprep.mubr.f32.mxu0 %v3528_v0  ;;  %v1891_v9 = vld [vmem:[%s7023_s5 + $0x140] sm:$0xff] }
  0xc2   :  { %1132 = vmatprep.mubr.f32.mxu1 %v3528_v0  ;;  %3259 = vmatpush1.bf16.msra.mxu0 %v3258_v60  ;;  %v3312_v10 = vpack.c.bf16 %v1892_v7, %v1891_v9  ;;  %v1873_v7 = vld [vmem:[%s7023_s5 + $0xb0] sm:$0xff] }
  0xc3   :  { %3307 = vmatpush1.bf16.msra.mxu1 %v3306_v61  ;;  %3260 = vmatprep.subr.bf16.mxu0 %v7056_v16  ;;  %v1869_v61 = vld [vmem:[%s7023_s5 + $0x90] sm:$0xff] }
  0xc4   :  { %876 = vmatmul.mubr.f32.gmra.mrb[70].mxu0 %v3902_v22  ;;  %3308 = vmatprep.subr.bf16.mxu1 %v7056_v16  ;;  %v3279_v59 = vpack.c.bf16 %v1870_v62, %v1869_v61 }
  0xc5   :  { %1133 = vmatmul.mubr.f32.gmra.mrb[70].mxu1 %v3902_v22  ;;  %881 = vmatprep.mubr.f32.mxu0 %v3528_v0  ;;  %v1893_v22 = vld [vmem:[%s7023_s5 + $0x150] sm:$0xff] }
  0xc6   :  { %1138 = vmatprep.mubr.f32.mxu1 %v3528_v0  ;;  %3262 = vmatpush1.bf16.msra.mxu0 %v3261_v3  ;;  %v3315_v43 = vpack.c.bf16 %v1894_v14, %v1893_v22  ;;  %v1871_v3 = vld [vmem:[%s7023_s5 + $0xa0] sm:$0xff]  ;;  %v1876_v14 = vld [vmem:[%s7023_s5 + $0xc8] sm:$0xff] }
  0xc7   :  { %3310 = vmatpush1.bf16.msra.mxu1 %v3309_v4  ;;  %3263 = vmatprep.subr.bf16.mxu0 %v7056_v16  ;;  %v1872_v4 = vld [vmem:[%s7023_s5 + $0xa8] sm:$0xff]  ;;  %v1875_v22 = vld [vmem:[%s7023_s5 + $0xc0] sm:$0xff] }
  0xc8   :  { %882 = vmatmul.mubr.f32.gmra.mrb[72].mxu0 %v3932_v35  ;;  %3311 = vmatprep.subr.bf16.mxu1 %v7056_v16  ;;  %v3282_v6 = vpack.c.bf16 %v1872_v4, %v1871_v3 }
  0xc9   :  { %1139 = vmatmul.mubr.f32.gmra.mrb[72].mxu1 %v3932_v35  ;;  %887 = vmatprep.mubr.f32.mxu0 %v3528_v0  ;;  %v1895_v35 = vld [vmem:[%s7023_s5 + $0x160] sm:$0xff] }
  0xca   :  { %1144 = vmatprep.mubr.f32.mxu1 %v3528_v0  ;;  %3265 = vmatpush1.bf16.msra.mxu0 %v3264_v8  ;;  %v3318_v50 = vpack.c.bf16 %v1896_v47, %v1895_v35  ;;  %v1874_v8 = vld [vmem:[%s7023_s5 + $0xb8] sm:$0xff] }
  0xcb   :  { %3313 = vmatpush1.bf16.msra.mxu1 %v3312_v10  ;;  %3266 = vmatprep.subr.bf16.mxu0 %v7056_v16  ;;  %v1906_v10 = vld [vmem:[%s7023_s5 + $0x1b8] sm:$0xff]  ;;  %v3285_v11 = vpack.c.bf16 %v1874_v8, %v1873_v7 }
  0xcc   :  { %888 = vmatmul.mubr.f32.gmra.mrb[74].mxu0 %v3962_v49  ;;  %3314 = vmatprep.subr.bf16.mxu1 %v7056_v16  ;;  %v1878_v35 = vld [vmem:[%s7023_s5 + $0xd8] sm:$0xff] }
  0xcd   :  { %1145 = vmatmul.mubr.f32.gmra.mrb[74].mxu1 %v3962_v49  ;;  %893 = vmatprep.mubr.f32.mxu0 %v3528_v0  ;;  %v1897_v49 = vld [vmem:[%s7023_s5 + $0x170] sm:$0xff]  ;;  %v1910_v47 = vld [vmem:[%s7023_s5 + $0x1d8] sm:$0xff] }
  0xce   :  { %1150 = vmatprep.mubr.f32.mxu1 %v3528_v0  ;;  %3268 = vmatpush1.bf16.msra.mxu0 %v3267_v42  ;;  %v3321_v55 = vpack.c.bf16 %v1898_v53, %v1897_v49  ;;  %v1908_v42 = vld [vmem:[%s7023_s5 + $0x1c8] sm:$0xff]  ;;  %v3294_v53 = vpack.c.bf16 %v1880_v52, %v1879_v51 }
  0xcf   :  { %3316 = vmatpush1.bf16.msra.mxu1 %v3315_v43  ;;  %3269 = vmatprep.subr.bf16.mxu0 %v7056_v16  ;;  %v3288_v43 = vpack.c.bf16 %v1876_v14, %v1875_v22  ;;  %v1912_v49 = vld [vmem:[%s7023_s5 + $0x1e8] sm:$0xff] }
  0xd0   :  { %894 = vmatmul.mubr.f32.gmra.mrb[76].mxu0 %v3992_v63  ;;  %3317 = vmatprep.subr.bf16.mxu1 %v7056_v16 }
  0xd1   :  { %1151 = vmatmul.mubr.f32.gmra.mrb[76].mxu1 %v3992_v63  ;;  %899 = vmatprep.mubr.f32.mxu0 %v3528_v0  ;;  %v1899_v63 = vld [vmem:[%s7023_s5 + $0x180] sm:$0xff] }
  0xd2   :  { %1156 = vmatprep.mubr.f32.mxu1 %v3528_v0  ;;  %3271 = vmatpush1.bf16.msra.mxu0 %v3270_v48  ;;  %v3324_v60 = vpack.c.bf16 %v1900_v46, %v1899_v63  ;;  %v3291_v48 = vpack.c.bf16 %v1878_v35, %v1877_v45 }
  0xd3   :  { %3319 = vmatpush1.bf16.msra.mxu1 %v3318_v50  ;;  %3272 = vmatprep.subr.bf16.mxu0 %v7056_v16 }
  0xd4   :  { %900 = vmatmul.mubr.f32.gmra.mrb[78].mxu0 %v4016_v12  ;;  %3320 = vmatprep.subr.bf16.mxu1 %v7056_v16 }
  0xd5   :  { %1157 = vmatmul.mubr.f32.gmra.mrb[78].mxu1 %v4016_v12  ;;  %905 = vmatprep.mubr.f32.mxu0 %v3528_v0  ;;  %v1901_v12 = vld [vmem:[%s7023_s5 + $0x190] sm:$0xff] }
  0xd6   :  { %1162 = vmatprep.mubr.f32.mxu1 %v3528_v0  ;;  %3274 = vmatpush1.bf16.msra.mxu0 %v3273_v54  ;;  %v3327_v2 = vpack.c.bf16 %v1902_v1, %v1901_v12 }
  0xd7   :  { %3322 = vmatpush1.bf16.msra.mxu1 %v3321_v55  ;;  %3275 = vmatprep.subr.bf16.mxu0 %v7056_v16  ;;  %v1881_v55 = vld [vmem:[%s7023_s5 + $0xf0] sm:$0xff] }
  0xd8   :  { %906 = vmatmul.mubr.f32.gmra.mrb[80].mxu0 %v4022_v15  ;;  %3323 = vmatprep.subr.bf16.mxu1 %v7056_v16  ;;  %v3297_v63 = vpack.c.bf16 %v1882_v56, %v1881_v55 }
  0xd9   :  { %1163 = vmatmul.mubr.f32.gmra.mrb[80].mxu1 %v4022_v15  ;;  %911 = vmatprep.mubr.f32.mxu0 %v3528_v0  ;;  %v1903_v15 = vld [vmem:[%s7023_s5 + $0x1a0] sm:$0xff] }
  0xda   :  { %1168 = vmatprep.mubr.f32.mxu1 %v3528_v0  ;;  %3277 = vmatpush1.bf16.msra.mxu0 %v3276_v58  ;;  %v3330_v9 = vpack.c.bf16 %v1904_v5, %v1903_v15 }
  0xdb   :  { %3325 = vmatpush1.bf16.msra.mxu1 %v3324_v60  ;;  %3278 = vmatprep.subr.bf16.mxu0 %v7056_v16 }
  0xdc   :  { %912 = vmatmul.mubr.f32.gmra.mrb[82].mxu0 %v4030_v17  ;;  %3326 = vmatprep.subr.bf16.mxu1 %v7056_v16 }
  0xdd   :  { %1169 = vmatmul.mubr.f32.gmra.mrb[82].mxu1 %v4030_v17  ;;  %917 = vmatprep.mubr.f32.mxu0 %v3528_v0  ;;  %v1905_v17 = vld [vmem:[%s7023_s5 + $0x1b0] sm:$0xff] }
  0xde   :  { %1174 = vmatprep.mubr.f32.mxu1 %v3528_v0  ;;  %3280 = vmatpush1.bf16.msra.mxu0 %v3279_v59  ;;  %v3333_v13 = vpack.c.bf16 %v1906_v10, %v1905_v17 }
  0xdf   :  { %3328 = vmatpush1.bf16.msra.mxu1 %v3327_v2  ;;  %3281 = vmatprep.subr.bf16.mxu0 %v7056_v16 }
  0xe0   :  { %918 = vmatmul.mubr.f32.gmra.mrb[84].mxu0 %v4036_v18  ;;  %3329 = vmatprep.subr.bf16.mxu1 %v7056_v16 }
  0xe1   :  { %1175 = vmatmul.mubr.f32.gmra.mrb[84].mxu1 %v4036_v18  ;;  %923 = vmatprep.mubr.f32.mxu0 %v3528_v0  ;;  %v1907_v18 = vld [vmem:[%s7023_s5 + $0x1c0] sm:$0xff] }
  0xe2   :  { %1180 = vmatprep.mubr.f32.mxu1 %v3528_v0  ;;  %3283 = vmatpush1.bf16.msra.mxu0 %v3282_v6  ;;  %v3336_v44 = vpack.c.bf16 %v1908_v42, %v1907_v18 }
  0xe3   :  { %3331 = vmatpush1.bf16.msra.mxu1 %v3330_v9  ;;  %3284 = vmatprep.subr.bf16.mxu0 %v7056_v16 }
  0xe4   :  { %924 = vmatmul.mubr.f32.gmra.mrb[86].mxu0 %v4042_v19  ;;  %3332 = vmatprep.subr.bf16.mxu1 %v7056_v16 }
  0xe5   :  { %1181 = vmatmul.mubr.f32.gmra.mrb[86].mxu1 %v4042_v19  ;;  %929 = vmatprep.mubr.f32.mxu0 %v3528_v0  ;;  %v1909_v19 = vld [vmem:[%s7023_s5 + $0x1d0] sm:$0xff] }
  0xe6   :  { %1186 = vmatprep.mubr.f32.mxu1 %v3528_v0  ;;  %3286 = vmatpush1.bf16.msra.mxu0 %v3285_v11  ;;  %v3339_v50 = vpack.c.bf16 %v1910_v47, %v1909_v19 }
  0xe7   :  { %3334 = vmatpush1.bf16.msra.mxu1 %v3333_v13  ;;  %3287 = vmatprep.subr.bf16.mxu0 %v7056_v16 }
  0xe8   :  { %930 = vmatmul.mubr.f32.gmra.mrb[88].mxu0 %v4048_v20  ;;  %3335 = vmatprep.subr.bf16.mxu1 %v7056_v16 }
  0xe9   :  { %1187 = vmatmul.mubr.f32.gmra.mrb[88].mxu1 %v4048_v20  ;;  %935 = vmatprep.mubr.f32.mxu0 %v3528_v0  ;;  %v1911_v20 = vld [vmem:[%s7023_s5 + $0x1e0] sm:$0xff] }
  0xea   :  { %1192 = vmatprep.mubr.f32.mxu1 %v3528_v0  ;;  %3289 = vmatpush1.bf16.msra.mxu0 %v3288_v43  ;;  %v3342_v54 = vpack.c.bf16 %v1912_v49, %v1911_v20 }
  0xeb   :  { %3337 = vmatpush1.bf16.msra.mxu1 %v3336_v44  ;;  %3290 = vmatprep.subr.bf16.mxu0 %v7056_v16 }
  0xec   :  { %936 = vmatmul.mubr.f32.gmra.mrb[90].mxu0 %v4054_v21  ;;  %3338 = vmatprep.subr.bf16.mxu1 %v7056_v16 }
  0xed   :  { %1193 = vmatmul.mubr.f32.gmra.mrb[90].mxu1 %v4054_v21  ;;  %941 = vmatprep.mubr.f32.mxu0 %v3528_v0  ;;  %v1913_v21 = vld [vmem:[%s7023_s5 + $0x1f0] sm:$0xff] }
  0xee   :  { %1198 = vmatprep.mubr.f32.mxu1 %v3528_v0  ;;  %3292 = vmatpush1.bf16.msra.mxu0 %v3291_v48  ;;  %v3345_v46 = vpack.c.bf16 %v1914_v57, %v1913_v21 }
  0xef   :  { %3340 = vmatpush1.bf16.msra.mxu1 %v3339_v50  ;;  %3293 = vmatprep.subr.bf16.mxu0 %v7056_v16 }
  0xf0   :  { %942 = vmatmul.mubr.f32.gmra.mrb[92].mxu0 %v4060_v23  ;;  %3341 = vmatprep.subr.bf16.mxu1 %v7056_v16 }
  0xf1   :  { %1199 = vmatmul.mubr.f32.gmra.mrb[92].mxu1 %v4060_v23  ;;  %947 = vmatprep.mubr.f32.mxu0 %v3528_v0  ;;  %v239_v23 = vlaneseq }
  0xf2   :  { %1204 = vmatprep.mubr.f32.mxu1 %v3528_v0  ;;  %3295 = vmatpush1.bf16.msra.mxu0 %v3294_v53 }
  0xf3   :  { %3343 = vmatpush1.bf16.msra.mxu1 %v3342_v54  ;;  %3296 = vmatprep.subr.bf16.mxu0 %v7056_v16 }
  0xf4   :  { %948 = vmatmul.mubr.f32.gmra.mrb[94].mxu0 %v4066_v24  ;;  %3344 = vmatprep.subr.bf16.mxu1 %v7056_v16 }
  0xf5   :  { %1205 = vmatmul.mubr.f32.gmra.mrb[94].mxu1 %v4066_v24  ;;  %953 = vmatprep.mubr.f32.mxu0 %v3528_v0  ;;  %v4466_v24 = vshrl.u32 %v239_v23, 7 }
  0xf6   :  { %1210 = vmatprep.mubr.f32.mxu1 %v3528_v0  ;;  %3298 = vmatpush1.bf16.msra.mxu0 %v3297_v63 }
  0xf7   :  { %3346 = vmatpush1.bf16.msra.mxu1 %v3345_v46  ;;  %3347 = vmatprep.subr.bf16.mxu0 %v7056_v16  ;;  %v245_v58 = vsub.s32 1, %v4466_v24  ;;  %v253_v60 = vsub.s32 3, %v4466_v24 }
  0xf8   :  { %954 = vmatmul.mubr.f32.gmra.mrb[96].mxu0 %v4072_v25  ;;  %3395 = vmatprep.subr.bf16.mxu1 %v7056_v16  ;;  %v1948_v16 = vld [vmem:[%s7023_s5 + $0x308] sm:$0xff] }
  0xf9   :  { %1211 = vmatmul.mubr.f32.gmra.mrb[96].mxu1 %v4072_v25  ;;  %959 = vmatprep.mubr.f32.mxu0 %v3528_v0  ;;  %v241_v25 = vsub.s32 0, %v4466_v24 }
  0xfa   :  { %1216 = vmatprep.mubr.f32.mxu1 %v3528_v0 }
  0xfc   :  { %960 = vmatmul.mubr.f32.gmra.mrb[98].mxu0 %v4078_v26 }
  0xfd   :  { %1217 = vmatmul.mubr.f32.gmra.mrb[98].mxu1 %v4078_v26  ;;  %965 = vmatprep.mubr.f32.mxu0 %v3528_v0  ;;  %v237_v26 = vld [vmem:[%s7020_s2] sm:$0xff] }
  0xfe   :  { %1222 = vmatprep.mubr.f32.mxu1 %v3528_v0  ;;  %v4483_v61 = vrot.slane %v237_v26, %v241_v25  ;;  %v4492_v12 = vrot.slane %v237_v26, %v253_v60 }
 0x100   :  { %966 = vmatmul.mubr.f32.gmra.mrb[100].mxu0 %v4084_v27 }
 0x101   :  { %1223 = vmatmul.mubr.f32.gmra.mrb[100].mxu1 %v4084_v27  ;;  %971 = vmatprep.mubr.f32.mxu0 %v3528_v0  ;;  %v249_v27 = vsub.s32 2, %v4466_v24 }
 0x102   :  { %1228 = vmatprep.mubr.f32.mxu1 %v3528_v0 }
 0x103   :  { %v4489_v62 = vrot.slane %v237_v26, %v249_v27 }
 0x104   :  { %972 = vmatmul.mubr.f32.gmra.mrb[102].mxu0 %v4090_v28 }
 0x105   :  { %1229 = vmatmul.mubr.f32.gmra.mrb[102].mxu1 %v4090_v28  ;;  %977 = vmatprep.mubr.f32.mxu0 %v3528_v0  ;;  %v4487_v28 = vrot.slane %v237_v26, %v245_v58 }
 0x106   :  { %1234 = vmatprep.mubr.f32.mxu1 %v3528_v0 }
 0x108   :  { %978 = vmatmul.mubr.f32.gmra.mrb[104].mxu0 %v4096_v29 }
 0x109   :  { %1235 = vmatmul.mubr.f32.gmra.mrb[104].mxu1 %v4096_v29  ;;  %983 = vmatprep.mubr.f32.mxu0 %v3528_v0 }
 0x10a   :  { %1240 = vmatprep.mubr.f32.mxu1 %v3528_v0 }
 0x10b   :  { %v345_v1 = vpop.f32.mrb[0].mxu0 }
 0x10c   :  { %v4495_v59 = vadd.f32 %v345_v1, %v4483_v61  ;;  %v347_v2 = vpop.f32.mrb[1].mxu0  ;;  %984 = vmatmul.mubr.f32.gmra.mrb[106].mxu0 %v4102_v30  ;;  %v602_v3 = vpop.f32.mrb[0].mxu1 }
 0x10d   :  { %v4499_v29 = vadd.f32 %v347_v2, %v4487_v28  ;;  %1241 = vmatmul.mubr.f32.gmra.mrb[106].mxu1 %v4102_v30  ;;  %v4503_v4 = vadd.f32 %v602_v3, %v4489_v62  ;;  %v604_v15 = vpop.f32.mrb[1].mxu1  ;;  %989 = vmatprep.mubr.f32.mxu0 %v3528_v0 }
 0x10e   :  { %v1307_v5 = vmax.f32 %v4495_v59, 0.0  ;;  %v4508_v6 = vadd.f32 %v604_v15, %v4492_v12  ;;  %1246 = vmatprep.mubr.f32.mxu1 %v3528_v0 }
 0x10f   :  { %v1308_v9 = vmax.f32 %v4499_v29, 0.0  ;;  %v1309_v7 = vmax.f32 %v4503_v4, 0.0  ;;  %v351_v8 = vpop.f32.mrb[2].mxu0 }
 0x110   :  { %1563 = vst [vmem:[#allocation6] sm:$0xff] %v1307_v5  ;;  %v1310_v30 = vmax.f32 %v4508_v6, 0.0  ;;  %v4517_v17 = vadd.f32 %v351_v8, %v4483_v61  ;;  %v353_v10 = vpop.f32.mrb[3].mxu0  ;;  %990 = vmatmul.mubr.f32.gmra.mrb[108].mxu0 %v4108_v31  ;;  %v608_v11 = vpop.f32.mrb[2].mxu1 }
 0x111   :  { %1564 = vst [vmem:[#allocation6 + $0x8] sm:$0xff] %v1308_v9  ;;  %1565 = vst [vmem:[#allocation6 + $0x10] sm:$0xff] %v1309_v7  ;;  %v4525_v13 = vadd.f32 %v353_v10, %v4487_v28  ;;  %1247 = vmatmul.mubr.f32.gmra.mrb[108].mxu1 %v4108_v31  ;;  %v4529_v22 = vadd.f32 %v608_v11, %v4489_v62  ;;  %v610_v14 = vpop.f32.mrb[3].mxu1  ;;  %995 = vmatprep.mubr.f32.mxu0 %v3528_v0 }
 0x112   :  { %1566 = vst [vmem:[#allocation6 + $0x18] sm:$0xff] %v1310_v30  ;;  %v7055_v18 = vmax.f32 %v4517_v17, 0.0  ;;  %v4536_v42 = vadd.f32 %v610_v14, %v4492_v12  ;;  %1252 = vmatprep.mubr.f32.mxu1 %v3528_v0 }
 0x113   :  { %v7062_v43 = vmax.f32 %v4525_v13, 0.0  ;;  %v7054_v31 = vmax.f32 %v4529_v22, 0.0  ;;  %v357_v44 = vpop.f32.mrb[4].mxu0 }
 0x114   :  { %1571 = vst [vmem:[#allocation6 + $0x40] sm:$0xff] %v7055_v18  ;;  %v7059_v45 = vmax.f32 %v4536_v42, 0.0  ;;  %v4545_v35 = vadd.f32 %v357_v44, %v4483_v61  ;;  %v359_v19 = vpop.f32.mrb[5].mxu0  ;;  %996 = vmatmul.mubr.f32.gmra.mrb[110].mxu0 %v4114_v32  ;;  %v614_v47 = vpop.f32.mrb[4].mxu1  ;;  %v1947_v18 = vld [vmem:[%s7023_s5 + $0x300] sm:$0xff] }
 0x115   :  { %1572 = vst [vmem:[#allocation6 + $0x48] sm:$0xff] %v7062_v43  ;;  %1573 = vst [vmem:[#allocation6 + $0x50] sm:$0xff] %v7054_v31  ;;  %v4553_v48 = vadd.f32 %v359_v19, %v4487_v28  ;;  %1253 = vmatmul.mubr.f32.gmra.mrb[110].mxu1 %v4114_v32  ;;  %v4557_v50 = vadd.f32 %v614_v47, %v4489_v62  ;;  %v616_v51 = vpop.f32.mrb[5].mxu1  ;;  %1001 = vmatprep.mubr.f32.mxu0 %v3528_v0 }
 0x116   :  { %1574 = vst [vmem:[#allocation6 + $0x58] sm:$0xff] %v7059_v45  ;;  %v7047_v52 = vmax.f32 %v4545_v35, 0.0  ;;  %v4564_v20 = vadd.f32 %v616_v51, %v4492_v12  ;;  %1258 = vmatprep.mubr.f32.mxu1 %v3528_v0  ;;  %v3396_v29 = vpack.c.bf16 %v1948_v16, %v1947_v18  ;;  %v1949_v18 = vld [vmem:[%s7023_s5 + $0x310] sm:$0xff] }
 0x117   :  { %v7053_v49 = vmax.f32 %v4553_v48, 0.0  ;;  %v7045_v32 = vmax.f32 %v4557_v50, 0.0  ;;  %v363_v53 = vpop.f32.mrb[6].mxu0 }
 0x118   :  { %1579 = vst [vmem:[#allocation6 + $0x80] sm:$0xff] %v7047_v52  ;;  %v7049_v54 = vmax.f32 %v4564_v20, 0.0  ;;  %v4573_v55 = vadd.f32 %v363_v53, %v4483_v61  ;;  %v365_v56 = vpop.f32.mrb[7].mxu0  ;;  %1002 = vmatmul.mubr.f32.gmra.mrb[112].mxu0 %v4120_v33  ;;  %v620_v21 = vpop.f32.mrb[6].mxu1 }
 0x119   :  { %1580 = vst [vmem:[#allocation6 + $0x88] sm:$0xff] %v7053_v49  ;;  %1581 = vst [vmem:[#allocation6 + $0x90] sm:$0xff] %v7045_v32  ;;  %v4581_v57 = vadd.f32 %v365_v56, %v4487_v28  ;;  %1259 = vmatmul.mubr.f32.gmra.mrb[112].mxu1 %v4120_v33  ;;  %v4585_v63 = vadd.f32 %v620_v21, %v4489_v62  ;;  %v622_v46 = vpop.f32.mrb[7].mxu1  ;;  %1007 = vmatprep.mubr.f32.mxu0 %v3528_v0 }
 0x11a   :  { %1582 = vst [vmem:[#allocation6 + $0x98] sm:$0xff] %v7049_v54  ;;  %v7038_v23 = vmax.f32 %v4573_v55, 0.0  ;;  %v4592_v25 = vadd.f32 %v622_v46, %v4492_v12  ;;  %1264 = vmatprep.mubr.f32.mxu1 %v3528_v0 }
 0x11b   :  { %v7042_v26 = vmax.f32 %v4581_v57, 0.0  ;;  %v7035_v33 = vmax.f32 %v4585_v63, 0.0  ;;  %v369_v58 = vpop.f32.mrb[8].mxu0 }
 0x11c   :  { %1587 = vst [vmem:[#allocation6 + $0xc0] sm:$0xff] %v7038_v23  ;;  %v7040_v27 = vmax.f32 %v4592_v25, 0.0  ;;  %v4601_v60 = vadd.f32 %v369_v58, %v4483_v61  ;;  %v371_v1 = vpop.f32.mrb[9].mxu0  ;;  %1008 = vmatmul.mubr.f32.gmra.mrb[114].mxu0 %v4126_v34  ;;  %v626_v2 = vpop.f32.mrb[8].mxu1 }
 0x11d   :  { %1588 = vst [vmem:[#allocation6 + $0xc8] sm:$0xff] %v7042_v26  ;;  %1589 = vst [vmem:[#allocation6 + $0xd0] sm:$0xff] %v7035_v33  ;;  %v4609_v3 = vadd.f32 %v371_v1, %v4487_v28  ;;  %1265 = vmatmul.mubr.f32.gmra.mrb[114].mxu1 %v4126_v34  ;;  %v4613_v15 = vadd.f32 %v626_v2, %v4489_v62  ;;  %v628_v8 = vpop.f32.mrb[9].mxu1  ;;  %1013 = vmatprep.mubr.f32.mxu0 %v3528_v0 }
 0x11e   :  { %1590 = vst [vmem:[#allocation6 + $0xd8] sm:$0xff] %v7040_v27  ;;  %v7028_v10 = vmax.f32 %v4601_v60, 0.0  ;;  %v4620_v11 = vadd.f32 %v628_v8, %v4492_v12  ;;  %1270 = vmatprep.mubr.f32.mxu1 %v3528_v0 }
 0x11f   :  { %v7033_v14 = vmax.f32 %v4609_v3, 0.0  ;;  %v7026_v34 = vmax.f32 %v4613_v15, 0.0  ;;  %v375_v44 = vpop.f32.mrb[10].mxu0 }
 0x120   :  { %1595 = vst [vmem:[#allocation6 + $0x100] sm:$0xff] %v7028_v10  ;;  %v7031_v19 = vmax.f32 %v4620_v11, 0.0  ;;  %v4629_v47 = vadd.f32 %v375_v44, %v4483_v61  ;;  %v377_v51 = vpop.f32.mrb[11].mxu0  ;;  %1014 = vmatmul.mubr.f32.gmra.mrb[116].mxu0 %v4132_v36  ;;  %v632_v53 = vpop.f32.mrb[10].mxu1 }
 0x121   :  { %1596 = vst [vmem:[#allocation6 + $0x108] sm:$0xff] %v7033_v14  ;;  %1597 = vst [vmem:[#allocation6 + $0x110] sm:$0xff] %v7026_v34  ;;  %v4637_v56 = vadd.f32 %v377_v51, %v4487_v28  ;;  %1271 = vmatmul.mubr.f32.gmra.mrb[116].mxu1 %v4132_v36  ;;  %v4641_v21 = vadd.f32 %v632_v53, %v4489_v62  ;;  %v634_v46 = vpop.f32.mrb[11].mxu1  ;;  %1019 = vmatprep.mubr.f32.mxu0 %v3528_v0 }
 0x122   :  { %1598 = vst [vmem:[#allocation6 + $0x118] sm:$0xff] %v7031_v19  ;;  %v7027_v58 = vmax.f32 %v4629_v47, 0.0  ;;  %v4648_v1 = vadd.f32 %v634_v46, %v4492_v12  ;;  %1276 = vmatprep.mubr.f32.mxu1 %v3528_v0 }
 0x123   :  { %v7029_v2 = vmax.f32 %v4637_v56, 0.0  ;;  %v7030_v36 = vmax.f32 %v4641_v21, 0.0  ;;  %v381_v8 = vpop.f32.mrb[12].mxu0 }
 0x124   :  { %1603 = vst [vmem:[#allocation6 + $0x140] sm:$0xff] %v7027_v58  ;;  %v7032_v44 = vmax.f32 %v4648_v1, 0.0  ;;  %v4657_v51 = vadd.f32 %v381_v8, %v4483_v61  ;;  %v383_v53 = vpop.f32.mrb[13].mxu0  ;;  %1020 = vmatmul.mubr.f32.gmra.mrb[118].mxu0 %v4138_v37  ;;  %v638_v46 = vpop.f32.mrb[12].mxu1 }
 0x125   :  { %1604 = vst [vmem:[#allocation6 + $0x148] sm:$0xff] %v7029_v2  ;;  %1605 = vst [vmem:[#allocation6 + $0x150] sm:$0xff] %v7030_v36  ;;  %v4665_v34 = vadd.f32 %v383_v53, %v4487_v28  ;;  %1277 = vmatmul.mubr.f32.gmra.mrb[118].mxu1 %v4138_v37  ;;  %v4669_v58 = vadd.f32 %v638_v46, %v4489_v62  ;;  %v640_v8 = vpop.f32.mrb[13].mxu1  ;;  %1025 = vmatprep.mubr.f32.mxu0 %v3528_v0 }
 0x126   :  { %1606 = vst [vmem:[#allocation6 + $0x158] sm:$0xff] %v7032_v44  ;;  %v7034_v10 = vmax.f32 %v4657_v51, 0.0  ;;  %v4676_v2 = vadd.f32 %v640_v8, %v4492_v12  ;;  %1282 = vmatprep.mubr.f32.mxu1 %v3528_v0 }
 0x127   :  { %v7036_v53 = vmax.f32 %v4665_v34, 0.0  ;;  %v7037_v37 = vmax.f32 %v4669_v58, 0.0  ;;  %v387_v36 = vpop.f32.mrb[14].mxu0 }
 0x128   :  { %1611 = vst [vmem:[#allocation6 + $0x180] sm:$0xff] %v7034_v10  ;;  %v7039_v46 = vmax.f32 %v4676_v2, 0.0  ;;  %v4685_v19 = vadd.f32 %v387_v36, %v4483_v61  ;;  %v389_v44 = vpop.f32.mrb[15].mxu0  ;;  %1026 = vmatmul.mubr.f32.gmra.mrb[120].mxu0 %v4144_v38  ;;  %v644_v8 = vpop.f32.mrb[14].mxu1 }
 0x129   :  { %1612 = vst [vmem:[#allocation6 + $0x188] sm:$0xff] %v7036_v53  ;;  %1613 = vst [vmem:[#allocation6 + $0x190] sm:$0xff] %v7037_v37  ;;  %v4693_v14 = vadd.f32 %v389_v44, %v4487_v28  ;;  %1283 = vmatmul.mubr.f32.gmra.mrb[120].mxu1 %v4144_v38  ;;  %v4697_v10 = vadd.f32 %v644_v8, %v4489_v62  ;;  %v646_v36 = vpop.f32.mrb[15].mxu1  ;;  %1031 = vmatprep.mubr.f32.mxu0 %v3528_v0 }
 0x12a   :  { %1614 = vst [vmem:[#allocation6 + $0x198] sm:$0xff] %v7039_v46  ;;  %v7041_v33 = vmax.f32 %v4685_v19, 0.0  ;;  %v4704_v53 = vadd.f32 %v646_v36, %v4492_v12  ;;  %1288 = vmatprep.mubr.f32.mxu1 %v3528_v0 }
 0x12b   :  { %v7043_v44 = vmax.f32 %v4693_v14, 0.0  ;;  %v7044_v38 = vmax.f32 %v4697_v10, 0.0  ;;  %v393_v37 = vpop.f32.mrb[16].mxu0 }
 0x12c   :  { %1619 = vst [vmem:[#allocation6 + $0x1c0] sm:$0xff] %v7041_v33  ;;  %v7046_v8 = vmax.f32 %v4704_v53, 0.0  ;;  %v4713_v23 = vadd.f32 %v393_v37, %v4483_v61  ;;  %v395_v46 = vpop.f32.mrb[17].mxu0  ;;  %1032 = vmatmul.mubr.f32.gmra.mrb[122].mxu0 %v4150_v39  ;;  %v650_v36 = vpop.f32.mrb[16].mxu1 }
 0x12d   :  { %1620 = vst [vmem:[#allocation6 + $0x1c8] sm:$0xff] %v7043_v44  ;;  %1621 = vst [vmem:[#allocation6 + $0x1d0] sm:$0xff] %v7044_v38  ;;  %v4721_v27 = vadd.f32 %v395_v46, %v4487_v28  ;;  %1289 = vmatmul.mubr.f32.gmra.mrb[122].mxu1 %v4150_v39  ;;  %v4725_v33 = vadd.f32 %v650_v36, %v4489_v62  ;;  %v652_v37 = vpop.f32.mrb[17].mxu1  ;;  %1037 = vmatprep.mubr.f32.mxu0 %v3528_v0 }
 0x12e   :  { %1622 = vst [vmem:[#allocation6 + $0x1d8] sm:$0xff] %v7046_v8  ;;  %v7048_v26 = vmax.f32 %v4713_v23, 0.0  ;;  %v4732_v44 = vadd.f32 %v652_v37, %v4492_v12  ;;  %1294 = vmatprep.mubr.f32.mxu1 %v3528_v0 }
 0x12f   :  { %v7050_v46 = vmax.f32 %v4721_v27, 0.0  ;;  %v7051_v39 = vmax.f32 %v4725_v33, 0.0  ;;  %v399_v38 = vpop.f32.mrb[18].mxu0 }
 0x130   :  { %1627 = vst [vmem:[#allocation6 + $0x200] sm:$0xff] %v7048_v26  ;;  %v7052_v36 = vmax.f32 %v4732_v44, 0.0  ;;  %v4741_v32 = vadd.f32 %v399_v38, %v4483_v61  ;;  %v401_v8 = vpop.f32.mrb[19].mxu0  ;;  %1038 = vmatmul.mubr.f32.gmra.mrb[124].mxu0 %v4156_v40  ;;  %v656_v37 = vpop.f32.mrb[18].mxu1 }
 0x131   :  { %1628 = vst [vmem:[#allocation6 + $0x208] sm:$0xff] %v7050_v46  ;;  %1629 = vst [vmem:[#allocation6 + $0x210] sm:$0xff] %v7051_v39  ;;  %v4749_v52 = vadd.f32 %v401_v8, %v4487_v28  ;;  %1295 = vmatmul.mubr.f32.gmra.mrb[124].mxu1 %v4156_v40  ;;  %v4753_v26 = vadd.f32 %v656_v37, %v4489_v62  ;;  %v658_v38 = vpop.f32.mrb[19].mxu1  ;;  %1043 = vmatprep.mubr.f32.mxu0 %v3528_v0  ;;  %v1915_v37 = vld [vmem:[%s7023_s5 + $0x200] sm:$0xff] }
 0x132   :  { %1630 = vst [vmem:[#allocation6 + $0x218] sm:$0xff] %v7052_v36  ;;  %v7058_v54 = vmax.f32 %v4741_v32, 0.0  ;;  %v4760_v46 = vadd.f32 %v658_v38, %v4492_v12  ;;  %1300 = vmatprep.mubr.f32.mxu1 %v3528_v0  ;;  %v1916_v36 = vld [vmem:[%s7023_s5 + $0x208] sm:$0xff] }
 0x133   :  { %v7060_v8 = vmax.f32 %v4749_v52, 0.0  ;;  %v7061_v40 = vmax.f32 %v4753_v26, 0.0  ;;  %v405_v39 = vpop.f32.mrb[20].mxu0 }
 0x134   :  { %1635 = vst [vmem:[#allocation6 + $0x240] sm:$0xff] %v7058_v54  ;;  %v7063_v38 = vmax.f32 %v4760_v46, 0.0  ;;  %v4775_v0 = vadd.f32 %v405_v39, %v4483_v61  ;;  %v407_v49 = vpop.f32.mrb[21].mxu0  ;;  %1044 = vmatmul.mubr.f32.gmra.mrb[126].mxu0 %v4162_v41  ;;  %v662_v31 = vpop.f32.mrb[20].mxu1 }
 0x135   :  { %1636 = vst [vmem:[#allocation6 + $0x248] sm:$0xff] %v7060_v8  ;;  %1637 = vst [vmem:[#allocation6 + $0x250] sm:$0xff] %v7061_v40  ;;  %v4789_v39 = vadd.f32 %v407_v49, %v4487_v28  ;;  %1301 = vmatmul.mubr.f32.gmra.mrb[126].mxu1 %v4162_v41  ;;  %v4793_v54 = vadd.f32 %v662_v31, %v4489_v62  ;;  %2043 = vmatprep.mubr.f32.mxu0 %v1308_v9  ;;  %v664_v45 = vpop.f32.mrb[21].mxu1  ;;  %v1917_v9 = vld [vmem:[%s7023_s5 + $0x210] sm:$0xff] }
 0x136   :  { %1638 = vst [vmem:[#allocation6 + $0x258] sm:$0xff] %v7063_v38  ;;  %v7064_v8 = vmax.f32 %v4775_v0, 0.0  ;;  %2268 = vmatprep.mubr.f32.mxu1 %v1310_v30  ;;  %v4803_v49 = vadd.f32 %v664_v45, %v4492_v12  ;;  %v3348_v40 = vpack.c.bf16 %v1916_v36, %v1915_v37  ;;  %v1918_v38 = vld [vmem:[%s7023_s5 + $0x218] sm:$0xff] }
 0x137   :  { %v7066_v41 = vmax.f32 %v4789_v39, 0.0  ;;  %v7065_v31 = vmax.f32 %v4793_v54, 0.0  ;;  %v411_v43 = vpop.f32.mrb[22].mxu0  ;;  %v1950_v36 = vld [vmem:[%s7023_s5 + $0x318] sm:$0xff]  ;;  %v3351_v4 = vpack.c.bf16 %v1918_v38, %v1917_v9 }
 0x138   :  { %1643 = vst [vmem:[#allocation6 + $0x280] sm:$0xff] %v7064_v8  ;;  %v7067_v6 = vmax.f32 %v4803_v49, 0.0  ;;  %v4817_v30 = vadd.f32 %v411_v43, %v4483_v61  ;;  %v413_v45 = vpop.f32.mrb[23].mxu0  ;;  %2044 = vmatmul.mubr.f32.vlgmr.msra.gmra.mrb[128].mxu0 %v1307_v5  ;;  %v668_v16 = vpop.f32.mrb[22].mxu1  ;;  %v7244_v5 = vmax.f32 %v4525_v13, 0.0 }
 0x139   :  { %1644 = vst [vmem:[#allocation6 + $0x288] sm:$0xff] %v7066_v41  ;;  %1645 = vst [vmem:[#allocation6 + $0x290] sm:$0xff] %v7065_v31  ;;  %v4832_v43 = vadd.f32 %v413_v45, %v4487_v28  ;;  %2269 = vmatmul.mubr.f32.vlgmr.msra.gmra.mrb[128].mxu1 %v1309_v7  ;;  %v4837_v59 = vadd.f32 %v668_v16, %v4489_v62  ;;  %v670_v37 = vpop.f32.mrb[23].mxu1  ;;  %v7245_v31 = vmax.f32 %v4536_v42, 0.0  ;;  %3349 = vmatpush1.bf16.msra.mxu0 %v3348_v40  ;;  %v1920_v42 = vld [vmem:[%s7023_s5 + $0x228] sm:$0xff] }
 0x13a   :  { %2048 = vmatprep.mubr.f32.mxu0 %v7244_v5  ;;  %1646 = vst [vmem:[#allocation6 + $0x298] sm:$0xff] %v7067_v6  ;;  %v7068_v8 = vmax.f32 %v4817_v30, 0.0  ;;  %v4847_v45 = vadd.f32 %v670_v37, %v4492_v12  ;;  %3397 = vmatpush1.bf16.msra.mxu1 %v3396_v29  ;;  %v7246_v5 = vmov 0.0|0.0   ;;  %v3399_v41 = vpack.c.bf16 %v1950_v36, %v1949_v18  ;;  %v1919_v6 = vld [vmem:[%s7023_s5 + $0x220] sm:$0xff]  ;;  %v1952_v36 = vld [vmem:[%s7023_s5 + $0x328] sm:$0xff] }
 0x13b   :  { %2273 = vmatprep.mubr.f32.mxu1 %v7245_v31  ;;  %v7069_v7 = vmax.f32 %v4832_v43, 0.0  ;;  %v7070_v16 = vmax.f32 %v4837_v59, 0.0  ;;  %v417_v13 = vpop.f32.mrb[24].mxu0  ;;  %3350 = vmatprep.subr.bf16.mxu0 %v7246_v5  ;;  %v7247_v29 = vmax.f32 %v4517_v17, 0.0  ;;  %v1951_v18 = vld [vmem:[%s7023_s5 + $0x320] sm:$0xff]  ;;  %v7248_v37 = vmax.f32 %v4529_v22, 0.0 }
 0x13c   :  { %1651 = vst [vmem:[#allocation6 + $0x2c0] sm:$0xff] %v7068_v8  ;;  %v7071_v40 = vmax.f32 %v4847_v45, 0.0  ;;  %v4862_v38 = vadd.f32 %v417_v13, %v4483_v61  ;;  %v419_v31 = vpop.f32.mrb[25].mxu0  ;;  %v674_v9 = vpop.f32.mrb[24].mxu1  ;;  %3398 = vmatprep.subr.bf16.mxu1 %v7246_v5  ;;  %v3354_v22 = vpack.c.bf16 %v1920_v42, %v1919_v6  ;;  %v1953_v42 = vld [vmem:[%s7023_s5 + $0x330] sm:$0xff] }
 0x13d   :  { %2049 = vmatmul.mubr.f32.gmra.mrb[130].mxu0 %v7247_v29  ;;  %1652 = vst [vmem:[#allocation6 + $0x2c8] sm:$0xff] %v7069_v7  ;;  %1653 = vst [vmem:[#allocation6 + $0x2d0] sm:$0xff] %v7070_v16  ;;  %v4878_v17 = vadd.f32 %v419_v31, %v4487_v28  ;;  %2274 = vmatmul.mubr.f32.gmra.mrb[130].mxu1 %v7248_v37  ;;  %v4883_v13 = vadd.f32 %v674_v9, %v4489_v62  ;;  %v7249_v29 = vmax.f32 %v4553_v48, 0.0  ;;  %v676_v8 = vpop.f32.mrb[25].mxu1 }
 0x13e   :  { %1654 = vst [vmem:[#allocation6 + $0x2d8] sm:$0xff] %v7071_v40  ;;  %v7072_v7 = vmax.f32 %v4862_v38, 0.0  ;;  %v7250_v16 = vmax.f32 %v4564_v20, 0.0  ;;  %v4893_v31 = vadd.f32 %v676_v8, %v4492_v12  ;;  %3352 = vmatpush1.bf16.msra.mxu0 %v3351_v4  ;;  %3400 = vmatpush1.bf16.msra.mxu1 %v3399_v41  ;;  %v1921_v40 = vld [vmem:[%s7023_s5 + $0x230] sm:$0xff]  ;;  %v1922_v20 = vld [vmem:[%s7023_s5 + $0x238] sm:$0xff]  ;;  %v7251_v4 = vmax.f32 %v4545_v35, 0.0 }
 0x13f   :  { %2053 = vmatprep.mubr.f32.mxu0 %v7249_v29  ;;  %v7073_v9 = vmax.f32 %v4878_v17, 0.0  ;;  %v7074_v37 = vmax.f32 %v4883_v13, 0.0  ;;  %v423_v48 = vpop.f32.mrb[26].mxu0  ;;  %3353 = vmatprep.subr.bf16.mxu0 %v7246_v5  ;;  %v3402_v29 = vpack.c.bf16 %v1952_v36, %v1951_v18  ;;  %v1954_v18 = vld [vmem:[%s7023_s5 + $0x338] sm:$0xff]  ;;  %v7252_v36 = vmax.f32 %v4557_v50, 0.0 }
 0x140   :  { %2278 = vmatprep.mubr.f32.mxu1 %v7250_v16  ;;  %1659 = vst [vmem:[#allocation6 + $0x300] sm:$0xff] %v7072_v7  ;;  %v7075_v8 = vmax.f32 %v4893_v31, 0.0  ;;  %v4908_v6 = vadd.f32 %v423_v48, %v4483_v61  ;;  %v425_v41 = vpop.f32.mrb[27].mxu0  ;;  %v680_v16 = vpop.f32.mrb[26].mxu1  ;;  %3401 = vmatprep.subr.bf16.mxu1 %v7246_v5  ;;  %v3357_v50 = vpack.c.bf16 %v1922_v20, %v1921_v40  ;;  %v1955_v20 = vld [vmem:[%s7023_s5 + $0x340] sm:$0xff] }
 0x141   :  { %2054 = vmatmul.mubr.f32.gmra.mrb[132].mxu0 %v7251_v4  ;;  %1660 = vst [vmem:[#allocation6 + $0x308] sm:$0xff] %v7073_v9  ;;  %1661 = vst [vmem:[#allocation6 + $0x310] sm:$0xff] %v7074_v37  ;;  %v4924_v35 = vadd.f32 %v425_v41, %v4487_v28  ;;  %2279 = vmatmul.mubr.f32.gmra.mrb[132].mxu1 %v7252_v36  ;;  %v4929_v48 = vadd.f32 %v680_v16, %v4489_v62  ;;  %v7253_v4 = vmax.f32 %v4581_v57, 0.0  ;;  %v682_v7 = vpop.f32.mrb[27].mxu1 }
 0x142   :  { %1662 = vst [vmem:[#allocation6 + $0x318] sm:$0xff] %v7075_v8  ;;  %v7076_v9 = vmax.f32 %v4908_v6, 0.0  ;;  %v7254_v37 = vmax.f32 %v4592_v25, 0.0  ;;  %v4939_v41 = vadd.f32 %v682_v7, %v4492_v12  ;;  %3355 = vmatpush1.bf16.msra.mxu0 %v3354_v22  ;;  %3403 = vmatpush1.bf16.msra.mxu1 %v3402_v29  ;;  %v1923_v8 = vld [vmem:[%s7023_s5 + $0x240] sm:$0xff]  ;;  %v1924_v25 = vld [vmem:[%s7023_s5 + $0x248] sm:$0xff] }
 0x143   :  { %2058 = vmatprep.mubr.f32.mxu0 %v7253_v4  ;;  %v7077_v16 = vmax.f32 %v4924_v35, 0.0  ;;  %v7078_v36 = vmax.f32 %v4929_v48, 0.0  ;;  %v429_v57 = vpop.f32.mrb[28].mxu0  ;;  %3356 = vmatprep.subr.bf16.mxu0 %v7246_v5  ;;  %v3405_v4 = vpack.c.bf16 %v1954_v18, %v1953_v42  ;;  %v1956_v42 = vld [vmem:[%s7023_s5 + $0x348] sm:$0xff]  ;;  %v7256_v18 = vmax.f32 %v4585_v63, 0.0 }
 0x144   :  { %2283 = vmatprep.mubr.f32.mxu1 %v7254_v37  ;;  %1667 = vst [vmem:[#allocation6 + $0x340] sm:$0xff] %v7076_v9  ;;  %v7079_v7 = vmax.f32 %v4939_v41, 0.0  ;;  %v4954_v40 = vadd.f32 %v429_v57, %v4483_v61  ;;  %v431_v22 = vpop.f32.mrb[29].mxu0  ;;  %v7255_v37 = vmax.f32 %v4573_v55, 0.0  ;;  %v686_v29 = vpop.f32.mrb[28].mxu1  ;;  %3404 = vmatprep.subr.bf16.mxu1 %v7246_v5  ;;  %v3360_v63 = vpack.c.bf16 %v1924_v25, %v1923_v8  ;;  %v1957_v25 = vld [vmem:[%s7023_s5 + $0x350] sm:$0xff] }
 0x145   :  { %1668 = vst [vmem:[#allocation6 + $0x348] sm:$0xff] %v7077_v16  ;;  %1669 = vst [vmem:[#allocation6 + $0x350] sm:$0xff] %v7078_v36  ;;  %v4970_v55 = vadd.f32 %v431_v22, %v4487_v28  ;;  %2284 = vmatmul.mubr.f32.gmra.mrb[134].mxu1 %v7256_v18  ;;  %v4975_v57 = vadd.f32 %v686_v29, %v4489_v62  ;;  %v688_v9 = vpop.f32.mrb[29].mxu1  ;;  %v7258_v36 = vmax.f32 %v4620_v11, 0.0  ;;  %v1926_v11 = vld [vmem:[%s7023_s5 + $0x258] sm:$0xff] }
 0x146   :  { %2059 = vmatmul.mubr.f32.gmra.mrb[134].mxu0 %v7255_v37  ;;  %v7257_v37 = vmax.f32 %v4609_v3, 0.0  ;;  %1670 = vst [vmem:[#allocation6 + $0x358] sm:$0xff] %v7079_v7  ;;  %v7080_v16 = vmax.f32 %v4954_v40, 0.0  ;;  %v4985_v22 = vadd.f32 %v688_v9, %v4492_v12  ;;  %3406 = vmatpush1.bf16.msra.mxu1 %v3405_v4  ;;  %v1925_v7 = vld [vmem:[%s7023_s5 + $0x250] sm:$0xff] }
 0x147   :  { %2288 = vmatprep.mubr.f32.mxu1 %v7258_v36  ;;  %3358 = vmatpush1.bf16.msra.mxu0 %v3357_v50  ;;  %v7081_v29 = vmax.f32 %v4970_v55, 0.0  ;;  %v7082_v18 = vmax.f32 %v4975_v57, 0.0  ;;  %v435_v3 = vpop.f32.mrb[30].mxu0  ;;  %v7259_v36 = vmax.f32 %v4601_v60, 0.0 }
 0x148   :  { %2063 = vmatprep.mubr.f32.mxu0 %v7257_v37  ;;  %3359 = vmatprep.subr.bf16.mxu0 %v7246_v5  ;;  %v3408_v37 = vpack.c.bf16 %v1956_v42, %v1955_v20  ;;  %1675 = vst [vmem:[#allocation6 + $0x380] sm:$0xff] %v7080_v16  ;;  %v7083_v9 = vmax.f32 %v4985_v22, 0.0  ;;  %v5000_v8 = vadd.f32 %v435_v3, %v4483_v61  ;;  %v437_v50 = vpop.f32.mrb[31].mxu0  ;;  %v692_v4 = vpop.f32.mrb[30].mxu1  ;;  %v1958_v20 = vld [vmem:[%s7023_s5 + $0x358] sm:$0xff]  ;;  %v7260_v42 = vmax.f32 %v4613_v15, 0.0 }
 0x149   :  { %3407 = vmatprep.subr.bf16.mxu1 %v7246_v5  ;;  %1676 = vst [vmem:[#allocation6 + $0x388] sm:$0xff] %v7081_v29  ;;  %1677 = vst [vmem:[#allocation6 + $0x390] sm:$0xff] %v7082_v18  ;;  %v5016_v60 = vadd.f32 %v437_v50, %v4487_v28  ;;  %v5021_v3 = vadd.f32 %v692_v4, %v4489_v62  ;;  %v694_v16 = vpop.f32.mrb[31].mxu1  ;;  %v7262_v18 = vmax.f32 %v4648_v1, 0.0  ;;  %v1928_v1 = vld [vmem:[%s7023_s5 + $0x268] sm:$0xff] }
 0x14a   :  { %2064 = vmatmul.mubr.f32.gmra.mrb[136].mxu0 %v7259_v36  ;;  %2289 = vmatmul.mubr.f32.gmra.mrb[136].mxu1 %v7260_v42  ;;  %v7261_v36 = vmax.f32 %v4637_v56, 0.0  ;;  %1678 = vst [vmem:[#allocation6 + $0x398] sm:$0xff] %v7083_v9  ;;  %v7084_v29 = vmax.f32 %v5000_v8, 0.0  ;;  %v5031_v50 = vadd.f32 %v694_v16, %v4492_v12  ;;  %v3363_v15 = vpack.c.bf16 %v1926_v11, %v1925_v7  ;;  %v1927_v9 = vld [vmem:[%s7023_s5 + $0x260] sm:$0xff] }
 0x14b   :  { %2293 = vmatprep.mubr.f32.mxu1 %v7262_v18  ;;  %3361 = vmatpush1.bf16.msra.mxu0 %v3360_v63  ;;  %v7085_v4 = vmax.f32 %v5016_v60, 0.0  ;;  %v7086_v42 = vmax.f32 %v5021_v3, 0.0  ;;  %v441_v56 = vpop.f32.mrb[32].mxu0  ;;  %v7263_v18 = vmax.f32 %v4629_v47, 0.0  ;;  %v1959_v11 = vld [vmem:[%s7023_s5 + $0x360] sm:$0xff] }
 0x14c   :  { %2068 = vmatprep.mubr.f32.mxu0 %v7261_v36  ;;  %3409 = vmatpush1.bf16.msra.mxu1 %v3408_v37  ;;  %v3411_v36 = vpack.c.bf16 %v1958_v20, %v1957_v25  ;;  %1683 = vst [vmem:[#allocation6 + $0x3c0] sm:$0xff] %v7084_v29  ;;  %v7087_v16 = vmax.f32 %v5031_v50, 0.0  ;;  %v5046_v7 = vadd.f32 %v441_v56, %v4483_v61  ;;  %v443_v63 = vpop.f32.mrb[33].mxu0  ;;  %v698_v37 = vpop.f32.mrb[32].mxu1  ;;  %v1960_v25 = vld [vmem:[%s7023_s5 + $0x368] sm:$0xff]  ;;  %v7264_v20 = vmax.f32 %v4641_v21, 0.0 }
 0x14d   :  { %3362 = vmatprep.subr.bf16.mxu0 %v7246_v5  ;;  %3410 = vmatprep.subr.bf16.mxu1 %v7246_v5  ;;  %1684 = vst [vmem:[#allocation6 + $0x3c8] sm:$0xff] %v7085_v4  ;;  %1685 = vst [vmem:[#allocation6 + $0x3d0] sm:$0xff] %v7086_v42  ;;  %v5062_v47 = vadd.f32 %v443_v63, %v4487_v28  ;;  %v5067_v56 = vadd.f32 %v698_v37, %v4489_v62  ;;  %v700_v29 = vpop.f32.mrb[33].mxu1  ;;  %v7266_v42 = vmax.f32 %v4676_v2, 0.0  ;;  %v1930_v2 = vld [vmem:[%s7023_s5 + $0x278] sm:$0xff] }
 0x14e   :  { %2069 = vmatmul.mubr.f32.gmra.mrb[138].mxu0 %v7263_v18  ;;  %2294 = vmatmul.mubr.f32.gmra.mrb[138].mxu1 %v7264_v20  ;;  %v7265_v18 = vmax.f32 %v4665_v34, 0.0  ;;  %1686 = vst [vmem:[#allocation6 + $0x3d8] sm:$0xff] %v7087_v16  ;;  %v7088_v4 = vmax.f32 %v5046_v7, 0.0  ;;  %v5077_v63 = vadd.f32 %v700_v29, %v4492_v12  ;;  %v3366_v21 = vpack.c.bf16 %v1928_v1, %v1927_v9  ;;  %v1929_v16 = vld [vmem:[%s7023_s5 + $0x270] sm:$0xff] }
 0x14f   :  { %2298 = vmatprep.mubr.f32.mxu1 %v7266_v42  ;;  %3364 = vmatpush1.bf16.msra.mxu0 %v3363_v15  ;;  %v7089_v37 = vmax.f32 %v5062_v47, 0.0  ;;  %v7090_v20 = vmax.f32 %v5067_v56, 0.0  ;;  %v447_v34 = vpop.f32.mrb[34].mxu0  ;;  %v7267_v42 = vmax.f32 %v4657_v51, 0.0  ;;  %v1961_v1 = vld [vmem:[%s7023_s5 + $0x370] sm:$0xff] }
 0x150   :  { %2073 = vmatprep.mubr.f32.mxu0 %v7265_v18  ;;  %3412 = vmatpush1.bf16.msra.mxu1 %v3411_v36  ;;  %v3414_v18 = vpack.c.bf16 %v1960_v25, %v1959_v11  ;;  %1691 = vst [vmem:[#allocation6 + $0x400] sm:$0xff] %v7088_v4  ;;  %v7091_v29 = vmax.f32 %v5077_v63, 0.0  ;;  %v5092_v9 = vadd.f32 %v447_v34, %v4483_v61  ;;  %v449_v15 = vpop.f32.mrb[35].mxu0  ;;  %v704_v36 = vpop.f32.mrb[34].mxu1  ;;  %v1962_v11 = vld [vmem:[%s7023_s5 + $0x378] sm:$0xff]  ;;  %v7268_v25 = vmax.f32 %v4669_v58, 0.0 }
 0x151   :  { %3365 = vmatprep.subr.bf16.mxu0 %v7246_v5  ;;  %3413 = vmatprep.subr.bf16.mxu1 %v7246_v5  ;;  %1692 = vst [vmem:[#allocation6 + $0x408] sm:$0xff] %v7089_v37  ;;  %1693 = vst [vmem:[#allocation6 + $0x410] sm:$0xff] %v7090_v20  ;;  %v5108_v51 = vadd.f32 %v449_v15, %v4487_v28  ;;  %v5113_v34 = vadd.f32 %v704_v36, %v4489_v62  ;;  %v706_v4 = vpop.f32.mrb[35].mxu1  ;;  %v7270_v20 = vmax.f32 %v4704_v53, 0.0  ;;  %v1932_v53 = vld [vmem:[%s7023_s5 + $0x288] sm:$0xff] }
 0x152   :  { %2074 = vmatmul.mubr.f32.gmra.mrb[140].mxu0 %v7267_v42  ;;  %2299 = vmatmul.mubr.f32.gmra.mrb[140].mxu1 %v7268_v25  ;;  %v7269_v42 = vmax.f32 %v4693_v14, 0.0  ;;  %1694 = vst [vmem:[#allocation6 + $0x418] sm:$0xff] %v7091_v29  ;;  %v7092_v37 = vmax.f32 %v5092_v9, 0.0  ;;  %v5123_v15 = vadd.f32 %v706_v4, %v4492_v12  ;;  %v3369_v58 = vpack.c.bf16 %v1930_v2, %v1929_v16  ;;  %v1931_v29 = vld [vmem:[%s7023_s5 + $0x280] sm:$0xff] }
 0x153   :  { %2303 = vmatprep.mubr.f32.mxu1 %v7270_v20  ;;  %3367 = vmatpush1.bf16.msra.mxu0 %v3366_v21  ;;  %v7093_v36 = vmax.f32 %v5108_v51, 0.0  ;;  %v7094_v25 = vmax.f32 %v5113_v34, 0.0  ;;  %v453_v14 = vpop.f32.mrb[36].mxu0  ;;  %v7271_v20 = vmax.f32 %v4685_v19, 0.0  ;;  %v1963_v2 = vld [vmem:[%s7023_s5 + $0x380] sm:$0xff] }
 0x154   :  { %2078 = vmatprep.mubr.f32.mxu0 %v7269_v42  ;;  %3415 = vmatpush1.bf16.msra.mxu1 %v3414_v18  ;;  %v3417_v42 = vpack.c.bf16 %v1962_v11, %v1961_v1  ;;  %1699 = vst [vmem:[#allocation6 + $0x440] sm:$0xff] %v7092_v37  ;;  %v7095_v4 = vmax.f32 %v5123_v15, 0.0  ;;  %v5138_v16 = vadd.f32 %v453_v14, %v4483_v61  ;;  %v455_v21 = vpop.f32.mrb[37].mxu0  ;;  %v710_v18 = vpop.f32.mrb[36].mxu1  ;;  %v1964_v1 = vld [vmem:[%s7023_s5 + $0x388] sm:$0xff]  ;;  %v7272_v11 = vmax.f32 %v4697_v10, 0.0 }
 0x155   :  { %3368 = vmatprep.subr.bf16.mxu0 %v7246_v5  ;;  %3416 = vmatprep.subr.bf16.mxu1 %v7246_v5  ;;  %1700 = vst [vmem:[#allocation6 + $0x448] sm:$0xff] %v7093_v36  ;;  %1701 = vst [vmem:[#allocation6 + $0x450] sm:$0xff] %v7094_v25  ;;  %v5154_v19 = vadd.f32 %v455_v21, %v4487_v28  ;;  %v5159_v14 = vadd.f32 %v710_v18, %v4489_v62  ;;  %v712_v37 = vpop.f32.mrb[37].mxu1  ;;  %v7274_v25 = vmax.f32 %v4732_v44, 0.0  ;;  %v1934_v44 = vld [vmem:[%s7023_s5 + $0x298] sm:$0xff] }
 0x156   :  { %2079 = vmatmul.mubr.f32.gmra.mrb[142].mxu0 %v7271_v20  ;;  %2304 = vmatmul.mubr.f32.gmra.mrb[142].mxu1 %v7272_v11  ;;  %v7273_v20 = vmax.f32 %v4721_v27, 0.0  ;;  %1702 = vst [vmem:[#allocation6 + $0x458] sm:$0xff] %v7095_v4  ;;  %v7096_v36 = vmax.f32 %v5138_v16, 0.0  ;;  %v5169_v21 = vadd.f32 %v712_v37, %v4492_v12  ;;  %v3372_v10 = vpack.c.bf16 %v1932_v53, %v1931_v29  ;;  %v1933_v4 = vld [vmem:[%s7023_s5 + $0x290] sm:$0xff] }
 0x157   :  { %2308 = vmatprep.mubr.f32.mxu1 %v7274_v25  ;;  %3370 = vmatpush1.bf16.msra.mxu0 %v3369_v58  ;;  %v7097_v18 = vmax.f32 %v5154_v19, 0.0  ;;  %v7098_v11 = vmax.f32 %v5159_v14, 0.0  ;;  %v459_v27 = vpop.f32.mrb[38].mxu0  ;;  %v7275_v25 = vmax.f32 %v4713_v23, 0.0  ;;  %v1965_v53 = vld [vmem:[%s7023_s5 + $0x390] sm:$0xff] }
 0x158   :  { %2083 = vmatprep.mubr.f32.mxu0 %v7273_v20  ;;  %3418 = vmatpush1.bf16.msra.mxu1 %v3417_v42  ;;  %v3420_v20 = vpack.c.bf16 %v1964_v1, %v1963_v2  ;;  %1707 = vst [vmem:[#allocation6 + $0x480] sm:$0xff] %v7096_v36  ;;  %v7099_v37 = vmax.f32 %v5169_v21, 0.0  ;;  %v5184_v29 = vadd.f32 %v459_v27, %v4483_v61  ;;  %v461_v58 = vpop.f32.mrb[39].mxu0  ;;  %v716_v42 = vpop.f32.mrb[38].mxu1  ;;  %v1966_v2 = vld [vmem:[%s7023_s5 + $0x398] sm:$0xff]  ;;  %v7276_v1 = vmax.f32 %v4725_v33, 0.0 }
 0x159   :  { %3371 = vmatprep.subr.bf16.mxu0 %v7246_v5  ;;  %3419 = vmatprep.subr.bf16.mxu1 %v7246_v5  ;;  %1708 = vst [vmem:[#allocation6 + $0x488] sm:$0xff] %v7097_v18  ;;  %1709 = vst [vmem:[#allocation6 + $0x490] sm:$0xff] %v7098_v11  ;;  %v5200_v23 = vadd.f32 %v461_v58, %v4487_v28  ;;  %v5205_v27 = vadd.f32 %v716_v42, %v4489_v62  ;;  %v718_v36 = vpop.f32.mrb[39].mxu1  ;;  %v7278_v11 = vmax.f32 %v4760_v46, 0.0  ;;  %v1936_v46 = vld [vmem:[%s7023_s5 + $0x2a8] sm:$0xff] }
 0x15a   :  { %2084 = vmatmul.mubr.f32.gmra.mrb[144].mxu0 %v7275_v25  ;;  %2309 = vmatmul.mubr.f32.gmra.mrb[144].mxu1 %v7276_v1  ;;  %v7277_v25 = vmax.f32 %v4749_v52, 0.0  ;;  %1710 = vst [vmem:[#allocation6 + $0x498] sm:$0xff] %v7099_v37  ;;  %v7100_v18 = vmax.f32 %v5184_v29, 0.0  ;;  %v5215_v58 = vadd.f32 %v718_v36, %v4492_v12  ;;  %v3375_v33 = vpack.c.bf16 %v1934_v44, %v1933_v4  ;;  %v1935_v37 = vld [vmem:[%s7023_s5 + $0x2a0] sm:$0xff] }
 0x15b   :  { %2313 = vmatprep.mubr.f32.mxu1 %v7278_v11  ;;  %3373 = vmatpush1.bf16.msra.mxu0 %v3372_v10  ;;  %v7101_v42 = vmax.f32 %v5200_v23, 0.0  ;;  %v7102_v1 = vmax.f32 %v5205_v27, 0.0  ;;  %v465_v52 = vpop.f32.mrb[40].mxu0  ;;  %v7279_v11 = vmax.f32 %v4741_v32, 0.0  ;;  %v1967_v44 = vld [vmem:[%s7023_s5 + $0x3a0] sm:$0xff] }
 0x15c   :  { %2088 = vmatprep.mubr.f32.mxu0 %v7277_v25  ;;  %3421 = vmatpush1.bf16.msra.mxu1 %v3420_v20  ;;  %v3423_v25 = vpack.c.bf16 %v1966_v2, %v1965_v53  ;;  %1715 = vst [vmem:[#allocation6 + $0x4c0] sm:$0xff] %v7100_v18  ;;  %v7103_v36 = vmax.f32 %v5215_v58, 0.0  ;;  %v5230_v4 = vadd.f32 %v465_v52, %v4483_v61  ;;  %v467_v10 = vpop.f32.mrb[41].mxu0  ;;  %v722_v20 = vpop.f32.mrb[40].mxu1  ;;  %v1968_v53 = vld [vmem:[%s7023_s5 + $0x3a8] sm:$0xff]  ;;  %v7280_v2 = vmax.f32 %v4753_v26, 0.0 }
 0x15d   :  { %3374 = vmatprep.subr.bf16.mxu0 %v7246_v5  ;;  %3422 = vmatprep.subr.bf16.mxu1 %v7246_v5  ;;  %1716 = vst [vmem:[#allocation6 + $0x4c8] sm:$0xff] %v7101_v42  ;;  %1717 = vst [vmem:[#allocation6 + $0x4d0] sm:$0xff] %v7102_v1  ;;  %v5246_v32 = vadd.f32 %v467_v10, %v4487_v28  ;;  %v5251_v52 = vadd.f32 %v722_v20, %v4489_v62  ;;  %v724_v18 = vpop.f32.mrb[41].mxu1  ;;  %v7282_v1 = vmax.f32 %v4803_v49, 0.0  ;;  %v1938_v49 = vld [vmem:[%s7023_s5 + $0x2b8] sm:$0xff] }
 0x15e   :  { %2089 = vmatmul.mubr.f32.gmra.mrb[146].mxu0 %v7279_v11  ;;  %2314 = vmatmul.mubr.f32.gmra.mrb[146].mxu1 %v7280_v2  ;;  %v7281_v11 = vmax.f32 %v4789_v39, 0.0  ;;  %1718 = vst [vmem:[#allocation6 + $0x4d8] sm:$0xff] %v7103_v36  ;;  %v7104_v42 = vmax.f32 %v5230_v4, 0.0  ;;  %v5261_v10 = vadd.f32 %v724_v18, %v4492_v12  ;;  %v3378_v26 = vpack.c.bf16 %v1936_v46, %v1935_v37  ;;  %v1937_v36 = vld [vmem:[%s7023_s5 + $0x2b0] sm:$0xff] }
 0x15f   :  { %2318 = vmatprep.mubr.f32.mxu1 %v7282_v1  ;;  %3376 = vmatpush1.bf16.msra.mxu0 %v3375_v33  ;;  %v7105_v20 = vmax.f32 %v5246_v32, 0.0  ;;  %v7106_v2 = vmax.f32 %v5251_v52, 0.0  ;;  %v471_v39 = vpop.f32.mrb[42].mxu0  ;;  %v7283_v1 = vmax.f32 %v4775_v0, 0.0  ;;  %v1969_v46 = vld [vmem:[%s7023_s5 + $0x3b0] sm:$0xff] }
 0x160   :  { %2093 = vmatprep.mubr.f32.mxu0 %v7281_v11  ;;  %3424 = vmatpush1.bf16.msra.mxu1 %v3423_v25  ;;  %v3426_v11 = vpack.c.bf16 %v1968_v53, %v1967_v44  ;;  %1723 = vst [vmem:[#allocation6 + $0x500] sm:$0xff] %v7104_v42  ;;  %v7107_v18 = vmax.f32 %v5261_v10, 0.0  ;;  %v5276_v37 = vadd.f32 %v471_v39, %v4483_v61  ;;  %v473_v33 = vpop.f32.mrb[43].mxu0  ;;  %v728_v25 = vpop.f32.mrb[42].mxu1  ;;  %v1970_v44 = vld [vmem:[%s7023_s5 + $0x3b8] sm:$0xff]  ;;  %v7284_v53 = vmax.f32 %v4793_v54, 0.0 }
 0x161   :  { %3377 = vmatprep.subr.bf16.mxu0 %v7246_v5  ;;  %3425 = vmatprep.subr.bf16.mxu1 %v7246_v5  ;;  %1724 = vst [vmem:[#allocation6 + $0x508] sm:$0xff] %v7105_v20  ;;  %1725 = vst [vmem:[#allocation6 + $0x510] sm:$0xff] %v7106_v2  ;;  %v5292_v0 = vadd.f32 %v473_v33, %v4487_v28  ;;  %v5297_v39 = vadd.f32 %v728_v25, %v4489_v62  ;;  %v730_v42 = vpop.f32.mrb[43].mxu1  ;;  %v7286_v2 = vmax.f32 %v4847_v45, 0.0  ;;  %v1940_v45 = vld [vmem:[%s7023_s5 + $0x2c8] sm:$0xff] }
 0x162   :  { %2094 = vmatmul.mubr.f32.gmra.mrb[148].mxu0 %v7283_v1  ;;  %2319 = vmatmul.mubr.f32.gmra.mrb[148].mxu1 %v7284_v53  ;;  %v7285_v1 = vmax.f32 %v4832_v43, 0.0  ;;  %1726 = vst [vmem:[#allocation6 + $0x518] sm:$0xff] %v7107_v18  ;;  %v7108_v20 = vmax.f32 %v5276_v37, 0.0  ;;  %v5307_v33 = vadd.f32 %v730_v42, %v4492_v12  ;;  %v3381_v54 = vpack.c.bf16 %v1938_v49, %v1937_v36  ;;  %v1939_v18 = vld [vmem:[%s7023_s5 + $0x2c0] sm:$0xff] }
 0x163   :  { %2323 = vmatprep.mubr.f32.mxu1 %v7286_v2  ;;  %3379 = vmatpush1.bf16.msra.mxu0 %v3378_v26  ;;  %v7109_v25 = vmax.f32 %v5292_v0, 0.0  ;;  %v7110_v53 = vmax.f32 %v5297_v39, 0.0  ;;  %v477_v43 = vpop.f32.mrb[44].mxu0  ;;  %v7287_v2 = vmax.f32 %v4817_v30, 0.0  ;;  %v1971_v49 = vld [vmem:[%s7023_s5 + $0x3c0] sm:$0xff] }
 0x164   :  { %2098 = vmatprep.mubr.f32.mxu0 %v7285_v1  ;;  %3427 = vmatpush1.bf16.msra.mxu1 %v3426_v11  ;;  %v3429_v1 = vpack.c.bf16 %v1970_v44, %v1969_v46  ;;  %1731 = vst [vmem:[#allocation6 + $0x540] sm:$0xff] %v7108_v20  ;;  %v7111_v42 = vmax.f32 %v5307_v33, 0.0  ;;  %v5322_v36 = vadd.f32 %v477_v43, %v4483_v61  ;;  %v479_v26 = vpop.f32.mrb[45].mxu0  ;;  %v734_v11 = vpop.f32.mrb[44].mxu1  ;;  %v1972_v46 = vld [vmem:[%s7023_s5 + $0x3c8] sm:$0xff]  ;;  %v7288_v44 = vmax.f32 %v4837_v59, 0.0 }
 0x165   :  { %3380 = vmatprep.subr.bf16.mxu0 %v7246_v5  ;;  %3428 = vmatprep.subr.bf16.mxu1 %v7246_v5  ;;  %1732 = vst [vmem:[#allocation6 + $0x548] sm:$0xff] %v7109_v25  ;;  %1733 = vst [vmem:[#allocation6 + $0x550] sm:$0xff] %v7110_v53  ;;  %v5338_v30 = vadd.f32 %v479_v26, %v4487_v28  ;;  %v5343_v43 = vadd.f32 %v734_v11, %v4489_v62  ;;  %v736_v20 = vpop.f32.mrb[45].mxu1  ;;  %v7290_v53 = vmax.f32 %v4893_v31, 0.0  ;;  %v1942_v31 = vld [vmem:[%s7023_s5 + $0x2d8] sm:$0xff] }
 0x166   :  { %2099 = vmatmul.mubr.f32.gmra.mrb[150].mxu0 %v7287_v2  ;;  %2324 = vmatmul.mubr.f32.gmra.mrb[150].mxu1 %v7288_v44  ;;  %v7289_v2 = vmax.f32 %v4878_v17, 0.0  ;;  %1734 = vst [vmem:[#allocation6 + $0x558] sm:$0xff] %v7111_v42  ;;  %v7112_v25 = vmax.f32 %v5322_v36, 0.0  ;;  %v5353_v26 = vadd.f32 %v736_v20, %v4492_v12  ;;  %v3384_v59 = vpack.c.bf16 %v1940_v45, %v1939_v18  ;;  %v1941_v42 = vld [vmem:[%s7023_s5 + $0x2d0] sm:$0xff] }
 0x167   :  { %2328 = vmatprep.mubr.f32.mxu1 %v7290_v53  ;;  %3382 = vmatpush1.bf16.msra.mxu0 %v3381_v54  ;;  %v7113_v11 = vmax.f32 %v5338_v30, 0.0  ;;  %v7114_v44 = vmax.f32 %v5343_v43, 0.0  ;;  %v483_v17 = vpop.f32.mrb[46].mxu0  ;;  %v7291_v53 = vmax.f32 %v4862_v38, 0.0  ;;  %v1973_v45 = vld [vmem:[%s7023_s5 + $0x3d0] sm:$0xff] }
 0x168   :  { %2103 = vmatprep.mubr.f32.mxu0 %v7289_v2  ;;  %3430 = vmatpush1.bf16.msra.mxu1 %v3429_v1  ;;  %v3432_v2 = vpack.c.bf16 %v1972_v46, %v1971_v49  ;;  %1739 = vst [vmem:[#allocation6 + $0x580] sm:$0xff] %v7112_v25  ;;  %v7115_v20 = vmax.f32 %v5353_v26, 0.0  ;;  %v5368_v18 = vadd.f32 %v483_v17, %v4483_v61  ;;  %v485_v54 = vpop.f32.mrb[47].mxu0  ;;  %v740_v1 = vpop.f32.mrb[46].mxu1  ;;  %v1974_v49 = vld [vmem:[%s7023_s5 + $0x3d8] sm:$0xff]  ;;  %v7292_v46 = vmax.f32 %v4883_v13, 0.0 }
 0x169   :  { %3383 = vmatprep.subr.bf16.mxu0 %v7246_v5  ;;  %3431 = vmatprep.subr.bf16.mxu1 %v7246_v5  ;;  %1740 = vst [vmem:[#allocation6 + $0x588] sm:$0xff] %v7113_v11  ;;  %1741 = vst [vmem:[#allocation6 + $0x590] sm:$0xff] %v7114_v44  ;;  %v5384_v38 = vadd.f32 %v485_v54, %v4487_v28  ;;  %v5389_v17 = vadd.f32 %v740_v1, %v4489_v62  ;;  %v742_v25 = vpop.f32.mrb[47].mxu1  ;;  %v7294_v44 = vmax.f32 %v4939_v41, 0.0  ;;  %v1944_v41 = vld [vmem:[%s7023_s5 + $0x2e8] sm:$0xff] }
 0x16a   :  { %2104 = vmatmul.mubr.f32.gmra.mrb[152].mxu0 %v7291_v53  ;;  %2329 = vmatmul.mubr.f32.gmra.mrb[152].mxu1 %v7292_v46  ;;  %v7293_v53 = vmax.f32 %v4924_v35, 0.0  ;;  %1742 = vst [vmem:[#allocation6 + $0x598] sm:$0xff] %v7115_v20  ;;  %v7116_v11 = vmax.f32 %v5368_v18, 0.0  ;;  %v5399_v54 = vadd.f32 %v742_v25, %v4492_v12  ;;  %v3387_v13 = vpack.c.bf16 %v1942_v31, %v1941_v42  ;;  %v1943_v20 = vld [vmem:[%s7023_s5 + $0x2e0] sm:$0xff] }
 0x16b   :  { %2333 = vmatprep.mubr.f32.mxu1 %v7294_v44  ;;  %3385 = vmatpush1.bf16.msra.mxu0 %v3384_v59  ;;  %v7117_v1 = vmax.f32 %v5384_v38, 0.0  ;;  %v7118_v46 = vmax.f32 %v5389_v17, 0.0  ;;  %v489_v35 = vpop.f32.mrb[48].mxu0  ;;  %v7295_v44 = vmax.f32 %v4908_v6, 0.0  ;;  %v1975_v31 = vld [vmem:[%s7023_s5 + $0x3e0] sm:$0xff] }
 0x16c   :  { %2108 = vmatprep.mubr.f32.mxu0 %v7293_v53  ;;  %3433 = vmatpush1.bf16.msra.mxu1 %v3432_v2  ;;  %v3435_v53 = vpack.c.bf16 %v1974_v49, %v1973_v45  ;;  %1747 = vst [vmem:[#allocation6 + $0x5c0] sm:$0xff] %v7116_v11  ;;  %v7119_v25 = vmax.f32 %v5399_v54, 0.0  ;;  %v5414_v42 = vadd.f32 %v489_v35, %v4483_v61  ;;  %v491_v59 = vpop.f32.mrb[49].mxu0  ;;  %v746_v2 = vpop.f32.mrb[48].mxu1  ;;  %v1976_v45 = vld [vmem:[%s7023_s5 + $0x3e8] sm:$0xff]  ;;  %v7296_v49 = vmax.f32 %v4929_v48, 0.0 }
 0x16d   :  { %3386 = vmatprep.subr.bf16.mxu0 %v7246_v5  ;;  %3434 = vmatprep.subr.bf16.mxu1 %v7246_v5  ;;  %1748 = vst [vmem:[#allocation6 + $0x5c8] sm:$0xff] %v7117_v1  ;;  %1749 = vst [vmem:[#allocation6 + $0x5d0] sm:$0xff] %v7118_v46  ;;  %v5430_v6 = vadd.f32 %v491_v59, %v4487_v28  ;;  %v5435_v35 = vadd.f32 %v746_v2, %v4489_v62  ;;  %v748_v11 = vpop.f32.mrb[49].mxu1  ;;  %v7298_v46 = vmax.f32 %v4985_v22, 0.0  ;;  %v1946_v22 = vld [vmem:[%s7023_s5 + $0x2f8] sm:$0xff] }
 0x16e   :  { %2109 = vmatmul.mubr.f32.gmra.mrb[154].mxu0 %v7295_v44  ;;  %2334 = vmatmul.mubr.f32.gmra.mrb[154].mxu1 %v7296_v49  ;;  %v7297_v44 = vmax.f32 %v4970_v55, 0.0  ;;  %1750 = vst [vmem:[#allocation6 + $0x5d8] sm:$0xff] %v7119_v25  ;;  %v7120_v1 = vmax.f32 %v5414_v42, 0.0  ;;  %v5445_v59 = vadd.f32 %v748_v11, %v4492_v12  ;;  %v3390_v48 = vpack.c.bf16 %v1944_v41, %v1943_v20  ;;  %v1945_v25 = vld [vmem:[%s7023_s5 + $0x2f0] sm:$0xff] }
 0x16f   :  { %2338 = vmatprep.mubr.f32.mxu1 %v7298_v46  ;;  %3388 = vmatpush1.bf16.msra.mxu0 %v3387_v13  ;;  %v7121_v2 = vmax.f32 %v5430_v6, 0.0  ;;  %v7122_v49 = vmax.f32 %v5435_v35, 0.0  ;;  %v495_v55 = vpop.f32.mrb[50].mxu0  ;;  %v7299_v46 = vmax.f32 %v4954_v40, 0.0  ;;  %v1977_v41 = vld [vmem:[%s7023_s5 + $0x3f0] sm:$0xff] }
 0x170   :  { %2113 = vmatprep.mubr.f32.mxu0 %v7297_v44  ;;  %3436 = vmatpush1.bf16.msra.mxu1 %v3435_v53  ;;  %v3438_v44 = vpack.c.bf16 %v1976_v45, %v1975_v31  ;;  %1755 = vst [vmem:[#allocation6 + $0x600] sm:$0xff] %v7120_v1  ;;  %v1502_v11 = vmax.f32 %v5445_v59, 0.0  ;;  %v5460_v20 = vadd.f32 %v495_v55, %v4483_v61  ;;  %v497_v13 = vpop.f32.mrb[51].mxu0  ;;  %v752_v53 = vpop.f32.mrb[50].mxu1  ;;  %v1978_v31 = vld [vmem:[%s7023_s5 + $0x3f8] sm:$0xff]  ;;  %v7300_v45 = vmax.f32 %v4975_v57, 0.0 }
 0x171   :  { %3389 = vmatprep.subr.bf16.mxu0 %v7246_v5  ;;  %3437 = vmatprep.subr.bf16.mxu1 %v7246_v5  ;;  %1756 = vst [vmem:[#allocation6 + $0x608] sm:$0xff] %v7121_v2  ;;  %1757 = vst [vmem:[#allocation6 + $0x610] sm:$0xff] %v7122_v49  ;;  %v5476_v40 = vadd.f32 %v497_v13, %v4487_v28  ;;  %v5481_v55 = vadd.f32 %v752_v53, %v4489_v62  ;;  %v754_v1 = vpop.f32.mrb[51].mxu1  ;;  %v7302_v49 = vmax.f32 %v5031_v50, 0.0 }
 0x172   :  { %2114 = vmatmul.mubr.f32.gmra.mrb[156].mxu0 %v7299_v46  ;;  %2339 = vmatmul.mubr.f32.gmra.mrb[156].mxu1 %v7300_v45  ;;  %v7301_v46 = vmax.f32 %v5016_v60, 0.0  ;;  %1758 = vst [vmem:[#allocation6 + $0x618] sm:$0xff] %v1502_v11  ;;  %v7140_v2 = vmax.f32 %v5460_v20, 0.0  ;;  %v5491_v13 = vadd.f32 %v754_v1, %v4492_v12  ;;  %v3393_v57 = vpack.c.bf16 %v1946_v22, %v1945_v25 }
 0x173   :  { %2343 = vmatprep.mubr.f32.mxu1 %v7302_v49  ;;  %3391 = vmatpush1.bf16.msra.mxu0 %v3390_v48  ;;  %v1508_v53 = vmax.f32 %v5476_v40, 0.0  ;;  %v7136_v45 = vmax.f32 %v5481_v55, 0.0  ;;  %v501_v60 = vpop.f32.mrb[52].mxu0  ;;  %v7303_v25 = vmax.f32 %v5000_v8, 0.0  ;;  %v7304_v22 = vmax.f32 %v5021_v3, 0.0 }
 0x174   :  { %2118 = vmatprep.mubr.f32.mxu0 %v7301_v46  ;;  %3439 = vmatpush1.bf16.msra.mxu1 %v3438_v44  ;;  %v3441_v46 = vpack.c.bf16 %v1978_v31, %v1977_v41  ;;  %1763 = vst [vmem:[#allocation6 + $0x640] sm:$0xff] %v7140_v2  ;;  %v7141_v50 = vmax.f32 %v5491_v13, 0.0  ;;  %v5500_v49 = vadd.f32 %v501_v60, %v4483_v61  ;;  %v503_v1 = vpop.f32.mrb[53].mxu0  ;;  %v758_v48 = vpop.f32.mrb[52].mxu1  ;;  %v7305_v8 = vmax.f32 %v5062_v47, 0.0 }
 0x175   :  { %3392 = vmatprep.subr.bf16.mxu0 %v7246_v5  ;;  %3440 = vmatprep.subr.bf16.mxu1 %v7246_v5  ;;  %1764 = vst [vmem:[#allocation6 + $0x648] sm:$0xff] %v1508_v53  ;;  %1765 = vst [vmem:[#allocation6 + $0x650] sm:$0xff] %v7136_v45  ;;  %v5510_v44 = vadd.f32 %v503_v1, %v4487_v28  ;;  %v5515_v41 = vadd.f32 %v758_v48, %v4489_v62  ;;  %v760_v31 = vpop.f32.mrb[53].mxu1  ;;  %v7306_v60 = vmax.f32 %v5077_v63, 0.0 }
 0x176   :  { %2119 = vmatmul.mubr.f32.gmra.mrb[158].mxu0 %v7303_v25  ;;  %2344 = vmatmul.mubr.f32.gmra.mrb[158].mxu1 %v7304_v22  ;;  %1766 = vst [vmem:[#allocation6 + $0x658] sm:$0xff] %v7141_v50  ;;  %v7124_v5 = vmax.f32 %v5500_v49, 0.0  ;;  %v5525_v1 = vadd.f32 %v760_v31, %v4492_v12  ;;  %v265_v45 = vsub.s32 6, %v4466_v24  ;;  %v7338_v59 = vmax.f32 %v5414_v42, 0.0 }
 0x177   :  { %2123 = vmatprep.mubr.f32.mxu0 %v7305_v8  ;;  %2348 = vmatprep.mubr.f32.mxu1 %v7306_v60  ;;  %v7135_v3 = vmax.f32 %v5510_v44, 0.0  ;;  %v7123_v25 = vmax.f32 %v5515_v41, 0.0  ;;  %v507_v48 = vpop.f32.mrb[54].mxu0  ;;  %v7307_v8 = vmax.f32 %v5046_v7, 0.0 }
 0x178   :  { %3394 = vmatpush1.bf16.msra.mxu0 %v3393_v57  ;;  %3442 = vmatpush1.bf16.msra.mxu1 %v3441_v46  ;;  %1771 = vst [vmem:[#allocation6 + $0x680] sm:$0xff] %v7124_v5  ;;  %v7126_v47 = vmax.f32 %v5525_v1, 0.0  ;;  %v5533_v22 = vadd.f32 %v507_v48, %v4483_v61  ;;  %v509_v63 = vpop.f32.mrb[55].mxu0  ;;  %v764_v31 = vpop.f32.mrb[54].mxu1  ;;  %v7308_v46 = vmax.f32 %v5067_v56, 0.0  ;;  %v7309_v48 = vmax.f32 %v5108_v51, 0.0 }
 0x179   :  { %1772 = vst [vmem:[#allocation6 + $0x688] sm:$0xff] %v7135_v3  ;;  %1773 = vst [vmem:[#allocation6 + $0x690] sm:$0xff] %v7123_v25  ;;  %v5542_v57 = vadd.f32 %v509_v63, %v4487_v28  ;;  %v5547_v60 = vadd.f32 %v764_v31, %v4489_v62  ;;  %v766_v7 = vpop.f32.mrb[55].mxu1  ;;  %v7310_v25 = vmax.f32 %v5123_v15, 0.0  ;;  %v7311_v15 = vmax.f32 %v5092_v9, 0.0 }
 0x17a   :  { %2124 = vmatmul.mubr.f32.gmra.mrb[160].mxu0 %v7307_v8  ;;  %2349 = vmatmul.mubr.f32.gmra.mrb[160].mxu1 %v7308_v46  ;;  %1774 = vst [vmem:[#allocation6 + $0x698] sm:$0xff] %v7126_v47  ;;  %v7125_v8 = vmax.f32 %v5533_v22, 0.0  ;;  %v5557_v63 = vadd.f32 %v766_v7, %v4492_v12  ;;  %v7313_v47 = vmax.f32 %v5154_v19, 0.0 }
 0x17b   :  { %2128 = vmatprep.mubr.f32.mxu0 %v7309_v48  ;;  %2353 = vmatprep.mubr.f32.mxu1 %v7310_v25  ;;  %v7130_v56 = vmax.f32 %v5542_v57, 0.0  ;;  %v7127_v31 = vmax.f32 %v5547_v60, 0.0  ;;  %v513_v46 = vpop.f32.mrb[56].mxu0 }
 0x17c   :  { %1779 = vst [vmem:[#allocation6 + $0x6c0] sm:$0xff] %v7125_v8  ;;  %v7128_v51 = vmax.f32 %v5557_v63, 0.0  ;;  %v5565_v48 = vadd.f32 %v513_v46, %v4483_v61  ;;  %v515_v5 = vpop.f32.mrb[57].mxu0  ;;  %v770_v25 = vpop.f32.mrb[56].mxu1  ;;  %v7312_v8 = vmax.f32 %v5113_v34, 0.0 }
 0x17d   :  { %1780 = vst [vmem:[#allocation6 + $0x6c8] sm:$0xff] %v7130_v56  ;;  %1781 = vst [vmem:[#allocation6 + $0x6d0] sm:$0xff] %v7127_v31  ;;  %v5574_v7 = vadd.f32 %v515_v5, %v4487_v28  ;;  %v5579_v46 = vadd.f32 %v770_v25, %v4489_v62  ;;  %v772_v9 = vpop.f32.mrb[57].mxu1  ;;  %v7314_v31 = vmax.f32 %v5169_v21, 0.0  ;;  %v7315_v21 = vmax.f32 %v5138_v16, 0.0 }
 0x17e   :  { %2129 = vmatmul.mubr.f32.gmra.mrb[162].mxu0 %v7311_v15  ;;  %2354 = vmatmul.mubr.f32.gmra.mrb[162].mxu1 %v7312_v8  ;;  %1782 = vst [vmem:[#allocation6 + $0x6d8] sm:$0xff] %v7128_v51  ;;  %v7129_v15 = vmax.f32 %v5565_v48, 0.0  ;;  %v5589_v5 = vadd.f32 %v772_v9, %v4492_v12  ;;  %v7317_v56 = vmax.f32 %v5200_v23, 0.0 }
 0x17f   :  { %2133 = vmatprep.mubr.f32.mxu0 %v7313_v47  ;;  %2358 = vmatprep.mubr.f32.mxu1 %v7314_v31  ;;  %v7133_v34 = vmax.f32 %v5574_v7, 0.0  ;;  %v7131_v8 = vmax.f32 %v5579_v46, 0.0  ;;  %v519_v25 = vpop.f32.mrb[58].mxu0 }
 0x180   :  { %1787 = vst [vmem:[#allocation6 + $0x700] sm:$0xff] %v7129_v15  ;;  %v7132_v19 = vmax.f32 %v5589_v5, 0.0  ;;  %v5597_v47 = vadd.f32 %v519_v25, %v4483_v61  ;;  %v521_v51 = vpop.f32.mrb[59].mxu0  ;;  %v776_v31 = vpop.f32.mrb[58].mxu1  ;;  %v7316_v15 = vmax.f32 %v5159_v14, 0.0 }
 0x181   :  { %1788 = vst [vmem:[#allocation6 + $0x708] sm:$0xff] %v7133_v34  ;;  %1789 = vst [vmem:[#allocation6 + $0x710] sm:$0xff] %v7131_v8  ;;  %v5606_v9 = vadd.f32 %v521_v51, %v4487_v28  ;;  %v5611_v25 = vadd.f32 %v776_v31, %v4489_v62  ;;  %v778_v16 = vpop.f32.mrb[59].mxu1  ;;  %v7318_v8 = vmax.f32 %v5215_v58, 0.0  ;;  %v7319_v58 = vmax.f32 %v5184_v29, 0.0 }
 0x182   :  { %2134 = vmatmul.mubr.f32.gmra.mrb[164].mxu0 %v7315_v21  ;;  %2359 = vmatmul.mubr.f32.gmra.mrb[164].mxu1 %v7316_v15  ;;  %1790 = vst [vmem:[#allocation6 + $0x718] sm:$0xff] %v7132_v19  ;;  %v7134_v21 = vmax.f32 %v5597_v47, 0.0  ;;  %v5621_v51 = vadd.f32 %v778_v16, %v4492_v12  ;;  %v257_v16 = vsub.s32 4, %v4466_v24  ;;  %v261_v34 = vsub.s32 5, %v4466_v24 }
 0x183   :  { %2138 = vmatprep.mubr.f32.mxu0 %v7317_v56  ;;  %2363 = vmatprep.mubr.f32.mxu1 %v7318_v8  ;;  %v7139_v14 = vmax.f32 %v5606_v9, 0.0  ;;  %v7137_v15 = vmax.f32 %v5611_v25, 0.0  ;;  %v525_v31 = vpop.f32.mrb[60].mxu0 }
 0x184   :  { %1795 = vst [vmem:[#allocation6 + $0x740] sm:$0xff] %v7134_v21  ;;  %v7138_v23 = vmax.f32 %v5621_v51, 0.0  ;;  %v5629_v56 = vadd.f32 %v525_v31, %v4483_v61  ;;  %v527_v19 = vpop.f32.mrb[61].mxu0  ;;  %v782_v8 = vpop.f32.mrb[60].mxu1  ;;  %v7320_v31 = vmax.f32 %v5205_v27, 0.0 }
 0x185   :  { %1796 = vst [vmem:[#allocation6 + $0x748] sm:$0xff] %v7139_v14  ;;  %1797 = vst [vmem:[#allocation6 + $0x750] sm:$0xff] %v7137_v15  ;;  %v5640_v21 = vadd.f32 %v527_v19, %v4487_v28  ;;  %v5645_v29 = vadd.f32 %v782_v8, %v4489_v62  ;;  %v784_v3 = vpop.f32.mrb[61].mxu1  ;;  %v7322_v19 = vmax.f32 %v5261_v10, 0.0  ;;  %v269_v8 = vsub.s32 7, %v4466_v24  ;;  %v3452_v24 = vld [vmem:[%s7020_s2] sm:$0xff] }
 0x186   :  { %2139 = vmatmul.mubr.f32.gmra.mrb[166].mxu0 %v7319_v58  ;;  %2364 = vmatmul.mubr.f32.gmra.mrb[166].mxu1 %v7320_v31  ;;  %v7321_v58 = vmax.f32 %v5246_v32, 0.0  ;;  %1798 = vst [vmem:[#allocation6 + $0x758] sm:$0xff] %v7138_v23  ;;  %v1547_v15 = vmax.f32 %v5629_v56, 0.0  ;;  %v5656_v27 = vadd.f32 %v784_v3, %v4492_v12  ;;  %v5672_v2 = vrot.slane %v3452_v24, %v257_v16 }
 0x187   :  { %2368 = vmatprep.mubr.f32.mxu1 %v7322_v19  ;;  %v1548_v31 = vmax.f32 %v5640_v21, 0.0  ;;  %v7142_v32 = vmax.f32 %v5645_v29, 0.0  ;;  %v7323_v19 = vmax.f32 %v5230_v4, 0.0  ;;  %v5674_v50 = vrot.slane %v3452_v24, %v261_v34 }
 0x188   :  { %2143 = vmatprep.mubr.f32.mxu0 %v7321_v58  ;;  %v531_v58 = vpop.f32.mrb[62].mxu0  ;;  %1803 = vst [vmem:[#allocation6 + $0x780] sm:$0xff] %v1547_v15  ;;  %v1550_v23 = vmax.f32 %v5656_v27, 0.0  ;;  %v788_v3 = vpop.f32.mrb[62].mxu1  ;;  %v7324_v4 = vmax.f32 %v5251_v52, 0.0  ;;  %v7325_v16 = vmax.f32 %v5292_v0, 0.0 }
 0x189   :  { %v5665_v14 = vadd.f32 %v531_v58, %v4483_v61  ;;  %v533_v10 = vpop.f32.mrb[63].mxu0  ;;  %1804 = vst [vmem:[#allocation6 + $0x788] sm:$0xff] %v1548_v31  ;;  %1805 = vst [vmem:[#allocation6 + $0x790] sm:$0xff] %v7142_v32  ;;  %v5686_v58 = vadd.f32 %v788_v3, %v4489_v62  ;;  %v790_v34 = vpop.f32.mrb[63].mxu1 }
 0x18a   :  { %2144 = vmatmul.mubr.f32.gmra.mrb[168].mxu0 %v7323_v19  ;;  %v5681_v61 = vadd.f32 %v533_v10, %v4487_v28  ;;  %2369 = vmatmul.mubr.f32.gmra.mrb[168].mxu1 %v7324_v4  ;;  %v5690_v19 = vrot.slane %v3452_v24, %v265_v45  ;;  %1806 = vst [vmem:[#allocation6 + $0x798] sm:$0xff] %v1550_v23  ;;  %v7326_v28 = vmax.f32 %v5307_v33, 0.0 }
 0x18b   :  { %2148 = vmatprep.mubr.f32.mxu0 %v7325_v16  ;;  %v7145_v32 = vmax.f32 %v5665_v14, 0.0  ;;  %v5698_v52 = vadd.f32 %v790_v34, %v4492_v12  ;;  %v5700_v10 = vrot.slane %v3452_v24, %v269_v8  ;;  %v7143_v0 = vmax.f32 %v5686_v58, 0.0  ;;  %v859_v3 = vpop.f32.mrb[64].mxu0 }
 0x18c   :  { %2373 = vmatprep.mubr.f32.mxu1 %v7326_v28  ;;  %v1556_v62 = vmax.f32 %v5681_v61, 0.0  ;;  %v5708_v4 = vadd.f32 %v859_v3, %v5672_v2  ;;  %v861_v33 = vpop.f32.mrb[65].mxu0  ;;  %v7327_v16 = vmax.f32 %v5276_v37, 0.0  ;;  %v1116_v12 = vpop.f32.mrb[64].mxu1  ;;  %v7328_v24 = vmax.f32 %v5297_v39, 0.0 }
 0x18d   :  { %1811 = vst [vmem:[#allocation6 + $0x7c0] sm:$0xff] %v7145_v32  ;;  %v1558_v45 = vmax.f32 %v5698_v52, 0.0  ;;  %1813 = vst [vmem:[#allocation6 + $0x7d0] sm:$0xff] %v7143_v0  ;;  %v5717_v8 = vadd.f32 %v861_v33, %v5674_v50  ;;  %v5722_v34 = vadd.f32 %v1116_v12, %v5690_v19  ;;  %v7329_v28 = vmax.f32 %v5338_v30, 0.0  ;;  %v1118_v37 = vpop.f32.mrb[65].mxu1 }
 0x18e   :  { %2149 = vmatmul.mubr.f32.gmra.mrb[170].mxu0 %v7327_v16  ;;  %1812 = vst [vmem:[#allocation6 + $0x7c8] sm:$0xff] %v1556_v62  ;;  %2374 = vmatmul.mubr.f32.gmra.mrb[170].mxu1 %v7328_v24  ;;  %v7144_v3 = vmax.f32 %v5708_v4, 0.0  ;;  %v7330_v16 = vmax.f32 %v5353_v26, 0.0  ;;  %v5732_v33 = vadd.f32 %v1118_v37, %v5700_v10  ;;  %v7331_v26 = vmax.f32 %v5322_v36, 0.0 }
 0x18f   :  { %2153 = vmatprep.mubr.f32.mxu0 %v7329_v28  ;;  %1814 = vst [vmem:[#allocation6 + $0x7d8] sm:$0xff] %v1558_v45  ;;  %v7149_v39 = vmax.f32 %v5717_v8, 0.0  ;;  %v7146_v12 = vmax.f32 %v5722_v34, 0.0  ;;  %v865_v24 = vpop.f32.mrb[66].mxu0  ;;  %v7333_v32 = vmax.f32 %v5384_v38, 0.0  ;;  %v7360_v52 = vmax.f32 %v5665_v14, 0.0 }
 0x190   :  { %2378 = vmatprep.mubr.f32.mxu1 %v7330_v16  ;;  %1567 = vst [vmem:[#allocation6 + $0x20] sm:$0xff] %v7144_v3  ;;  %v7147_v30 = vmax.f32 %v5732_v33, 0.0  ;;  %v5740_v28 = vadd.f32 %v865_v24, %v5672_v2  ;;  %v867_v0 = vpop.f32.mrb[67].mxu0  ;;  %v1122_v16 = vpop.f32.mrb[66].mxu1  ;;  %v7332_v3 = vmax.f32 %v5343_v43, 0.0 }
 0x191   :  { %1568 = vst [vmem:[#allocation6 + $0x28] sm:$0xff] %v7149_v39  ;;  %1569 = vst [vmem:[#allocation6 + $0x30] sm:$0xff] %v7146_v12  ;;  %v5749_v37 = vadd.f32 %v867_v0, %v5674_v50  ;;  %v5754_v24 = vadd.f32 %v1122_v16, %v5690_v19  ;;  %v1124_v36 = vpop.f32.mrb[67].mxu1  ;;  %v7334_v12 = vmax.f32 %v5399_v54, 0.0  ;;  %v7335_v54 = vmax.f32 %v5368_v18, 0.0 }
 0x192   :  { %2154 = vmatmul.mubr.f32.gmra.mrb[172].mxu0 %v7331_v26  ;;  %2379 = vmatmul.mubr.f32.gmra.mrb[172].mxu1 %v7332_v3  ;;  %1570 = vst [vmem:[#allocation6 + $0x38] sm:$0xff] %v7147_v30  ;;  %v7148_v26 = vmax.f32 %v5740_v28, 0.0  ;;  %v5764_v0 = vadd.f32 %v1124_v36, %v5700_v10  ;;  %v7337_v39 = vmax.f32 %v5430_v6, 0.0 }
 0x193   :  { %2158 = vmatprep.mubr.f32.mxu0 %v7333_v32  ;;  %2383 = vmatprep.mubr.f32.mxu1 %v7334_v12  ;;  %v1320_v43 = vmax.f32 %v5749_v37, 0.0  ;;  %v7150_v3 = vmax.f32 %v5754_v24, 0.0  ;;  %v871_v16 = vpop.f32.mrb[68].mxu0 }
 0x194   :  { %1575 = vst [vmem:[#allocation6 + $0x60] sm:$0xff] %v7148_v26  ;;  %v1322_v38 = vmax.f32 %v5764_v0, 0.0  ;;  %v5772_v32 = vadd.f32 %v871_v16, %v5672_v2  ;;  %v873_v30 = vpop.f32.mrb[69].mxu0  ;;  %v1128_v12 = vpop.f32.mrb[68].mxu1  ;;  %v7336_v26 = vmax.f32 %v5389_v17, 0.0  ;;  %v7366_v0 = vmax.f32 %v5740_v28, 0.0 }
 0x195   :  { %1576 = vst [vmem:[#allocation6 + $0x68] sm:$0xff] %v1320_v43  ;;  %1577 = vst [vmem:[#allocation6 + $0x70] sm:$0xff] %v7150_v3  ;;  %v5781_v36 = vadd.f32 %v873_v30, %v5674_v50  ;;  %v5786_v16 = vadd.f32 %v1128_v12, %v5690_v19  ;;  %v1130_v18 = vpop.f32.mrb[69].mxu1 }
 0x196   :  { %2159 = vmatmul.mubr.f32.gmra.mrb[174].mxu0 %v7335_v54  ;;  %2384 = vmatmul.mubr.f32.gmra.mrb[174].mxu1 %v7336_v26  ;;  %1578 = vst [vmem:[#allocation6 + $0x78] sm:$0xff] %v1322_v38  ;;  %v7151_v54 = vmax.f32 %v5772_v32, 0.0  ;;  %v5796_v30 = vadd.f32 %v1130_v18, %v5700_v10 }
 0x197   :  { %2163 = vmatprep.mubr.f32.mxu0 %v7337_v39  ;;  %2388 = vmatprep.mubr.f32.mxu1 %v1502_v11  ;;  %v7155_v17 = vmax.f32 %v5781_v36, 0.0  ;;  %v7152_v26 = vmax.f32 %v5786_v16, 0.0  ;;  %v877_v12 = vpop.f32.mrb[70].mxu0 }
 0x198   :  { %1583 = vst [vmem:[#allocation6 + $0xa0] sm:$0xff] %v7151_v54  ;;  %v7153_v6 = vmax.f32 %v5796_v30, 0.0  ;;  %v5804_v39 = vadd.f32 %v877_v12, %v5672_v2  ;;  %v879_v3 = vpop.f32.mrb[71].mxu0  ;;  %v1134_v11 = vpop.f32.mrb[70].mxu1  ;;  %v7339_v54 = vmax.f32 %v5435_v35, 0.0 }
 0x199   :  { %1584 = vst [vmem:[#allocation6 + $0xa8] sm:$0xff] %v7155_v17  ;;  %1585 = vst [vmem:[#allocation6 + $0xb0] sm:$0xff] %v7152_v26  ;;  %v5813_v18 = vadd.f32 %v879_v3, %v5674_v50  ;;  %v5818_v12 = vadd.f32 %v1134_v11, %v5690_v19  ;;  %v1136_v42 = vpop.f32.mrb[71].mxu1  ;;  %v7340_v26 = vmax.f32 %v5491_v13, 0.0  ;;  %v7341_v13 = vmax.f32 %v5460_v20, 0.0 }
 0x19a   :  { %2164 = vmatmul.mubr.f32.gmra.mrb[176].mxu0 %v7338_v59  ;;  %2389 = vmatmul.mubr.f32.gmra.mrb[176].mxu1 %v7339_v54  ;;  %1586 = vst [vmem:[#allocation6 + $0xb8] sm:$0xff] %v7153_v6  ;;  %v7154_v59 = vmax.f32 %v5804_v39, 0.0  ;;  %v5828_v3 = vadd.f32 %v1136_v42, %v5700_v10  ;;  %v7343_v17 = vmax.f32 %v5510_v44, 0.0 }
 0x19b   :  { %2168 = vmatprep.mubr.f32.mxu0 %v1508_v53  ;;  %2393 = vmatprep.mubr.f32.mxu1 %v7340_v26  ;;  %v7159_v35 = vmax.f32 %v5813_v18, 0.0  ;;  %v7156_v54 = vmax.f32 %v5818_v12, 0.0  ;;  %v883_v11 = vpop.f32.mrb[72].mxu0 }
 0x19c   :  { %1591 = vst [vmem:[#allocation6 + $0xe0] sm:$0xff] %v7154_v59  ;;  %v7157_v40 = vmax.f32 %v5828_v3, 0.0  ;;  %v5836_v53 = vadd.f32 %v883_v11, %v5672_v2  ;;  %v885_v6 = vpop.f32.mrb[73].mxu0  ;;  %v1140_v26 = vpop.f32.mrb[72].mxu1  ;;  %v7342_v59 = vmax.f32 %v5481_v55, 0.0 }
 0x19d   :  { %1592 = vst [vmem:[#allocation6 + $0xe8] sm:$0xff] %v7159_v35  ;;  %1593 = vst [vmem:[#allocation6 + $0xf0] sm:$0xff] %v7156_v54  ;;  %v5845_v42 = vadd.f32 %v885_v6, %v5674_v50  ;;  %v5850_v11 = vadd.f32 %v1140_v26, %v5690_v19  ;;  %v1142_v20 = vpop.f32.mrb[73].mxu1  ;;  %v7344_v54 = vmax.f32 %v5525_v1, 0.0  ;;  %v7345_v1 = vmax.f32 %v5500_v49, 0.0 }
 0x19e   :  { %2169 = vmatmul.mubr.f32.gmra.mrb[178].mxu0 %v7341_v13  ;;  %2394 = vmatmul.mubr.f32.gmra.mrb[178].mxu1 %v7342_v59  ;;  %1594 = vst [vmem:[#allocation6 + $0xf8] sm:$0xff] %v7157_v40  ;;  %v7158_v13 = vmax.f32 %v5836_v53, 0.0  ;;  %v5860_v6 = vadd.f32 %v1142_v20, %v5700_v10  ;;  %v7347_v35 = vmax.f32 %v5542_v57, 0.0 }
 0x19f   :  { %2173 = vmatprep.mubr.f32.mxu0 %v7343_v17  ;;  %2398 = vmatprep.mubr.f32.mxu1 %v7344_v54  ;;  %v7163_v55 = vmax.f32 %v5845_v42, 0.0  ;;  %v7160_v59 = vmax.f32 %v5850_v11, 0.0  ;;  %v889_v26 = vpop.f32.mrb[74].mxu0 }
 0x1a0   :  { %1599 = vst [vmem:[#allocation6 + $0x120] sm:$0xff] %v7158_v13  ;;  %v7161_v44 = vmax.f32 %v5860_v6, 0.0  ;;  %v5868_v17 = vadd.f32 %v889_v26, %v5672_v2  ;;  %v891_v40 = vpop.f32.mrb[75].mxu0  ;;  %v1146_v54 = vpop.f32.mrb[74].mxu1  ;;  %v7346_v13 = vmax.f32 %v5515_v41, 0.0 }
 0x1a1   :  { %1600 = vst [vmem:[#allocation6 + $0x128] sm:$0xff] %v7163_v55  ;;  %1601 = vst [vmem:[#allocation6 + $0x130] sm:$0xff] %v7160_v59  ;;  %v5877_v20 = vadd.f32 %v891_v40, %v5674_v50  ;;  %v5882_v26 = vadd.f32 %v1146_v54, %v5690_v19  ;;  %v1148_v49 = vpop.f32.mrb[75].mxu1  ;;  %v7348_v59 = vmax.f32 %v5557_v63, 0.0  ;;  %v7349_v63 = vmax.f32 %v5533_v22, 0.0 }
 0x1a2   :  { %2174 = vmatmul.mubr.f32.gmra.mrb[180].mxu0 %v7345_v1  ;;  %2399 = vmatmul.mubr.f32.gmra.mrb[180].mxu1 %v7346_v13  ;;  %1602 = vst [vmem:[#allocation6 + $0x138] sm:$0xff] %v7161_v44  ;;  %v7162_v1 = vmax.f32 %v5868_v17, 0.0  ;;  %v5892_v40 = vadd.f32 %v1148_v49, %v5700_v10  ;;  %v7351_v55 = vmax.f32 %v5574_v7, 0.0 }
 0x1a3   :  { %2178 = vmatprep.mubr.f32.mxu0 %v7347_v35  ;;  %2403 = vmatprep.mubr.f32.mxu1 %v7348_v59  ;;  %v7167_v41 = vmax.f32 %v5877_v20, 0.0  ;;  %v7164_v13 = vmax.f32 %v5882_v26, 0.0  ;;  %v895_v54 = vpop.f32.mrb[76].mxu0 }
 0x1a4   :  { %1607 = vst [vmem:[#allocation6 + $0x160] sm:$0xff] %v7162_v1  ;;  %v7165_v57 = vmax.f32 %v5892_v40, 0.0  ;;  %v5900_v35 = vadd.f32 %v895_v54, %v5672_v2  ;;  %v897_v44 = vpop.f32.mrb[77].mxu0  ;;  %v1152_v59 = vpop.f32.mrb[76].mxu1  ;;  %v7350_v1 = vmax.f32 %v5547_v60, 0.0 }
 0x1a5   :  { %1608 = vst [vmem:[#allocation6 + $0x168] sm:$0xff] %v7167_v41  ;;  %1609 = vst [vmem:[#allocation6 + $0x170] sm:$0xff] %v7164_v13  ;;  %v5909_v49 = vadd.f32 %v897_v44, %v5674_v50  ;;  %v5914_v54 = vadd.f32 %v1152_v59, %v5690_v19  ;;  %v1154_v22 = vpop.f32.mrb[77].mxu1  ;;  %v7352_v13 = vmax.f32 %v5589_v5, 0.0  ;;  %v7353_v5 = vmax.f32 %v5565_v48, 0.0 }
 0x1a6   :  { %2179 = vmatmul.mubr.f32.gmra.mrb[182].mxu0 %v7349_v63  ;;  %2404 = vmatmul.mubr.f32.gmra.mrb[182].mxu1 %v7350_v1  ;;  %1610 = vst [vmem:[#allocation6 + $0x178] sm:$0xff] %v7165_v57  ;;  %v7166_v63 = vmax.f32 %v5900_v35, 0.0  ;;  %v5924_v44 = vadd.f32 %v1154_v22, %v5700_v10  ;;  %v7355_v41 = vmax.f32 %v5606_v9, 0.0 }
 0x1a7   :  { %2183 = vmatprep.mubr.f32.mxu0 %v7351_v55  ;;  %2408 = vmatprep.mubr.f32.mxu1 %v7352_v13  ;;  %v1360_v60 = vmax.f32 %v5909_v49, 0.0  ;;  %v7168_v1 = vmax.f32 %v5914_v54, 0.0  ;;  %v901_v59 = vpop.f32.mrb[78].mxu0 }
 0x1a8   :  { %1615 = vst [vmem:[#allocation6 + $0x1a0] sm:$0xff] %v7166_v63  ;;  %v7169_v7 = vmax.f32 %v5924_v44, 0.0  ;;  %v5932_v55 = vadd.f32 %v901_v59, %v5672_v2  ;;  %v903_v57 = vpop.f32.mrb[79].mxu0  ;;  %v1158_v13 = vpop.f32.mrb[78].mxu1  ;;  %v7354_v63 = vmax.f32 %v5579_v46, 0.0 }
 0x1a9   :  { %1616 = vst [vmem:[#allocation6 + $0x1a8] sm:$0xff] %v1360_v60  ;;  %1617 = vst [vmem:[#allocation6 + $0x1b0] sm:$0xff] %v7168_v1  ;;  %v5941_v22 = vadd.f32 %v903_v57, %v5674_v50  ;;  %v5946_v59 = vadd.f32 %v1158_v13, %v5690_v19  ;;  %v1160_v48 = vpop.f32.mrb[79].mxu1  ;;  %v7356_v1 = vmax.f32 %v5621_v51, 0.0  ;;  %v7357_v51 = vmax.f32 %v5597_v47, 0.0 }
 0x1aa   :  { %2184 = vmatmul.mubr.f32.gmra.mrb[184].mxu0 %v7353_v5  ;;  %2409 = vmatmul.mubr.f32.gmra.mrb[184].mxu1 %v7354_v63  ;;  %1618 = vst [vmem:[#allocation6 + $0x1b8] sm:$0xff] %v7169_v7  ;;  %v7170_v5 = vmax.f32 %v5932_v55, 0.0  ;;  %v5956_v57 = vadd.f32 %v1160_v48, %v5700_v10 }
 0x1ab   :  { %2188 = vmatprep.mubr.f32.mxu0 %v7355_v41  ;;  %2413 = vmatprep.mubr.f32.mxu1 %v7356_v1  ;;  %v1368_v46 = vmax.f32 %v5941_v22, 0.0  ;;  %v7171_v63 = vmax.f32 %v5946_v59, 0.0  ;;  %v907_v13 = vpop.f32.mrb[80].mxu0 }
 0x1ac   :  { %1623 = vst [vmem:[#allocation6 + $0x1e0] sm:$0xff] %v7170_v5  ;;  %v1370_v9 = vmax.f32 %v5956_v57, 0.0  ;;  %v5964_v41 = vadd.f32 %v907_v13, %v5672_v2  ;;  %v909_v7 = vpop.f32.mrb[81].mxu0  ;;  %v1164_v1 = vpop.f32.mrb[80].mxu1  ;;  %v7358_v5 = vmax.f32 %v5611_v25, 0.0  ;;  %v7387_v57 = vmax.f32 %v5932_v55, 0.0 }
 0x1ad   :  { %1624 = vst [vmem:[#allocation6 + $0x1e8] sm:$0xff] %v1368_v46  ;;  %1625 = vst [vmem:[#allocation6 + $0x1f0] sm:$0xff] %v7171_v63  ;;  %v5973_v48 = vadd.f32 %v909_v7, %v5674_v50  ;;  %v5978_v13 = vadd.f32 %v1164_v1, %v5690_v19  ;;  %v1166_v47 = vpop.f32.mrb[81].mxu1 }
 0x1ae   :  { %2189 = vmatmul.mubr.f32.gmra.mrb[186].mxu0 %v7357_v51  ;;  %2414 = vmatmul.mubr.f32.gmra.mrb[186].mxu1 %v7358_v5  ;;  %1626 = vst [vmem:[#allocation6 + $0x1f8] sm:$0xff] %v1370_v9  ;;  %v7174_v51 = vmax.f32 %v5964_v41, 0.0  ;;  %v5988_v7 = vadd.f32 %v1166_v47, %v5700_v10  ;;  %v7359_v47 = vmax.f32 %v5645_v29, 0.0 }
 0x1af   :  { %2193 = vmatprep.mubr.f32.mxu0 %v1548_v31  ;;  %2418 = vmatprep.mubr.f32.mxu1 %v1550_v23  ;;  %v1376_v25 = vmax.f32 %v5973_v48, 0.0  ;;  %v7172_v5 = vmax.f32 %v5978_v13, 0.0  ;;  %v913_v1 = vpop.f32.mrb[82].mxu0 }
 0x1b0   :  { %1631 = vst [vmem:[#allocation6 + $0x220] sm:$0xff] %v7174_v51  ;;  %v1378_v21 = vmax.f32 %v5988_v7, 0.0  ;;  %v5996_v31 = vadd.f32 %v913_v1, %v5672_v2  ;;  %v915_v63 = vpop.f32.mrb[83].mxu0  ;;  %v1170_v23 = vpop.f32.mrb[82].mxu1  ;;  %v7362_v51 = vmax.f32 %v5717_v8, 0.0  ;;  %v7389_v7 = vmax.f32 %v5964_v41, 0.0 }
 0x1b1   :  { %1632 = vst [vmem:[#allocation6 + $0x228] sm:$0xff] %v1376_v25  ;;  %1633 = vst [vmem:[#allocation6 + $0x230] sm:$0xff] %v7172_v5  ;;  %v6005_v27 = vadd.f32 %v915_v63, %v5674_v50  ;;  %v6010_v1 = vadd.f32 %v1170_v23, %v5690_v19 }
 0x1b2   :  { %2194 = vmatmul.mubr.f32.gmra.mrb[188].mxu0 %v1547_v15  ;;  %2419 = vmatmul.mubr.f32.gmra.mrb[188].mxu1 %v7359_v47  ;;  %v1172_v15 = vpop.f32.mrb[83].mxu1  ;;  %1634 = vst [vmem:[#allocation6 + $0x238] sm:$0xff] %v1378_v21  ;;  %v7173_v56 = vmax.f32 %v5996_v31, 0.0 }
 0x1b3   :  { %2198 = vmatprep.mubr.f32.mxu0 %v1556_v62  ;;  %2423 = vmatprep.mubr.f32.mxu1 %v1558_v45  ;;  %v6020_v63 = vadd.f32 %v1172_v15, %v5700_v10  ;;  %v1384_v29 = vmax.f32 %v6005_v27, 0.0  ;;  %v7175_v23 = vmax.f32 %v6010_v1, 0.0  ;;  %v919_v47 = vpop.f32.mrb[84].mxu0 }
 0x1b4   :  { %1639 = vst [vmem:[#allocation6 + $0x260] sm:$0xff] %v7173_v56  ;;  %v6028_v62 = vadd.f32 %v919_v47, %v5672_v2  ;;  %v921_v5 = vpop.f32.mrb[85].mxu0  ;;  %v1176_v45 = vpop.f32.mrb[84].mxu1  ;;  %v7361_v56 = vmax.f32 %v5686_v58, 0.0 }
 0x1b5   :  { %v7176_v61 = vmax.f32 %v6020_v63, 0.0  ;;  %1640 = vst [vmem:[#allocation6 + $0x268] sm:$0xff] %v1384_v29  ;;  %1641 = vst [vmem:[#allocation6 + $0x270] sm:$0xff] %v7175_v23  ;;  %v6037_v15 = vadd.f32 %v921_v5, %v5674_v50  ;;  %v6042_v47 = vadd.f32 %v1176_v45, %v5690_v19  ;;  %v1178_v14 = vpop.f32.mrb[85].mxu1  ;;  %v7363_v23 = vmax.f32 %v5732_v33, 0.0 }
 0x1b6   :  { %2199 = vmatmul.mubr.f32.gmra.mrb[190].mxu0 %v7360_v52  ;;  %2424 = vmatmul.mubr.f32.gmra.mrb[190].mxu1 %v7361_v56  ;;  %v7177_v52 = vmax.f32 %v6028_v62, 0.0  ;;  %v6052_v5 = vadd.f32 %v1178_v14, %v5700_v10  ;;  %v7364_v33 = vmax.f32 %v5708_v4, 0.0 }
 0x1b7   :  { %2493 = vmatprep.mubr.f32.mxu0 %v7362_v51  ;;  %1642 = vst [vmem:[#allocation6 + $0x278] sm:$0xff] %v7176_v61  ;;  %2718 = vmatprep.mubr.f32.mxu1 %v7363_v23  ;;  %v1392_v58 = vmax.f32 %v6037_v15, 0.0  ;;  %v7178_v56 = vmax.f32 %v6042_v47, 0.0  ;;  %v925_v45 = vpop.f32.mrb[86].mxu0 }
 0x1b8   :  { %1647 = vst [vmem:[#allocation6 + $0x2a0] sm:$0xff] %v7177_v52  ;;  %v7180_v8 = vmax.f32 %v6052_v5, 0.0  ;;  %v6060_v51 = vadd.f32 %v925_v45, %v5672_v2  ;;  %v927_v61 = vpop.f32.mrb[87].mxu0  ;;  %v1182_v23 = vpop.f32.mrb[86].mxu1  ;;  %v7365_v52 = vmax.f32 %v5722_v34, 0.0 }
 0x1b9   :  { %1648 = vst [vmem:[#allocation6 + $0x2a8] sm:$0xff] %v1392_v58  ;;  %1649 = vst [vmem:[#allocation6 + $0x2b0] sm:$0xff] %v7178_v56  ;;  %v6069_v14 = vadd.f32 %v927_v61, %v5674_v50  ;;  %v6074_v45 = vadd.f32 %v1182_v23, %v5690_v19  ;;  %v1184_v4 = vpop.f32.mrb[87].mxu1 }
 0x1ba   :  { %2494 = vmatmul.mubr.f32.vlgmr.msra.gmra.mrb[192].mxu0 %v7364_v33  ;;  %2719 = vmatmul.mubr.f32.vlgmr.msra.gmra.mrb[192].mxu1 %v7365_v52  ;;  %1650 = vst [vmem:[#allocation6 + $0x2b8] sm:$0xff] %v7180_v8  ;;  %v7179_v33 = vmax.f32 %v6060_v51, 0.0  ;;  %v6084_v61 = vadd.f32 %v1184_v4, %v5700_v10  ;;  %v7368_v8 = vmax.f32 %v5781_v36, 0.0 }
 0x1bb   :  { %2498 = vmatprep.mubr.f32.mxu0 %v1320_v43  ;;  %2723 = vmatprep.mubr.f32.mxu1 %v1322_v38  ;;  %v7184_v34 = vmax.f32 %v6069_v14, 0.0  ;;  %v7181_v52 = vmax.f32 %v6074_v45, 0.0  ;;  %v931_v23 = vpop.f32.mrb[88].mxu0 }
 0x1bc   :  { %1655 = vst [vmem:[#allocation6 + $0x2e0] sm:$0xff] %v7179_v33  ;;  %v7182_v37 = vmax.f32 %v6084_v61, 0.0  ;;  %v6092_v43 = vadd.f32 %v931_v23, %v5672_v2  ;;  %v933_v56 = vpop.f32.mrb[89].mxu0  ;;  %v1188_v38 = vpop.f32.mrb[88].mxu1  ;;  %v7367_v33 = vmax.f32 %v5754_v24, 0.0 }
 0x1bd   :  { %1656 = vst [vmem:[#allocation6 + $0x2e8] sm:$0xff] %v7184_v34  ;;  %1657 = vst [vmem:[#allocation6 + $0x2f0] sm:$0xff] %v7181_v52  ;;  %v6101_v4 = vadd.f32 %v933_v56, %v5674_v50  ;;  %v6106_v23 = vadd.f32 %v1188_v38, %v5690_v19  ;;  %v1190_v28 = vpop.f32.mrb[89].mxu1  ;;  %v7369_v52 = vmax.f32 %v5796_v30, 0.0  ;;  %v7370_v30 = vmax.f32 %v5772_v32, 0.0 }
 0x1be   :  { %2499 = vmatmul.mubr.f32.gmra.mrb[194].mxu0 %v7366_v0  ;;  %2724 = vmatmul.mubr.f32.gmra.mrb[194].mxu1 %v7367_v33  ;;  %1658 = vst [vmem:[#allocation6 + $0x2f8] sm:$0xff] %v7182_v37  ;;  %v7183_v0 = vmax.f32 %v6092_v43, 0.0  ;;  %v6116_v56 = vadd.f32 %v1190_v28, %v5700_v10  ;;  %v7372_v34 = vmax.f32 %v5813_v18, 0.0 }
 0x1bf   :  { %2503 = vmatprep.mubr.f32.mxu0 %v7368_v8  ;;  %2728 = vmatprep.mubr.f32.mxu1 %v7369_v52  ;;  %v7188_v24 = vmax.f32 %v6101_v4, 0.0  ;;  %v7185_v33 = vmax.f32 %v6106_v23, 0.0  ;;  %v937_v38 = vpop.f32.mrb[90].mxu0 }
 0x1c0   :  { %1663 = vst [vmem:[#allocation6 + $0x320] sm:$0xff] %v7183_v0  ;;  %v7186_v36 = vmax.f32 %v6116_v56, 0.0  ;;  %v6124_v8 = vadd.f32 %v937_v38, %v5672_v2  ;;  %v939_v37 = vpop.f32.mrb[91].mxu0  ;;  %v1194_v52 = vpop.f32.mrb[90].mxu1  ;;  %v7371_v0 = vmax.f32 %v5786_v16, 0.0 }
 0x1c1   :  { %1664 = vst [vmem:[#allocation6 + $0x328] sm:$0xff] %v7188_v24  ;;  %1665 = vst [vmem:[#allocation6 + $0x330] sm:$0xff] %v7185_v33  ;;  %v6133_v28 = vadd.f32 %v939_v37, %v5674_v50  ;;  %v6138_v38 = vadd.f32 %v1194_v52, %v5690_v19  ;;  %v1196_v32 = vpop.f32.mrb[91].mxu1  ;;  %v7373_v33 = vmax.f32 %v5828_v3, 0.0  ;;  %v7374_v3 = vmax.f32 %v5804_v39, 0.0 }
 0x1c2   :  { %2504 = vmatmul.mubr.f32.gmra.mrb[196].mxu0 %v7370_v30  ;;  %2729 = vmatmul.mubr.f32.gmra.mrb[196].mxu1 %v7371_v0  ;;  %1666 = vst [vmem:[#allocation6 + $0x338] sm:$0xff] %v7186_v36  ;;  %v7187_v30 = vmax.f32 %v6124_v8, 0.0  ;;  %v6148_v37 = vadd.f32 %v1196_v32, %v5700_v10  ;;  %v7376_v24 = vmax.f32 %v5845_v42, 0.0 }
 0x1c3   :  { %2508 = vmatprep.mubr.f32.mxu0 %v7372_v34  ;;  %2733 = vmatprep.mubr.f32.mxu1 %v7373_v33  ;;  %v7192_v16 = vmax.f32 %v6133_v28, 0.0  ;;  %v7189_v0 = vmax.f32 %v6138_v38, 0.0  ;;  %v943_v52 = vpop.f32.mrb[92].mxu0 }
 0x1c4   :  { %1671 = vst [vmem:[#allocation6 + $0x360] sm:$0xff] %v7187_v30  ;;  %v7190_v18 = vmax.f32 %v6148_v37, 0.0  ;;  %v6156_v34 = vadd.f32 %v943_v52, %v5672_v2  ;;  %v945_v36 = vpop.f32.mrb[93].mxu0  ;;  %v1200_v33 = vpop.f32.mrb[92].mxu1  ;;  %v7375_v30 = vmax.f32 %v5818_v12, 0.0 }
 0x1c5   :  { %1672 = vst [vmem:[#allocation6 + $0x368] sm:$0xff] %v7192_v16  ;;  %1673 = vst [vmem:[#allocation6 + $0x370] sm:$0xff] %v7189_v0  ;;  %v6165_v32 = vadd.f32 %v945_v36, %v5674_v50  ;;  %v6170_v52 = vadd.f32 %v1200_v33, %v5690_v19  ;;  %v1202_v39 = vpop.f32.mrb[93].mxu1  ;;  %v7377_v0 = vmax.f32 %v5860_v6, 0.0  ;;  %v7378_v6 = vmax.f32 %v5836_v53, 0.0 }
 0x1c6   :  { %2509 = vmatmul.mubr.f32.gmra.mrb[198].mxu0 %v7374_v3  ;;  %2734 = vmatmul.mubr.f32.gmra.mrb[198].mxu1 %v7375_v30  ;;  %1674 = vst [vmem:[#allocation6 + $0x378] sm:$0xff] %v7190_v18  ;;  %v7191_v3 = vmax.f32 %v6156_v34, 0.0  ;;  %v6180_v36 = vadd.f32 %v1202_v39, %v5700_v10  ;;  %v7380_v16 = vmax.f32 %v5877_v20, 0.0 }
 0x1c7   :  { %2513 = vmatprep.mubr.f32.mxu0 %v7376_v24  ;;  %2738 = vmatprep.mubr.f32.mxu1 %v7377_v0  ;;  %v1424_v12 = vmax.f32 %v6165_v32, 0.0  ;;  %v7193_v30 = vmax.f32 %v6170_v52, 0.0  ;;  %v949_v33 = vpop.f32.mrb[94].mxu0 }
 0x1c8   :  { %1679 = vst [vmem:[#allocation6 + $0x3a0] sm:$0xff] %v7191_v3  ;;  %v7194_v42 = vmax.f32 %v6180_v36, 0.0  ;;  %v6188_v24 = vadd.f32 %v949_v33, %v5672_v2  ;;  %v951_v18 = vpop.f32.mrb[95].mxu0  ;;  %v1206_v0 = vpop.f32.mrb[94].mxu1  ;;  %v7379_v3 = vmax.f32 %v5850_v11, 0.0 }
 0x1c9   :  { %1680 = vst [vmem:[#allocation6 + $0x3a8] sm:$0xff] %v1424_v12  ;;  %1681 = vst [vmem:[#allocation6 + $0x3b0] sm:$0xff] %v7193_v30  ;;  %v6197_v39 = vadd.f32 %v951_v18, %v5674_v50  ;;  %v6202_v33 = vadd.f32 %v1206_v0, %v5690_v19  ;;  %v1208_v53 = vpop.f32.mrb[95].mxu1  ;;  %v7381_v30 = vmax.f32 %v5892_v40, 0.0  ;;  %v7382_v40 = vmax.f32 %v5868_v17, 0.0 }
 0x1ca   :  { %2514 = vmatmul.mubr.f32.gmra.mrb[200].mxu0 %v7378_v6  ;;  %2739 = vmatmul.mubr.f32.gmra.mrb[200].mxu1 %v7379_v3  ;;  %1682 = vst [vmem:[#allocation6 + $0x3b8] sm:$0xff] %v7194_v42  ;;  %v7195_v6 = vmax.f32 %v6188_v24, 0.0  ;;  %v6212_v18 = vadd.f32 %v1208_v53, %v5700_v10 }
 0x1cb   :  { %2518 = vmatprep.mubr.f32.mxu0 %v7380_v16  ;;  %2743 = vmatprep.mubr.f32.mxu1 %v7381_v30  ;;  %v1432_v11 = vmax.f32 %v6197_v39, 0.0  ;;  %v7196_v3 = vmax.f32 %v6202_v33, 0.0  ;;  %v955_v0 = vpop.f32.mrb[96].mxu0 }
 0x1cc   :  { %1687 = vst [vmem:[#allocation6 + $0x3e0] sm:$0xff] %v7195_v6  ;;  %v7197_v20 = vmax.f32 %v6212_v18, 0.0  ;;  %v6220_v16 = vadd.f32 %v955_v0, %v5672_v2  ;;  %v957_v42 = vpop.f32.mrb[97].mxu0  ;;  %v1212_v30 = vpop.f32.mrb[96].mxu1  ;;  %v7383_v6 = vmax.f32 %v5882_v26, 0.0 }
 0x1cd   :  { %1688 = vst [vmem:[#allocation6 + $0x3e8] sm:$0xff] %v1432_v11  ;;  %1689 = vst [vmem:[#allocation6 + $0x3f0] sm:$0xff] %v7196_v3  ;;  %v6229_v53 = vadd.f32 %v957_v42, %v5674_v50  ;;  %v6234_v0 = vadd.f32 %v1212_v30, %v5690_v19  ;;  %v1214_v17 = vpop.f32.mrb[97].mxu1  ;;  %v7384_v3 = vmax.f32 %v5924_v44, 0.0  ;;  %v7385_v44 = vmax.f32 %v5900_v35, 0.0 }
 0x1ce   :  { %2519 = vmatmul.mubr.f32.gmra.mrb[202].mxu0 %v7382_v40  ;;  %2744 = vmatmul.mubr.f32.gmra.mrb[202].mxu1 %v7383_v6  ;;  %1690 = vst [vmem:[#allocation6 + $0x3f8] sm:$0xff] %v7197_v20  ;;  %v7198_v40 = vmax.f32 %v6220_v16, 0.0  ;;  %v6244_v42 = vadd.f32 %v1214_v17, %v5700_v10 }
 0x1cf   :  { %2523 = vmatprep.mubr.f32.mxu0 %v1360_v60  ;;  %2748 = vmatprep.mubr.f32.mxu1 %v7384_v3  ;;  %v1440_v26 = vmax.f32 %v6229_v53, 0.0  ;;  %v7199_v6 = vmax.f32 %v6234_v0, 0.0  ;;  %v961_v30 = vpop.f32.mrb[98].mxu0 }
 0x1d0   :  { %1695 = vst [vmem:[#allocation6 + $0x420] sm:$0xff] %v7198_v40  ;;  %v1442_v49 = vmax.f32 %v6244_v42, 0.0  ;;  %v6252_v60 = vadd.f32 %v961_v30, %v5672_v2  ;;  %v963_v20 = vpop.f32.mrb[99].mxu0  ;;  %v1218_v3 = vpop.f32.mrb[98].mxu1  ;;  %v7386_v40 = vmax.f32 %v5914_v54, 0.0  ;;  %v7415_v42 = vmax.f32 %v6220_v16, 0.0 }
 0x1d1   :  { %1696 = vst [vmem:[#allocation6 + $0x428] sm:$0xff] %v1440_v26  ;;  %1697 = vst [vmem:[#allocation6 + $0x430] sm:$0xff] %v7199_v6  ;;  %v6261_v17 = vadd.f32 %v963_v20, %v5674_v50  ;;  %v6266_v30 = vadd.f32 %v1218_v3, %v5690_v19  ;;  %v1220_v35 = vpop.f32.mrb[99].mxu1 }
 0x1d2   :  { %2524 = vmatmul.mubr.f32.gmra.mrb[204].mxu0 %v7385_v44  ;;  %2749 = vmatmul.mubr.f32.gmra.mrb[204].mxu1 %v7386_v40  ;;  %1698 = vst [vmem:[#allocation6 + $0x438] sm:$0xff] %v1442_v49  ;;  %v7200_v44 = vmax.f32 %v6252_v60, 0.0  ;;  %v6276_v20 = vadd.f32 %v1220_v35, %v5700_v10 }
 0x1d3   :  { %2528 = vmatprep.mubr.f32.mxu0 %v1368_v46  ;;  %2753 = vmatprep.mubr.f32.mxu1 %v1370_v9  ;;  %v1448_v54 = vmax.f32 %v6261_v17, 0.0  ;;  %v7201_v40 = vmax.f32 %v6266_v30, 0.0  ;;  %v967_v3 = vpop.f32.mrb[100].mxu0 }
 0x1d4   :  { %1703 = vst [vmem:[#allocation6 + $0x460] sm:$0xff] %v7200_v44  ;;  %v1450_v22 = vmax.f32 %v6276_v20, 0.0  ;;  %v6284_v46 = vadd.f32 %v967_v3, %v5672_v2  ;;  %v969_v6 = vpop.f32.mrb[101].mxu0  ;;  %v1224_v9 = vpop.f32.mrb[100].mxu1  ;;  %v7388_v44 = vmax.f32 %v5946_v59, 0.0  ;;  %v7417_v20 = vmax.f32 %v6252_v60, 0.0 }
 0x1d5   :  { %1704 = vst [vmem:[#allocation6 + $0x468] sm:$0xff] %v1448_v54  ;;  %1705 = vst [vmem:[#allocation6 + $0x470] sm:$0xff] %v7201_v40  ;;  %v6293_v35 = vadd.f32 %v969_v6, %v5674_v50  ;;  %v6298_v3 = vadd.f32 %v1224_v9, %v5690_v19  ;;  %v1226_v55 = vpop.f32.mrb[101].mxu1 }
 0x1d6   :  { %2529 = vmatmul.mubr.f32.gmra.mrb[206].mxu0 %v7387_v57  ;;  %2754 = vmatmul.mubr.f32.gmra.mrb[206].mxu1 %v7388_v44  ;;  %1706 = vst [vmem:[#allocation6 + $0x478] sm:$0xff] %v1450_v22  ;;  %v7202_v57 = vmax.f32 %v6284_v46, 0.0  ;;  %v6308_v6 = vadd.f32 %v1226_v55, %v5700_v10 }
 0x1d7   :  { %2533 = vmatprep.mubr.f32.mxu0 %v1376_v25  ;;  %2758 = vmatprep.mubr.f32.mxu1 %v1378_v21  ;;  %v1456_v59 = vmax.f32 %v6293_v35, 0.0  ;;  %v7203_v44 = vmax.f32 %v6298_v3, 0.0  ;;  %v973_v9 = vpop.f32.mrb[102].mxu0 }
 0x1d8   :  { %1711 = vst [vmem:[#allocation6 + $0x4a0] sm:$0xff] %v7202_v57  ;;  %v7204_v48 = vmax.f32 %v6308_v6, 0.0  ;;  %v6316_v25 = vadd.f32 %v973_v9, %v5672_v2  ;;  %v975_v40 = vpop.f32.mrb[103].mxu0  ;;  %v1230_v21 = vpop.f32.mrb[102].mxu1  ;;  %v7390_v57 = vmax.f32 %v5978_v13, 0.0 }
 0x1d9   :  { %1712 = vst [vmem:[#allocation6 + $0x4a8] sm:$0xff] %v1456_v59  ;;  %1713 = vst [vmem:[#allocation6 + $0x4b0] sm:$0xff] %v7203_v44  ;;  %v6325_v55 = vadd.f32 %v975_v40, %v5674_v50  ;;  %v6330_v9 = vadd.f32 %v1230_v21, %v5690_v19  ;;  %v1232_v41 = vpop.f32.mrb[103].mxu1  ;;  %v7391_v44 = vmax.f32 %v6020_v63, 0.0  ;;  %v7392_v63 = vmax.f32 %v5996_v31, 0.0 }
 0x1da   :  { %2534 = vmatmul.mubr.f32.gmra.mrb[208].mxu0 %v7389_v7  ;;  %2759 = vmatmul.mubr.f32.gmra.mrb[208].mxu1 %v7390_v57  ;;  %1714 = vst [vmem:[#allocation6 + $0x4b8] sm:$0xff] %v7204_v48  ;;  %v7205_v7 = vmax.f32 %v6316_v25, 0.0  ;;  %v6340_v40 = vadd.f32 %v1232_v41, %v5700_v10 }
 0x1db   :  { %2538 = vmatprep.mubr.f32.mxu0 %v1384_v29  ;;  %2763 = vmatprep.mubr.f32.mxu1 %v7391_v44  ;;  %v7209_v13 = vmax.f32 %v6325_v55, 0.0  ;;  %v7206_v57 = vmax.f32 %v6330_v9, 0.0  ;;  %v979_v21 = vpop.f32.mrb[104].mxu0 }
 0x1dc   :  { %1719 = vst [vmem:[#allocation6 + $0x4e0] sm:$0xff] %v7205_v7  ;;  %v7207_v27 = vmax.f32 %v6340_v40, 0.0  ;;  %v6348_v29 = vadd.f32 %v979_v21, %v5672_v2  ;;  %v981_v48 = vpop.f32.mrb[105].mxu0  ;;  %v1236_v44 = vpop.f32.mrb[104].mxu1  ;;  %v7393_v7 = vmax.f32 %v6010_v1, 0.0 }
 0x1dd   :  { %1720 = vst [vmem:[#allocation6 + $0x4e8] sm:$0xff] %v7209_v13  ;;  %1721 = vst [vmem:[#allocation6 + $0x4f0] sm:$0xff] %v7206_v57  ;;  %v6357_v41 = vadd.f32 %v981_v48, %v5674_v50  ;;  %v6362_v21 = vadd.f32 %v1236_v44, %v5690_v19  ;;  %v1238_v31 = vpop.f32.mrb[105].mxu1  ;;  %v7394_v57 = vmax.f32 %v6052_v5, 0.0  ;;  %v7395_v5 = vmax.f32 %v6028_v62, 0.0 }
 0x1de   :  { %2539 = vmatmul.mubr.f32.gmra.mrb[210].mxu0 %v7392_v63  ;;  %2764 = vmatmul.mubr.f32.gmra.mrb[210].mxu1 %v7393_v7  ;;  %1722 = vst [vmem:[#allocation6 + $0x4f8] sm:$0xff] %v7207_v27  ;;  %v7208_v63 = vmax.f32 %v6348_v29, 0.0  ;;  %v6372_v48 = vadd.f32 %v1238_v31, %v5700_v10  ;;  %v7397_v13 = vmax.f32 %v6069_v14, 0.0 }
 0x1df   :  { %2543 = vmatprep.mubr.f32.mxu0 %v1392_v58  ;;  %2768 = vmatprep.mubr.f32.mxu1 %v7394_v57  ;;  %v7213_v1 = vmax.f32 %v6357_v41, 0.0  ;;  %v7210_v7 = vmax.f32 %v6362_v21, 0.0  ;;  %v985_v44 = vpop.f32.mrb[106].mxu0 }
 0x1e0   :  { %1727 = vst [vmem:[#allocation6 + $0x520] sm:$0xff] %v7208_v63  ;;  %v7211_v15 = vmax.f32 %v6372_v48, 0.0  ;;  %v6380_v58 = vadd.f32 %v985_v44, %v5672_v2  ;;  %v987_v27 = vpop.f32.mrb[107].mxu0  ;;  %v1242_v57 = vpop.f32.mrb[106].mxu1  ;;  %v7396_v63 = vmax.f32 %v6042_v47, 0.0 }
 0x1e1   :  { %1728 = vst [vmem:[#allocation6 + $0x528] sm:$0xff] %v7213_v1  ;;  %1729 = vst [vmem:[#allocation6 + $0x530] sm:$0xff] %v7210_v7  ;;  %v6389_v31 = vadd.f32 %v987_v27, %v5674_v50  ;;  %v6394_v44 = vadd.f32 %v1242_v57, %v5690_v19  ;;  %v1244_v62 = vpop.f32.mrb[107].mxu1  ;;  %v7398_v7 = vmax.f32 %v6084_v61, 0.0  ;;  %v7399_v61 = vmax.f32 %v6060_v51, 0.0 }
 0x1e2   :  { %2544 = vmatmul.mubr.f32.gmra.mrb[212].mxu0 %v7395_v5  ;;  %2769 = vmatmul.mubr.f32.gmra.mrb[212].mxu1 %v7396_v63  ;;  %1730 = vst [vmem:[#allocation6 + $0x538] sm:$0xff] %v7211_v15  ;;  %v7212_v5 = vmax.f32 %v6380_v58, 0.0  ;;  %v6404_v27 = vadd.f32 %v1244_v62, %v5700_v10  ;;  %v7401_v1 = vmax.f32 %v6101_v4, 0.0 }
 0x1e3   :  { %2548 = vmatprep.mubr.f32.mxu0 %v7397_v13  ;;  %2773 = vmatprep.mubr.f32.mxu1 %v7398_v7  ;;  %v7217_v47 = vmax.f32 %v6389_v31, 0.0  ;;  %v7214_v63 = vmax.f32 %v6394_v44, 0.0  ;;  %v991_v57 = vpop.f32.mrb[108].mxu0 }
 0x1e4   :  { %1735 = vst [vmem:[#allocation6 + $0x560] sm:$0xff] %v7212_v5  ;;  %v7215_v14 = vmax.f32 %v6404_v27, 0.0  ;;  %v6412_v13 = vadd.f32 %v991_v57, %v5672_v2  ;;  %v993_v15 = vpop.f32.mrb[109].mxu0  ;;  %v1248_v7 = vpop.f32.mrb[108].mxu1  ;;  %v7400_v5 = vmax.f32 %v6074_v45, 0.0 }
 0x1e5   :  { %1736 = vst [vmem:[#allocation6 + $0x568] sm:$0xff] %v7217_v47  ;;  %1737 = vst [vmem:[#allocation6 + $0x570] sm:$0xff] %v7214_v63  ;;  %v6421_v62 = vadd.f32 %v993_v15, %v5674_v50  ;;  %v6426_v57 = vadd.f32 %v1248_v7, %v5690_v19  ;;  %v1250_v51 = vpop.f32.mrb[109].mxu1  ;;  %v7402_v63 = vmax.f32 %v6116_v56, 0.0  ;;  %v7403_v56 = vmax.f32 %v6092_v43, 0.0 }
 0x1e6   :  { %2549 = vmatmul.mubr.f32.gmra.mrb[214].mxu0 %v7399_v61  ;;  %2774 = vmatmul.mubr.f32.gmra.mrb[214].mxu1 %v7400_v5  ;;  %1738 = vst [vmem:[#allocation6 + $0x578] sm:$0xff] %v7215_v14  ;;  %v7216_v61 = vmax.f32 %v6412_v13, 0.0  ;;  %v6436_v15 = vadd.f32 %v1250_v51, %v5700_v10  ;;  %v7405_v47 = vmax.f32 %v6133_v28, 0.0 }
 0x1e7   :  { %2553 = vmatprep.mubr.f32.mxu0 %v7401_v1  ;;  %2778 = vmatprep.mubr.f32.mxu1 %v7402_v63  ;;  %v1488_v45 = vmax.f32 %v6421_v62, 0.0  ;;  %v7218_v5 = vmax.f32 %v6426_v57, 0.0  ;;  %v997_v7 = vpop.f32.mrb[110].mxu0 }
 0x1e8   :  { %1743 = vst [vmem:[#allocation6 + $0x5a0] sm:$0xff] %v7216_v61  ;;  %v7219_v4 = vmax.f32 %v6436_v15, 0.0  ;;  %v6444_v1 = vadd.f32 %v997_v7, %v5672_v2  ;;  %v999_v14 = vpop.f32.mrb[111].mxu0  ;;  %v1254_v63 = vpop.f32.mrb[110].mxu1  ;;  %v7404_v61 = vmax.f32 %v6106_v23, 0.0 }
 0x1e9   :  { %1744 = vst [vmem:[#allocation6 + $0x5a8] sm:$0xff] %v1488_v45  ;;  %1745 = vst [vmem:[#allocation6 + $0x5b0] sm:$0xff] %v7218_v5  ;;  %v6453_v51 = vadd.f32 %v999_v14, %v5674_v50  ;;  %v6458_v7 = vadd.f32 %v1254_v63, %v5690_v19  ;;  %v1256_v43 = vpop.f32.mrb[111].mxu1  ;;  %v7406_v5 = vmax.f32 %v6148_v37, 0.0  ;;  %v7407_v37 = vmax.f32 %v6124_v8, 0.0 }
 0x1ea   :  { %2554 = vmatmul.mubr.f32.gmra.mrb[216].mxu0 %v7403_v56  ;;  %2779 = vmatmul.mubr.f32.gmra.mrb[216].mxu1 %v7404_v61  ;;  %1746 = vst [vmem:[#allocation6 + $0x5b8] sm:$0xff] %v7219_v4  ;;  %v7220_v56 = vmax.f32 %v6444_v1, 0.0  ;;  %v6468_v14 = vadd.f32 %v1256_v43, %v5700_v10 }
 0x1eb   :  { %2558 = vmatprep.mubr.f32.mxu0 %v7405_v47  ;;  %2783 = vmatprep.mubr.f32.mxu1 %v7406_v5  ;;  %v1496_v23 = vmax.f32 %v6453_v51, 0.0  ;;  %v7221_v61 = vmax.f32 %v6458_v7, 0.0  ;;  %v1003_v63 = vpop.f32.mrb[112].mxu0 }
 0x1ec   :  { %1751 = vst [vmem:[#allocation6 + $0x5e0] sm:$0xff] %v7220_v56  ;;  %v7222_v28 = vmax.f32 %v6468_v14, 0.0  ;;  %v6476_v47 = vadd.f32 %v1003_v63, %v5672_v2  ;;  %v1005_v4 = vpop.f32.mrb[113].mxu0  ;;  %v1260_v5 = vpop.f32.mrb[112].mxu1  ;;  %v7408_v56 = vmax.f32 %v6138_v38, 0.0  ;;  %v7437_v62 = vmax.f32 %v6468_v14, 0.0 }
 0x1ed   :  { %1752 = vst [vmem:[#allocation6 + $0x5e8] sm:$0xff] %v1496_v23  ;;  %1753 = vst [vmem:[#allocation6 + $0x5f0] sm:$0xff] %v7221_v61  ;;  %v6485_v43 = vadd.f32 %v1005_v4, %v5674_v50  ;;  %v6490_v63 = vadd.f32 %v1260_v5, %v5690_v19  ;;  %v1262_v8 = vpop.f32.mrb[113].mxu1  ;;  %v7409_v61 = vmax.f32 %v6180_v36, 0.0  ;;  %v7410_v36 = vmax.f32 %v6156_v34, 0.0 }
 0x1ee   :  { %2559 = vmatmul.mubr.f32.gmra.mrb[218].mxu0 %v7407_v37  ;;  %2784 = vmatmul.mubr.f32.gmra.mrb[218].mxu1 %v7408_v56  ;;  %1754 = vst [vmem:[#allocation6 + $0x5f8] sm:$0xff] %v7222_v28  ;;  %v7223_v37 = vmax.f32 %v6476_v47, 0.0  ;;  %v6500_v4 = vadd.f32 %v1262_v8, %v5700_v10 }
 0x1ef   :  { %2563 = vmatprep.mubr.f32.mxu0 %v1424_v12  ;;  %2788 = vmatprep.mubr.f32.mxu1 %v7409_v61  ;;  %v1504_v38 = vmax.f32 %v6485_v43, 0.0  ;;  %v7224_v56 = vmax.f32 %v6490_v63, 0.0  ;;  %v1009_v5 = vpop.f32.mrb[114].mxu0 }
 0x1f0   :  { %1759 = vst [vmem:[#allocation6 + $0x620] sm:$0xff] %v7223_v37  ;;  %v7225_v32 = vmax.f32 %v6500_v4, 0.0  ;;  %v6508_v12 = vadd.f32 %v1009_v5, %v5672_v2  ;;  %v1011_v28 = vpop.f32.mrb[115].mxu0  ;;  %v1266_v61 = vpop.f32.mrb[114].mxu1  ;;  %v7411_v37 = vmax.f32 %v6170_v52, 0.0 }
 0x1f1   :  { %1760 = vst [vmem:[#allocation6 + $0x628] sm:$0xff] %v1504_v38  ;;  %1761 = vst [vmem:[#allocation6 + $0x630] sm:$0xff] %v7224_v56  ;;  %v6517_v8 = vadd.f32 %v1011_v28, %v5674_v50  ;;  %v6522_v5 = vadd.f32 %v1266_v61, %v5690_v19  ;;  %v1268_v34 = vpop.f32.mrb[115].mxu1  ;;  %v7412_v56 = vmax.f32 %v6212_v18, 0.0  ;;  %v7413_v18 = vmax.f32 %v6188_v24, 0.0 }
 0x1f2   :  { %2564 = vmatmul.mubr.f32.gmra.mrb[220].mxu0 %v7410_v36  ;;  %2789 = vmatmul.mubr.f32.gmra.mrb[220].mxu1 %v7411_v37  ;;  %1762 = vst [vmem:[#allocation6 + $0x638] sm:$0xff] %v7225_v32  ;;  %v7226_v36 = vmax.f32 %v6508_v12, 0.0  ;;  %v6532_v28 = vadd.f32 %v1268_v34, %v5700_v10 }
 0x1f3   :  { %2568 = vmatprep.mubr.f32.mxu0 %v1432_v11  ;;  %2793 = vmatprep.mubr.f32.mxu1 %v7412_v56  ;;  %v1512_v52 = vmax.f32 %v6517_v8, 0.0  ;;  %v7227_v37 = vmax.f32 %v6522_v5, 0.0  ;;  %v1015_v61 = vpop.f32.mrb[116].mxu0 }
 0x1f4   :  { %1767 = vst [vmem:[#allocation6 + $0x660] sm:$0xff] %v7226_v36  ;;  %v1514_v39 = vmax.f32 %v6532_v28, 0.0  ;;  %v6540_v11 = vadd.f32 %v1015_v61, %v5672_v2  ;;  %v1017_v32 = vpop.f32.mrb[117].mxu0  ;;  %v1272_v56 = vpop.f32.mrb[116].mxu1  ;;  %v7414_v36 = vmax.f32 %v6202_v33, 0.0 }
 0x1f5   :  { %1768 = vst [vmem:[#allocation6 + $0x668] sm:$0xff] %v1512_v52  ;;  %1769 = vst [vmem:[#allocation6 + $0x670] sm:$0xff] %v7227_v37  ;;  %v6549_v34 = vadd.f32 %v1017_v32, %v5674_v50  ;;  %v6554_v61 = vadd.f32 %v1272_v56, %v5690_v19  ;;  %v1274_v24 = vpop.f32.mrb[117].mxu1 }
 0x1f6   :  { %2569 = vmatmul.mubr.f32.gmra.mrb[222].mxu0 %v7413_v18  ;;  %2794 = vmatmul.mubr.f32.gmra.mrb[222].mxu1 %v7414_v36  ;;  %1770 = vst [vmem:[#allocation6 + $0x678] sm:$0xff] %v1514_v39  ;;  %v7228_v18 = vmax.f32 %v6540_v11, 0.0  ;;  %v6564_v32 = vadd.f32 %v1274_v24, %v5700_v10 }
 0x1f7   :  { %2573 = vmatprep.mubr.f32.mxu0 %v1440_v26  ;;  %2798 = vmatprep.mubr.f32.mxu1 %v1442_v49  ;;  %v1520_v33 = vmax.f32 %v6549_v34, 0.0  ;;  %v7229_v36 = vmax.f32 %v6554_v61, 0.0  ;;  %v1021_v56 = vpop.f32.mrb[118].mxu0 }
 0x1f8   :  { %1775 = vst [vmem:[#allocation6 + $0x6a0] sm:$0xff] %v7228_v18  ;;  %v1522_v53 = vmax.f32 %v6564_v32, 0.0  ;;  %v6572_v26 = vadd.f32 %v1021_v56, %v5672_v2  ;;  %v1023_v37 = vpop.f32.mrb[119].mxu0  ;;  %v1278_v49 = vpop.f32.mrb[118].mxu1  ;;  %v7416_v18 = vmax.f32 %v6234_v0, 0.0 }
 0x1f9   :  { %1776 = vst [vmem:[#allocation6 + $0x6a8] sm:$0xff] %v1520_v33  ;;  %1777 = vst [vmem:[#allocation6 + $0x6b0] sm:$0xff] %v7229_v36  ;;  %v6581_v24 = vadd.f32 %v1023_v37, %v5674_v50  ;;  %v6586_v56 = vadd.f32 %v1278_v49, %v5690_v19  ;;  %v1280_v16 = vpop.f32.mrb[119].mxu1 }
 0x1fa   :  { %2574 = vmatmul.mubr.f32.gmra.mrb[224].mxu0 %v7415_v42  ;;  %2799 = vmatmul.mubr.f32.gmra.mrb[224].mxu1 %v7416_v18  ;;  %1778 = vst [vmem:[#allocation6 + $0x6b8] sm:$0xff] %v1522_v53  ;;  %v7230_v42 = vmax.f32 %v6572_v26, 0.0  ;;  %v6596_v37 = vadd.f32 %v1280_v16, %v5700_v10 }
 0x1fb   :  { %2578 = vmatprep.mubr.f32.mxu0 %v1448_v54  ;;  %2803 = vmatprep.mubr.f32.mxu1 %v1450_v22  ;;  %v7234_v0 = vmax.f32 %v6581_v24, 0.0  ;;  %v7231_v18 = vmax.f32 %v6586_v56, 0.0  ;;  %v1027_v49 = vpop.f32.mrb[120].mxu0 }
 0x1fc   :  { %1783 = vst [vmem:[#allocation6 + $0x6e0] sm:$0xff] %v7230_v42  ;;  %v7232_v17 = vmax.f32 %v6596_v37, 0.0  ;;  %v6604_v54 = vadd.f32 %v1027_v49, %v5672_v2  ;;  %v1029_v36 = vpop.f32.mrb[121].mxu0  ;;  %v1284_v22 = vpop.f32.mrb[120].mxu1  ;;  %v7418_v42 = vmax.f32 %v6266_v30, 0.0  ;;  %v7448_v34 = vmax.f32 %v6596_v37, 0.0 }
 0x1fd   :  { %1784 = vst [vmem:[#allocation6 + $0x6e8] sm:$0xff] %v7234_v0  ;;  %1785 = vst [vmem:[#allocation6 + $0x6f0] sm:$0xff] %v7231_v18  ;;  %v6613_v16 = vadd.f32 %v1029_v36, %v5674_v50  ;;  %v6618_v49 = vadd.f32 %v1284_v22, %v5690_v19  ;;  %v1286_v60 = vpop.f32.mrb[121].mxu1  ;;  %v7419_v18 = vmax.f32 %v6308_v6, 0.0  ;;  %v7420_v6 = vmax.f32 %v6284_v46, 0.0 }
 0x1fe   :  { %2579 = vmatmul.mubr.f32.gmra.mrb[226].mxu0 %v7417_v20  ;;  %2804 = vmatmul.mubr.f32.gmra.mrb[226].mxu1 %v7418_v42  ;;  %1786 = vst [vmem:[#allocation6 + $0x6f8] sm:$0xff] %v7232_v17  ;;  %v7233_v20 = vmax.f32 %v6604_v54, 0.0  ;;  %v6628_v36 = vadd.f32 %v1286_v60, %v5700_v10  ;;  %v7422_v0 = vmax.f32 %v6325_v55, 0.0 }
 0x1ff   :  { %2583 = vmatprep.mubr.f32.mxu0 %v1456_v59  ;;  %2808 = vmatprep.mubr.f32.mxu1 %v7419_v18  ;;  %v7238_v30 = vmax.f32 %v6613_v16, 0.0  ;;  %v7235_v42 = vmax.f32 %v6618_v49, 0.0  ;;  %v1033_v22 = vpop.f32.mrb[122].mxu0 }
 0x200   :  { %1791 = vst [vmem:[#allocation6 + $0x720] sm:$0xff] %v7233_v20  ;;  %v7236_v35 = vmax.f32 %v6628_v36, 0.0  ;;  %v6636_v59 = vadd.f32 %v1033_v22, %v5672_v2  ;;  %v1035_v17 = vpop.f32.mrb[123].mxu0  ;;  %v1290_v18 = vpop.f32.mrb[122].mxu1  ;;  %v7421_v20 = vmax.f32 %v6298_v3, 0.0 }
 0x201   :  { %1792 = vst [vmem:[#allocation6 + $0x728] sm:$0xff] %v7238_v30  ;;  %1793 = vst [vmem:[#allocation6 + $0x730] sm:$0xff] %v7235_v42  ;;  %v6645_v60 = vadd.f32 %v1035_v17, %v5674_v50  ;;  %v6650_v22 = vadd.f32 %v1290_v18, %v5690_v19  ;;  %v1292_v46 = vpop.f32.mrb[123].mxu1  ;;  %v7423_v42 = vmax.f32 %v6340_v40, 0.0  ;;  %v7424_v40 = vmax.f32 %v6316_v25, 0.0 }
 0x202   :  { %2584 = vmatmul.mubr.f32.gmra.mrb[228].mxu0 %v7420_v6  ;;  %2809 = vmatmul.mubr.f32.gmra.mrb[228].mxu1 %v7421_v20  ;;  %1794 = vst [vmem:[#allocation6 + $0x738] sm:$0xff] %v7236_v35  ;;  %v7237_v6 = vmax.f32 %v6636_v59, 0.0  ;;  %v6660_v17 = vadd.f32 %v1292_v46, %v5700_v10  ;;  %v7426_v30 = vmax.f32 %v6357_v41, 0.0 }
 0x203   :  { %2588 = vmatprep.mubr.f32.mxu0 %v7422_v0  ;;  %2813 = vmatprep.mubr.f32.mxu1 %v7423_v42  ;;  %v1544_v3 = vmax.f32 %v6645_v60, 0.0  ;;  %v7239_v20 = vmax.f32 %v6650_v22, 0.0  ;;  %v1039_v18 = vpop.f32.mrb[124].mxu0 }
 0x204   :  { %1799 = vst [vmem:[#allocation6 + $0x760] sm:$0xff] %v7237_v6  ;;  %v7240_v55 = vmax.f32 %v6660_v17, 0.0  ;;  %v6668_v0 = vadd.f32 %v1039_v18, %v5672_v2  ;;  %v1041_v35 = vpop.f32.mrb[125].mxu0  ;;  %v1296_v42 = vpop.f32.mrb[124].mxu1  ;;  %v7425_v6 = vmax.f32 %v6330_v9, 0.0 }
 0x205   :  { %1800 = vst [vmem:[#allocation6 + $0x768] sm:$0xff] %v1544_v3  ;;  %1801 = vst [vmem:[#allocation6 + $0x770] sm:$0xff] %v7239_v20  ;;  %v6677_v46 = vadd.f32 %v1041_v35, %v5674_v50  ;;  %v6682_v18 = vadd.f32 %v1296_v42, %v5690_v19  ;;  %v1298_v25 = vpop.f32.mrb[125].mxu1  ;;  %v7427_v20 = vmax.f32 %v6372_v48, 0.0  ;;  %v7428_v48 = vmax.f32 %v6348_v29, 0.0 }
 0x206   :  { %2589 = vmatmul.mubr.f32.gmra.mrb[230].mxu0 %v7424_v40  ;;  %2814 = vmatmul.mubr.f32.gmra.mrb[230].mxu1 %v7425_v6  ;;  %1802 = vst [vmem:[#allocation6 + $0x778] sm:$0xff] %v7240_v55  ;;  %v7241_v40 = vmax.f32 %v6668_v0, 0.0  ;;  %v6692_v35 = vadd.f32 %v1298_v25, %v5700_v10 }
 0x207   :  { %2593 = vmatprep.mubr.f32.mxu0 %v7426_v30  ;;  %2818 = vmatprep.mubr.f32.mxu1 %v7427_v20  ;;  %v1552_v9 = vmax.f32 %v6677_v46, 0.0  ;;  %v7242_v6 = vmax.f32 %v6682_v18, 0.0  ;;  %v1045_v42 = vpop.f32.mrb[126].mxu0 }
 0x208   :  { %1807 = vst [vmem:[#allocation6 + $0x7a0] sm:$0xff] %v7241_v40  ;;  %v1554_v41 = vmax.f32 %v6692_v35, 0.0  ;;  %v6700_v30 = vadd.f32 %v1045_v42, %v5672_v2  ;;  %v1047_v55 = vpop.f32.mrb[127].mxu0  ;;  %v1302_v20 = vpop.f32.mrb[126].mxu1  ;;  %v7429_v40 = vmax.f32 %v6362_v21, 0.0  ;;  %v7430_v42 = vmax.f32 %v6389_v31, 0.0 }
 0x209   :  { %1808 = vst [vmem:[#allocation6 + $0x7a8] sm:$0xff] %v1552_v9  ;;  %1809 = vst [vmem:[#allocation6 + $0x7b0] sm:$0xff] %v7242_v6  ;;  %v6709_v25 = vadd.f32 %v1047_v55, %v5674_v50  ;;  %v6714_v2 = vadd.f32 %v1302_v20, %v5690_v19  ;;  %v1304_v29 = vpop.f32.mrb[127].mxu1  ;;  %v7431_v6 = vmax.f32 %v6404_v27, 0.0 }
 0x20a   :  { %2594 = vmatmul.mubr.f32.gmra.mrb[232].mxu0 %v7428_v48  ;;  %2819 = vmatmul.mubr.f32.gmra.mrb[232].mxu1 %v7429_v40  ;;  %1810 = vst [vmem:[#allocation6 + $0x7b8] sm:$0xff] %v1554_v41  ;;  %v1559_v48 = vmax.f32 %v6700_v30, 0.0  ;;  %v6724_v50 = vadd.f32 %v1304_v29, %v5700_v10 }
 0x20b   :  { %2598 = vmatprep.mubr.f32.mxu0 %v7430_v42  ;;  %2823 = vmatprep.mubr.f32.mxu1 %v7431_v6  ;;  %v1560_v21 = vmax.f32 %v6709_v25, 0.0  ;;  %v7243_v19 = vmax.f32 %v6714_v2, 0.0  ;;  %v2045_v55 = vpop.f32.mrb[128].mxu0  ;;  %v7432_v42 = vmax.f32 %v6380_v58, 0.0  ;;  %v7433_v6 = vmax.f32 %v6394_v44, 0.0 }
 0x20c   :  { %1815 = vst [vmem:[#allocation6 + $0x7e0] sm:$0xff] %v1559_v48  ;;  %v1562_v31 = vmax.f32 %v6724_v50, 0.0  ;;  %v2270_v40 = vpop.f32.mrb[128].mxu1  ;;  %v2047_v20 = vpop.f32.mrb[129].mxu0  ;;  %v7434_v58 = vmax.f32 %v6436_v15, 0.0  ;;  %v7436_v44 = vmax.f32 %v6426_v57, 0.0 }
 0x20d   :  { %1816 = vst [vmem:[#allocation6 + $0x7e8] sm:$0xff] %v1560_v21  ;;  %1817 = vst [vmem:[#allocation6 + $0x7f0] sm:$0xff] %v7243_v19  ;;  %v6737_v10 = vadd.f32 %v2270_v40, %v2045_v55  ;;  %v2272_v27 = vpop.f32.mrb[129].mxu1  ;;  %v7435_v19 = vmax.f32 %v6412_v13, 0.0  ;;  %v7440_v57 = vmax.f32 %v6500_v4, 0.0 }
 0x20e   :  { %2599 = vmatmul.mubr.f32.gmra.mrb[234].mxu0 %v7432_v42  ;;  %2824 = vmatmul.mubr.f32.gmra.mrb[234].mxu1 %v7433_v6  ;;  %1818 = vst [vmem:[#allocation6 + $0x7f8] sm:$0xff] %v1562_v31  ;;  %v7438_v6 = vmax.f32 %v6444_v1, 0.0 }
 0x20f   :  { %2603 = vmatprep.mubr.f32.mxu0 %v1488_v45  ;;  %2828 = vmatprep.mubr.f32.mxu1 %v7434_v58  ;;  %v7439_v58 = vmax.f32 %v6458_v7, 0.0 }
 0x210   :  { %v2050_v29 = vpop.f32.mrb[130].mxu0  ;;  %v2275_v20 = vpop.f32.mrb[130].mxu1 }
 0x211   :  { %v2052_v42 = vpop.f32.mrb[131].mxu0  ;;  %v6749_v55 = vadd.f32 %v2275_v20, %v2050_v29  ;;  %v2277_v40 = vpop.f32.mrb[131].mxu1  ;;  %v7441_v29 = vmax.f32 %v6476_v47, 0.0 }
 0x212   :  { %2604 = vmatmul.mubr.f32.gmra.mrb[236].mxu0 %v7435_v19  ;;  %2829 = vmatmul.mubr.f32.gmra.mrb[236].mxu1 %v7436_v44  ;;  %v7442_v42 = vmax.f32 %v6490_v63, 0.0  ;;  %v7444_v44 = vmax.f32 %v6522_v5, 0.0  ;;  %v7447_v5 = vmax.f32 %v6581_v24, 0.0  ;;  %v7452_v24 = vmax.f32 %v6628_v36, 0.0 }
 0x213   :  { %2608 = vmatprep.mubr.f32.mxu0 %v1496_v23  ;;  %2833 = vmatprep.mubr.f32.mxu1 %v7437_v62  ;;  %v7446_v62 = vmax.f32 %v6554_v61, 0.0  ;;  %v7451_v61 = vmax.f32 %v6613_v16, 0.0 }
 0x214   :  { %v2055_v15 = vpop.f32.mrb[132].mxu0  ;;  %v2280_v45 = vpop.f32.mrb[132].mxu1 }
 0x215   :  { %v2057_v27 = vpop.f32.mrb[133].mxu0  ;;  %v6759_v13 = vadd.f32 %v2280_v45, %v2055_v15  ;;  %v2282_v19 = vpop.f32.mrb[133].mxu1  ;;  %v7449_v15 = vmax.f32 %v6572_v26, 0.0 }
 0x216   :  { %2609 = vmatmul.mubr.f32.gmra.mrb[238].mxu0 %v7438_v6  ;;  %2834 = vmatmul.mubr.f32.gmra.mrb[238].mxu1 %v7439_v58  ;;  %v7450_v27 = vmax.f32 %v6586_v56, 0.0  ;;  %v7453_v58 = vmax.f32 %v6604_v54, 0.0  ;;  %v7455_v56 = vmax.f32 %v6660_v17, 0.0 }
 0x217   :  { %2613 = vmatprep.mubr.f32.mxu0 %v1504_v38  ;;  %2838 = vmatprep.mubr.f32.mxu1 %v7440_v57  ;;  %v7443_v38 = vmax.f32 %v6508_v12, 0.0 }
 0x218   :  { %v2285_v14 = vpop.f32.mrb[134].mxu1 }
 0x219   :  { %v2060_v51 = vpop.f32.mrb[134].mxu0  ;;  %v2287_v20 = vpop.f32.mrb[135].mxu1 }
 0x21a   :  { %v2062_v23 = vpop.f32.mrb[135].mxu0  ;;  %2614 = vmatmul.mubr.f32.gmra.mrb[240].mxu0 %v7441_v29  ;;  %v6769_v1 = vadd.f32 %v2285_v14, %v2060_v51  ;;  %2839 = vmatmul.mubr.f32.gmra.mrb[240].mxu1 %v7442_v42  ;;  %v7454_v51 = vmax.f32 %v6618_v49, 0.0  ;;  %v7457_v20 = vmax.f32 %v6650_v22, 0.0 }
 0x21b   :  { %2618 = vmatprep.mubr.f32.mxu0 %v1512_v52  ;;  %2843 = vmatprep.mubr.f32.mxu1 %v1514_v39  ;;  %v7445_v52 = vmax.f32 %v6540_v11, 0.0  ;;  %v7456_v23 = vmax.f32 %v6636_v59, 0.0 }
 0x21d   :  { %v2065_v7 = vpop.f32.mrb[136].mxu0  ;;  %v2290_v43 = vpop.f32.mrb[136].mxu1 }
 0x21e   :  { %v2067_v4 = vpop.f32.mrb[137].mxu0  ;;  %2619 = vmatmul.mubr.f32.gmra.mrb[242].mxu0 %v7443_v38  ;;  %v6779_v47 = vadd.f32 %v2290_v43, %v2065_v7  ;;  %v2292_v40 = vpop.f32.mrb[137].mxu1  ;;  %2844 = vmatmul.mubr.f32.gmra.mrb[242].mxu1 %v7444_v44  ;;  %v7459_v7 = vmax.f32 %v6682_v18, 0.0 }
 0x21f   :  { %2623 = vmatprep.mubr.f32.mxu0 %v1520_v33  ;;  %2848 = vmatprep.mubr.f32.mxu1 %v1522_v53 }
 0x221   :  { %v2070_v63 = vpop.f32.mrb[138].mxu0  ;;  %v2295_v8 = vpop.f32.mrb[138].mxu1 }
 0x222   :  { %v2072_v28 = vpop.f32.mrb[139].mxu0  ;;  %2624 = vmatmul.mubr.f32.gmra.mrb[244].mxu0 %v7445_v52  ;;  %v6789_v12 = vadd.f32 %v2295_v8, %v2070_v63  ;;  %v2297_v39 = vpop.f32.mrb[139].mxu1  ;;  %2849 = vmatmul.mubr.f32.gmra.mrb[244].mxu1 %v7446_v62 }
 0x223   :  { %2628 = vmatprep.mubr.f32.mxu0 %v7447_v5  ;;  %2853 = vmatprep.mubr.f32.mxu1 %v7448_v34 }
 0x225   :  { %v2075_v32 = vpop.f32.mrb[140].mxu0  ;;  %v2300_v33 = vpop.f32.mrb[140].mxu1 }
 0x226   :  { %v2077_v53 = vpop.f32.mrb[141].mxu0  ;;  %2629 = vmatmul.mubr.f32.gmra.mrb[246].mxu0 %v7449_v15  ;;  %v6799_v11 = vadd.f32 %v2300_v33, %v2075_v32  ;;  %v2302_v45 = vpop.f32.mrb[141].mxu1  ;;  %2854 = vmatmul.mubr.f32.gmra.mrb[246].mxu1 %v7450_v27 }
 0x227   :  { %2633 = vmatprep.mubr.f32.mxu0 %v7451_v61  ;;  %2858 = vmatprep.mubr.f32.mxu1 %v7452_v24 }
 0x229   :  { %v2080_v37 = vpop.f32.mrb[142].mxu0  ;;  %v2305_v6 = vpop.f32.mrb[142].mxu1 }
 0x22a   :  { %v2082_v19 = vpop.f32.mrb[143].mxu0  ;;  %2634 = vmatmul.mubr.f32.gmra.mrb[248].mxu0 %v7453_v58  ;;  %v6809_v26 = vadd.f32 %v2305_v6, %v2080_v37  ;;  %v2307_v57 = vpop.f32.mrb[143].mxu1  ;;  %2859 = vmatmul.mubr.f32.gmra.mrb[248].mxu1 %v7454_v51 }
 0x22b   :  { %2638 = vmatprep.mubr.f32.mxu0 %v1544_v3  ;;  %2863 = vmatprep.mubr.f32.mxu1 %v7455_v56  ;;  %v7458_v3 = vmax.f32 %v6668_v0, 0.0 }
 0x22d   :  { %v2085_v16 = vpop.f32.mrb[144].mxu0  ;;  %v2310_v36 = vpop.f32.mrb[144].mxu1 }
 0x22e   :  { %v2087_v14 = vpop.f32.mrb[145].mxu0  ;;  %2639 = vmatmul.mubr.f32.gmra.mrb[250].mxu0 %v7456_v23  ;;  %v6819_v54 = vadd.f32 %v2310_v36, %v2085_v16  ;;  %v2312_v29 = vpop.f32.mrb[145].mxu1  ;;  %2864 = vmatmul.mubr.f32.gmra.mrb[250].mxu1 %v7457_v20 }
 0x22f   :  { %2643 = vmatprep.mubr.f32.mxu0 %v1552_v9  ;;  %2868 = vmatprep.mubr.f32.mxu1 %v1554_v41  ;;  %v7460_v41 = vmax.f32 %v6714_v2, 0.0 }
 0x231   :  { %v2090_v49 = vpop.f32.mrb[146].mxu0  ;;  %v2315_v60 = vpop.f32.mrb[146].mxu1 }
 0x232   :  { %v2092_v17 = vpop.f32.mrb[147].mxu0  ;;  %2644 = vmatmul.mubr.f32.gmra.mrb[252].mxu0 %v7458_v3  ;;  %v6829_v59 = vadd.f32 %v2315_v60, %v2090_v49  ;;  %v2317_v42 = vpop.f32.mrb[147].mxu1  ;;  %2869 = vmatmul.mubr.f32.gmra.mrb[252].mxu1 %v7459_v7 }
 0x233   :  { %2648 = vmatprep.mubr.f32.mxu0 %v1560_v21  ;;  %2873 = vmatprep.mubr.f32.mxu1 %v1562_v31 }
 0x235   :  { %v2095_v22 = vpop.f32.mrb[148].mxu0  ;;  %v2320_v46 = vpop.f32.mrb[148].mxu1 }
 0x236   :  { %v2097_v35 = vpop.f32.mrb[149].mxu0  ;;  %2649 = vmatmul.mubr.f32.gmra.mrb[254].mxu0 %v1559_v48  ;;  %v6839_v0 = vadd.f32 %v2320_v46, %v2095_v22  ;;  %v2322_v9 = vpop.f32.mrb[149].mxu1  ;;  %2874 = vmatmul.mubr.f32.gmra.mrb[254].mxu1 %v7460_v41 }
 0x239   :  { %v2100_v18 = vpop.f32.mrb[150].mxu0  ;;  %v2325_v43 = vpop.f32.mrb[150].mxu1 }
 0x23a   :  { %v2102_v4 = vpop.f32.mrb[151].mxu0  ;;  %v6843_v25 = vadd.f32 %v2325_v43, %v2100_v18  ;;  %v2327_v21 = vpop.f32.mrb[151].mxu1 }
 0x23d   :  { %v2105_v50 = vpop.f32.mrb[152].mxu0  ;;  %v2330_v31 = vpop.f32.mrb[152].mxu1 }
 0x23e   :  { %v2107_v38 = vpop.f32.mrb[153].mxu0  ;;  %v6845_v40 = vadd.f32 %v2330_v31, %v2105_v50  ;;  %v2332_v44 = vpop.f32.mrb[153].mxu1 }
 0x241   :  { %v2110_v30 = vpop.f32.mrb[154].mxu0  ;;  %v2335_v48 = vpop.f32.mrb[154].mxu1 }
 0x242   :  { %v2112_v63 = vpop.f32.mrb[155].mxu0  ;;  %v6847_v8 = vadd.f32 %v2335_v48, %v2110_v30  ;;  %v2337_v28 = vpop.f32.mrb[155].mxu1 }
 0x245   :  { %v2115_v2 = vpop.f32.mrb[156].mxu0  ;;  %v2340_v52 = vpop.f32.mrb[156].mxu1 }
 0x246   :  { %v2117_v39 = vpop.f32.mrb[157].mxu0  ;;  %v6849_v62 = vadd.f32 %v2340_v52, %v2115_v2  ;;  %v2342_v5 = vpop.f32.mrb[157].mxu1 }
 0x249   :  { %v2120_v34 = vpop.f32.mrb[158].mxu0  ;;  %v2345_v32 = vpop.f32.mrb[158].mxu1 }
 0x24a   :  { %v2122_v33 = vpop.f32.mrb[159].mxu0  ;;  %v6851_v53 = vadd.f32 %v2345_v32, %v2120_v34  ;;  %v2347_v15 = vpop.f32.mrb[159].mxu1 }
 0x24d   :  { %v2125_v45 = vpop.f32.mrb[160].mxu0  ;;  %v2350_v27 = vpop.f32.mrb[160].mxu1 }
 0x24e   :  { %v2127_v61 = vpop.f32.mrb[161].mxu0  ;;  %v6853_v24 = vadd.f32 %v2350_v27, %v2125_v45  ;;  %v2352_v37 = vpop.f32.mrb[161].mxu1 }
 0x251   :  { %v2130_v6 = vpop.f32.mrb[162].mxu0  ;;  %v2355_v19 = vpop.f32.mrb[162].mxu1 }
 0x252   :  { %v2132_v58 = vpop.f32.mrb[163].mxu0  ;;  %v6855_v57 = vadd.f32 %v2355_v19, %v2130_v6  ;;  %v2357_v51 = vpop.f32.mrb[163].mxu1 }
 0x255   :  { %v2135_v56 = vpop.f32.mrb[164].mxu0  ;;  %v2360_v16 = vpop.f32.mrb[164].mxu1 }
 0x256   :  { %v2137_v36 = vpop.f32.mrb[165].mxu0  ;;  %v6857_v14 = vadd.f32 %v2360_v16, %v2135_v56  ;;  %v2362_v23 = vpop.f32.mrb[165].mxu1 }
 0x259   :  { %v2140_v29 = vpop.f32.mrb[166].mxu0  ;;  %v2365_v20 = vpop.f32.mrb[166].mxu1 }
 0x25a   :  { %v2142_v49 = vpop.f32.mrb[167].mxu0  ;;  %v6859_v60 = vadd.f32 %v2365_v20, %v2140_v29  ;;  %v2367_v17 = vpop.f32.mrb[167].mxu1 }
 0x25d   :  { %v2145_v3 = vpop.f32.mrb[168].mxu0  ;;  %v2370_v42 = vpop.f32.mrb[168].mxu1 }
 0x25e   :  { %v2147_v7 = vpop.f32.mrb[169].mxu0  ;;  %v6861_v22 = vadd.f32 %v2370_v42, %v2145_v3  ;;  %v2372_v46 = vpop.f32.mrb[169].mxu1 }
 0x261   :  { %v2150_v35 = vpop.f32.mrb[170].mxu0  ;;  %v2375_v9 = vpop.f32.mrb[170].mxu1 }
 0x262   :  { %v2152_v41 = vpop.f32.mrb[171].mxu0  ;;  %v6863_v18 = vadd.f32 %v2375_v9, %v2150_v35  ;;  %v2377_v43 = vpop.f32.mrb[171].mxu1 }
 0x265   :  { %v2155_v4 = vpop.f32.mrb[172].mxu0  ;;  %v2380_v21 = vpop.f32.mrb[172].mxu1 }
 0x266   :  { %v2157_v50 = vpop.f32.mrb[173].mxu0  ;;  %v6865_v31 = vadd.f32 %v2380_v21, %v2155_v4  ;;  %v2382_v38 = vpop.f32.mrb[173].mxu1 }
 0x269   :  { %v2160_v44 = vpop.f32.mrb[174].mxu0  ;;  %v2385_v30 = vpop.f32.mrb[174].mxu1 }
 0x26a   :  { %v2162_v48 = vpop.f32.mrb[175].mxu0  ;;  %v6867_v63 = vadd.f32 %v2385_v30, %v2160_v44  ;;  %v2387_v28 = vpop.f32.mrb[175].mxu1 }
 0x26d   :  { %v2165_v2 = vpop.f32.mrb[176].mxu0  ;;  %v2390_v52 = vpop.f32.mrb[176].mxu1 }
 0x26e   :  { %v2167_v39 = vpop.f32.mrb[177].mxu0  ;;  %v6869_v5 = vadd.f32 %v2390_v52, %v2165_v2  ;;  %v2392_v34 = vpop.f32.mrb[177].mxu1 }
 0x271   :  { %v2170_v32 = vpop.f32.mrb[178].mxu0  ;;  %v2395_v33 = vpop.f32.mrb[178].mxu1 }
 0x272   :  { %v2172_v15 = vpop.f32.mrb[179].mxu0  ;;  %v6871_v45 = vadd.f32 %v2395_v33, %v2170_v32  ;;  %v2397_v27 = vpop.f32.mrb[179].mxu1 }
 0x273   :  { %v6889_v15 = vld [vmem:[%s7022_s4] ss:$0 sm:$0xff]  ;;  %s3475_s4 = scalar_lea.vmem %s3106_s16, 32768 }
 0x274   :  { %p3476_p8 = scmp.ne.s32.totalorder %s3106_s16, %s3475_s4  ;;  %p3481_p10 = scmp.lt.s32.totalorder %s3475_s4, %s3475_s4 }
 0x275   :  { %v2175_v61 = vpop.f32.mrb[180].mxu0  ;;  %v2400_v37 = vpop.f32.mrb[180].mxu1 }
 0x276   :  { %v2177_v6 = vpop.f32.mrb[181].mxu0  ;;  %v6873_v19 = vadd.f32 %v2400_v37, %v2175_v61  ;;  %v2402_v58 = vpop.f32.mrb[181].mxu1  ;;  %p3482_p11 = por %p3481_p10, %p3480_p9 }
 0x277   :  { %v6895_v58 = vld [vmem:[%s7021_s3] ss:$0 sm:$0xff] }
 0x278   :  { %p3483_p12 = pnand %p3482_p11, %p3476_p8 }
 0x279   :  { %v2180_v51 = vpop.f32.mrb[182].mxu0  ;;  %v2405_v56 = vpop.f32.mrb[182].mxu1 }
 0x27a   :  { %v2182_v16 = vpop.f32.mrb[183].mxu0  ;;  %v6875_v36 = vadd.f32 %v2405_v56, %v2180_v51  ;;  %v2407_v23 = vpop.f32.mrb[183].mxu1 }
 0x27d   :  { %v2185_v29 = vpop.f32.mrb[184].mxu0  ;;  %v2410_v20 = vpop.f32.mrb[184].mxu1 }
 0x27e   :  { %v2187_v49 = vpop.f32.mrb[185].mxu0  ;;  %v6877_v17 = vadd.f32 %v2410_v20, %v2185_v29  ;;  %v2412_v3 = vpop.f32.mrb[185].mxu1 }
 0x281   :  { %v2190_v42 = vpop.f32.mrb[186].mxu0  ;;  %v2415_v7 = vpop.f32.mrb[186].mxu1 }
 0x282   :  { %v2192_v46 = vpop.f32.mrb[187].mxu0  ;;  %v6879_v35 = vadd.f32 %v2415_v7, %v2190_v42  ;;  %v2417_v9 = vpop.f32.mrb[187].mxu1 }
 0x285   :  { %v2195_v41 = vpop.f32.mrb[188].mxu0  ;;  %v2420_v43 = vpop.f32.mrb[188].mxu1 }
 0x286   :  { %v2197_v4 = vpop.f32.mrb[189].mxu0  ;;  %v6881_v21 = vadd.f32 %v2420_v43, %v2195_v41  ;;  %v2422_v50 = vpop.f32.mrb[189].mxu1 }
 0x289   :  { %v2200_v38 = vpop.f32.mrb[190].mxu0  ;;  %v2425_v44 = vpop.f32.mrb[190].mxu1 }
 0x28a   :  { %v2202_v30 = vpop.f32.mrb[191].mxu0  ;;  %v6883_v48 = vadd.f32 %v2425_v44, %v2200_v38  ;;  %v2427_v28 = vpop.f32.mrb[191].mxu1 }
 0x28d   :  { %v2495_v2 = vpop.f32.mrb[192].mxu0  ;;  %v2720_v39 = vpop.f32.mrb[192].mxu1 }
 0x28e   :  { %v2496_v52 = vadd.f32 %v2495_v2, %v6737_v10  ;;  %v2497_v34 = vpop.f32.mrb[193].mxu0  ;;  %v2722_v32 = vpop.f32.mrb[193].mxu1 }
 0x290   :  { %v2721_v33 = vadd.f32 %v2720_v39, %v2496_v52 }
 0x291   :  { %v2500_v27 = vpop.f32.mrb[194].mxu0  ;;  %v2725_v37 = vpop.f32.mrb[194].mxu1 }
 0x292   :  { %v2501_v61 = vadd.f32 %v2500_v27, %v6749_v55  ;;  %v2502_v6 = vpop.f32.mrb[195].mxu0  ;;  %v2727_v10 = vpop.f32.mrb[195].mxu1  ;;  %v2985_v51 = vmul.f32 %v6889_v15, %v2721_v33 }
 0x294   :  { %v2726_v56 = vadd.f32 %v2725_v37, %v2501_v61  ;;  %v3024_v23 = vadd.f32 %v6895_v58, %v2985_v51 }
 0x295   :  { %v2505_v16 = vpop.f32.mrb[196].mxu0  ;;  %v2730_v55 = vpop.f32.mrb[196].mxu1 }
 0x296   :  { %v2506_v29 = vadd.f32 %v2505_v16, %v6759_v13  ;;  %v2507_v20 = vpop.f32.mrb[197].mxu0  ;;  %v2732_v49 = vpop.f32.mrb[197].mxu1 }
 0x297   :  { %3486 = shalt.err (!%p3483_p12)
}
 0x298   :  { %s3487_s18 = scalar_lea.hbm %s7025_s7, 32768 }
 0x299   :  { %p3488_p13 = scmp.ne.s32.totalorder %s7025_s7, %s3487_s18  ;;  %p3491_p0 = scmp.lt.u32.totalorder %s3487_s18, %s7025_s7 }
 0x29b   :  { %p3493_p1 = pnand %p3491_p0, %p3488_p13 }
 0x29d   :  { %3496 = shalt.err (!%p3493_p1)
}
 0x29e   :  { %s3531_s22 = smov 1024   ;;  %s3532_s23 = smov 64   ;;  %3056 = vst [vmem:[#allocation5] sm:$0xff] %v3024_v23  ;;  %v2986_v13 = vmul.f32 %v6889_v15, %v2726_v56  ;;  %v2731_v3 = vadd.f32 %v2730_v55, %v2506_v29  ;;  %v2510_v42 = vpop.f32.mrb[198].mxu0  ;;  %v2735_v9 = vpop.f32.mrb[198].mxu1 }
 0x29f   :  { %3111 = dma.vmem_to_hbm [thread:$0]  %s3106_s16, 32768, %s7025_s7, [#allocation7], %s3531_s22, %s3531_s22, %s3532_s23   ;;  %v2511_v46 = vadd.f32 %v2510_v42, %v6769_v1  ;;  %v2512_v41 = vpop.f32.mrb[199].mxu0  ;;  %v2737_v43 = vpop.f32.mrb[199].mxu1 }
 0x2a0   :  { %v3025_v7 = vadd.f32 %v6895_v58, %v2986_v13  ;;  %v2987_v4 = vmul.f32 %v6889_v15, %v2731_v3  ;;  %v2515_v38 = vpop.f32.mrb[200].mxu0  ;;  %v2740_v28 = vpop.f32.mrb[200].mxu1  ;;  %s3533_s7 = smov [#allocation5]  }
 0x2a1   :  { %v2736_v50 = vadd.f32 %v2735_v9, %v2511_v46  ;;  %v2516_v30 = vadd.f32 %v2515_v38, %v6779_v47  ;;  %v2517_v2 = vpop.f32.mrb[201].mxu0  ;;  %v2742_v52 = vpop.f32.mrb[201].mxu1  ;;  %s3093_s26 = sshll.u32 %s3533_s7, 4  ;;  %s3094_s26 = int_to_ptr.vmem [resolvable:$true] %s3093_s26 }
 0x2a2   :  { %3057 = vst [vmem:[#allocation5 + $0x8] sm:$0xff] %v3025_v7  ;;  %v3026_v44 = vadd.f32 %v6895_v58, %v2987_v4  ;;  %v2520_v1 = vpop.f32.mrb[202].mxu0  ;;  %v2745_v27 = vpop.f32.mrb[202].mxu1  ;;  %s3497_s27 = scalar_lea.vmem %s3094_s26, 4096  ;;  %p3502_p3 = scmp.lt.s32.totalorder %s3094_s26, %s3094_s26 }
 0x2a3   :  { %v2988_v39 = vmul.f32 %v6889_v15, %v2736_v50  ;;  %v2741_v34 = vadd.f32 %v2740_v28, %v2516_v30  ;;  %v2521_v33 = vadd.f32 %v2520_v1, %v6789_v12  ;;  %v2522_v61 = vpop.f32.mrb[203].mxu0  ;;  %v2747_v37 = vpop.f32.mrb[203].mxu1  ;;  %p3498_p2 = scmp.ne.s32.totalorder %s3094_s26, %s3497_s27  ;;  %p3503_p4 = scmp.lt.s32.totalorder %s3497_s27, %s3497_s27 }
 0x2a4   :  { %3058 = vst [vmem:[#allocation5 + $0x10] sm:$0xff] %v3026_v44 }
 0x2a5   :  { %v3027_v32 = vadd.f32 %v6895_v58, %v2988_v39  ;;  %v2989_v6 = vmul.f32 %v6889_v15, %v2741_v34  ;;  %v2746_v10 = vadd.f32 %v2745_v27, %v2521_v33  ;;  %v2525_v47 = vpop.f32.mrb[204].mxu0  ;;  %v2750_v16 = vpop.f32.mrb[204].mxu1  ;;  %p3504_p5 = por %p3503_p4, %p3502_p3 }
 0x2a6   :  { %v2526_v56 = vadd.f32 %v2525_v47, %v6799_v11  ;;  %v2527_v23 = vpop.f32.mrb[205].mxu0  ;;  %v2752_v29 = vpop.f32.mrb[205].mxu1 }
 0x2a7   :  { %3059 = vst [vmem:[#allocation5 + $0x18] sm:$0xff] %v3027_v32  ;;  %v3028_v51 = vadd.f32 %v6895_v58, %v2989_v6  ;;  %v2990_v55 = vmul.f32 %v6889_v15, %v2746_v10  ;;  %p3505_p6 = pnand %p3504_p5, %p3498_p2 }
 0x2a8   :  { %v2751_v20 = vadd.f32 %v2750_v16, %v2526_v56 }
 0x2a9   :  { %3060 = vst [vmem:[#allocation5 + $0x20] sm:$0xff] %v3028_v51  ;;  %v2530_v12 = vpop.f32.mrb[206].mxu0  ;;  %v3029_v49 = vadd.f32 %v6895_v58, %v2990_v55  ;;  %v2755_v3 = vpop.f32.mrb[206].mxu1 }
 0x2aa   :  { %v2531_v13 = vadd.f32 %v2530_v12, %v6809_v26  ;;  %v2532_v42 = vpop.f32.mrb[207].mxu0  ;;  %v2757_v7 = vpop.f32.mrb[207].mxu1  ;;  %v2991_v46 = vmul.f32 %v6889_v15, %v2751_v20 }
 0x2ab   :  { %3061 = vst [vmem:[#allocation5 + $0x28] sm:$0xff] %v3029_v49 }
 0x2ac   :  { %v2756_v9 = vadd.f32 %v2755_v3, %v2531_v13  ;;  %v3030_v41 = vadd.f32 %v6895_v58, %v2991_v46 }
 0x2ad   :  { %v2535_v11 = vpop.f32.mrb[208].mxu0  ;;  %v2760_v4 = vpop.f32.mrb[208].mxu1 }
 0x2ae   :  { %v2536_v43 = vadd.f32 %v2535_v11, %v6819_v54  ;;  %v2537_v50 = vpop.f32.mrb[209].mxu0  ;;  %v2762_v38 = vpop.f32.mrb[209].mxu1  ;;  %3062 = vst [vmem:[#allocation5 + $0x30] sm:$0xff] %v3030_v41  ;;  %v2992_v44 = vmul.f32 %v6889_v15, %v2756_v9 }
 0x2b0   :  { %v2761_v30 = vadd.f32 %v2760_v4, %v2536_v43  ;;  %v3031_v28 = vadd.f32 %v6895_v58, %v2992_v44 }
 0x2b1   :  { %v2540_v26 = vpop.f32.mrb[210].mxu0  ;;  %v2765_v52 = vpop.f32.mrb[210].mxu1 }
 0x2b2   :  { %v2541_v2 = vadd.f32 %v2540_v26, %v6829_v59  ;;  %v2542_v39 = vpop.f32.mrb[211].mxu0  ;;  %v2767_v34 = vpop.f32.mrb[211].mxu1  ;;  %3063 = vst [vmem:[#allocation5 + $0x38] sm:$0xff] %v3031_v28  ;;  %v2993_v1 = vmul.f32 %v6889_v15, %v2761_v30 }
 0x2b4   :  { %v2766_v32 = vadd.f32 %v2765_v52, %v2541_v2  ;;  %v3032_v33 = vadd.f32 %v6895_v58, %v2993_v1 }
 0x2b5   :  { %v2545_v54 = vpop.f32.mrb[212].mxu0  ;;  %v2770_v61 = vpop.f32.mrb[212].mxu1 }
 0x2b6   :  { %v2546_v27 = vadd.f32 %v2545_v54, %v6839_v0  ;;  %v2547_v37 = vpop.f32.mrb[213].mxu0  ;;  %v2772_v6 = vpop.f32.mrb[213].mxu1  ;;  %3064 = vst [vmem:[#allocation5 + $0x40] sm:$0xff] %v3032_v33  ;;  %v2994_v10 = vmul.f32 %v6889_v15, %v2766_v32 }
 0x2b8   :  { %v2771_v47 = vadd.f32 %v2770_v61, %v2546_v27  ;;  %v3033_v51 = vadd.f32 %v6895_v58, %v2994_v10 }
 0x2b9   :  { %v2550_v59 = vpop.f32.mrb[214].mxu0  ;;  %v2775_v16 = vpop.f32.mrb[214].mxu1 }
 0x2ba   :  { %v2551_v56 = vadd.f32 %v2550_v59, %v6843_v25  ;;  %v2552_v23 = vpop.f32.mrb[215].mxu0  ;;  %v2777_v29 = vpop.f32.mrb[215].mxu1  ;;  %3065 = vst [vmem:[#allocation5 + $0x48] sm:$0xff] %v3033_v51  ;;  %v2995_v55 = vmul.f32 %v6889_v15, %v2771_v47 }
 0x2bc   :  { %v2776_v20 = vadd.f32 %v2775_v16, %v2551_v56  ;;  %v3034_v12 = vadd.f32 %v6895_v58, %v2995_v55 }
 0x2bd   :  { %v2555_v0 = vpop.f32.mrb[216].mxu0  ;;  %v2780_v13 = vpop.f32.mrb[216].mxu1 }
 0x2be   :  { %v2556_v49 = vadd.f32 %v2555_v0, %v6845_v40  ;;  %v2557_v3 = vpop.f32.mrb[217].mxu0  ;;  %v2782_v42 = vpop.f32.mrb[217].mxu1  ;;  %3066 = vst [vmem:[#allocation5 + $0x50] sm:$0xff] %v3034_v12  ;;  %v2996_v7 = vmul.f32 %v6889_v15, %v2776_v20 }
 0x2c0   :  { %v2781_v46 = vadd.f32 %v2780_v13, %v2556_v49  ;;  %v3035_v9 = vadd.f32 %v6895_v58, %v2996_v7 }
 0x2c1   :  { %v2560_v25 = vpop.f32.mrb[218].mxu0  ;;  %v2785_v41 = vpop.f32.mrb[218].mxu1 }
 0x2c2   :  { %v2561_v11 = vadd.f32 %v2560_v25, %v6847_v8  ;;  %v2562_v43 = vpop.f32.mrb[219].mxu0  ;;  %v2787_v4 = vpop.f32.mrb[219].mxu1  ;;  %3067 = vst [vmem:[#allocation5 + $0x58] sm:$0xff] %v3035_v9  ;;  %v2997_v50 = vmul.f32 %v6889_v15, %v2781_v46 }
 0x2c4   :  { %v2786_v38 = vadd.f32 %v2785_v41, %v2561_v11  ;;  %v3036_v44 = vadd.f32 %v6895_v58, %v2997_v50 }
 0x2c5   :  { %v2565_v40 = vpop.f32.mrb[220].mxu0  ;;  %v2790_v26 = vpop.f32.mrb[220].mxu1 }
 0x2c6   :  { %v2566_v30 = vadd.f32 %v2565_v40, %v6849_v62  ;;  %v2567_v28 = vpop.f32.mrb[221].mxu0  ;;  %v2792_v2 = vpop.f32.mrb[221].mxu1  ;;  %3068 = vst [vmem:[#allocation5 + $0x60] sm:$0xff] %v3036_v44  ;;  %v2998_v52 = vmul.f32 %v6889_v15, %v2786_v38 }
 0x2c8   :  { %v2791_v39 = vadd.f32 %v2790_v26, %v2566_v30  ;;  %v3037_v34 = vadd.f32 %v6895_v58, %v2998_v52 }
 0x2c9   :  { %v2570_v8 = vpop.f32.mrb[222].mxu0  ;;  %v2795_v32 = vpop.f32.mrb[222].mxu1 }
 0x2ca   :  { %v2571_v1 = vadd.f32 %v2570_v8, %v6851_v53  ;;  %v2572_v54 = vpop.f32.mrb[223].mxu0  ;;  %v2797_v33 = vpop.f32.mrb[223].mxu1  ;;  %3069 = vst [vmem:[#allocation5 + $0x68] sm:$0xff] %v3037_v34  ;;  %v2999_v27 = vmul.f32 %v6889_v15, %v2791_v39 }
 0x2cc   :  { %v2796_v61 = vadd.f32 %v2795_v32, %v2571_v1  ;;  %v3038_v37 = vadd.f32 %v6895_v58, %v2999_v27 }
 0x2cd   :  { %v2575_v62 = vpop.f32.mrb[224].mxu0  ;;  %v2800_v10 = vpop.f32.mrb[224].mxu1 }
 0x2ce   :  { %v2576_v6 = vadd.f32 %v2575_v62, %v6853_v24  ;;  %v2577_v47 = vpop.f32.mrb[225].mxu0  ;;  %v2802_v59 = vpop.f32.mrb[225].mxu1  ;;  %3070 = vst [vmem:[#allocation5 + $0x70] sm:$0xff] %v3038_v37  ;;  %v3000_v51 = vmul.f32 %v6889_v15, %v2796_v61 }
 0x2d0   :  { %v2801_v56 = vadd.f32 %v2800_v10, %v2576_v6  ;;  %v3039_v16 = vadd.f32 %v6895_v58, %v3000_v51 }
 0x2d1   :  { %v2580_v53 = vpop.f32.mrb[226].mxu0  ;;  %v2805_v29 = vpop.f32.mrb[226].mxu1 }
 0x2d2   :  { %v2581_v23 = vadd.f32 %v2580_v53, %v6855_v57  ;;  %v2582_v55 = vpop.f32.mrb[227].mxu0  ;;  %v2807_v20 = vpop.f32.mrb[227].mxu1  ;;  %3071 = vst [vmem:[#allocation5 + $0x78] sm:$0xff] %v3039_v16  ;;  %v3001_v0 = vmul.f32 %v6889_v15, %v2801_v56 }
 0x2d4   :  { %v2806_v12 = vadd.f32 %v2805_v29, %v2581_v23  ;;  %v3040_v49 = vadd.f32 %v6895_v58, %v3001_v0 }
 0x2d5   :  { %v2585_v24 = vpop.f32.mrb[228].mxu0  ;;  %v2810_v3 = vpop.f32.mrb[228].mxu1 }
 0x2d6   :  { %v2586_v13 = vadd.f32 %v2585_v24, %v6857_v14  ;;  %v2587_v42 = vpop.f32.mrb[229].mxu0  ;;  %v2812_v7 = vpop.f32.mrb[229].mxu1  ;;  %3072 = vst [vmem:[#allocation5 + $0x80] sm:$0xff] %v3040_v49  ;;  %v3002_v46 = vmul.f32 %v6889_v15, %v2806_v12 }
 0x2d8   :  { %v2811_v25 = vadd.f32 %v2810_v3, %v2586_v13  ;;  %v3041_v9 = vadd.f32 %v6895_v58, %v3002_v46 }
 0x2d9   :  { %v2590_v57 = vpop.f32.mrb[230].mxu0  ;;  %v2815_v41 = vpop.f32.mrb[230].mxu1 }
 0x2da   :  { %v2591_v11 = vadd.f32 %v2590_v57, %v6859_v60  ;;  %v2592_v43 = vpop.f32.mrb[231].mxu0  ;;  %v2817_v4 = vpop.f32.mrb[231].mxu1  ;;  %3073 = vst [vmem:[#allocation5 + $0x88] sm:$0xff] %v3041_v9  ;;  %v3003_v50 = vmul.f32 %v6889_v15, %v2811_v25 }
 0x2dc   :  { %v2816_v38 = vadd.f32 %v2815_v41, %v2591_v11  ;;  %v3042_v40 = vadd.f32 %v6895_v58, %v3003_v50 }
 0x2dd   :  { %v2595_v14 = vpop.f32.mrb[232].mxu0  ;;  %v2820_v30 = vpop.f32.mrb[232].mxu1 }
 0x2de   :  { %v2596_v44 = vadd.f32 %v2595_v14, %v6861_v22  ;;  %v2597_v26 = vpop.f32.mrb[233].mxu0  ;;  %v2822_v28 = vpop.f32.mrb[233].mxu1  ;;  %3074 = vst [vmem:[#allocation5 + $0x90] sm:$0xff] %v3042_v40  ;;  %v3004_v2 = vmul.f32 %v6889_v15, %v2816_v38 }
 0x2e0   :  { %v2821_v52 = vadd.f32 %v2820_v30, %v2596_v44  ;;  %v3043_v39 = vadd.f32 %v6895_v58, %v3004_v2 }
 0x2e1   :  { %v2600_v60 = vpop.f32.mrb[234].mxu0  ;;  %v2825_v34 = vpop.f32.mrb[234].mxu1 }
 0x2e2   :  { %v2601_v8 = vadd.f32 %v2600_v60, %v6863_v18  ;;  %v2602_v1 = vpop.f32.mrb[235].mxu0  ;;  %v2827_v32 = vpop.f32.mrb[235].mxu1  ;;  %3075 = vst [vmem:[#allocation5 + $0x98] sm:$0xff] %v3043_v39  ;;  %v3005_v54 = vmul.f32 %v6889_v15, %v2821_v52 }
 0x2e4   :  { %v2826_v33 = vadd.f32 %v2825_v34, %v2601_v8  ;;  %v3044_v27 = vadd.f32 %v6895_v58, %v3005_v54 }
 0x2e5   :  { %v2605_v22 = vpop.f32.mrb[236].mxu0  ;;  %v2830_v62 = vpop.f32.mrb[236].mxu1 }
 0x2e6   :  { %v2606_v61 = vadd.f32 %v2605_v22, %v6865_v31  ;;  %v2607_v37 = vpop.f32.mrb[237].mxu0  ;;  %v2832_v6 = vpop.f32.mrb[237].mxu1  ;;  %3076 = vst [vmem:[#allocation5 + $0xa0] sm:$0xff] %v3044_v27  ;;  %v3006_v10 = vmul.f32 %v6889_v15, %v2826_v33 }
 0x2e8   :  { %v2831_v47 = vadd.f32 %v2830_v62, %v2606_v61  ;;  %v3045_v59 = vadd.f32 %v6895_v58, %v3006_v10 }
 0x2e9   :  { %v2610_v18 = vpop.f32.mrb[238].mxu0  ;;  %v2835_v56 = vpop.f32.mrb[238].mxu1 }
 0x2ea   :  { %v2611_v51 = vadd.f32 %v2610_v18, %v6867_v63  ;;  %v2612_v53 = vpop.f32.mrb[239].mxu0  ;;  %v2837_v16 = vpop.f32.mrb[239].mxu1  ;;  %3077 = vst [vmem:[#allocation5 + $0xa8] sm:$0xff] %v3045_v59  ;;  %v3007_v23 = vmul.f32 %v6889_v15, %v2831_v47 }
 0x2ec   :  { %v2836_v29 = vadd.f32 %v2835_v56, %v2611_v51  ;;  %v3046_v55 = vadd.f32 %v6895_v58, %v3007_v23 }
 0x2ed   :  { %v2615_v31 = vpop.f32.mrb[240].mxu0  ;;  %v2840_v0 = vpop.f32.mrb[240].mxu1 }
 0x2ee   :  { %v2616_v20 = vadd.f32 %v2615_v31, %v6869_v5  ;;  %v2617_v12 = vpop.f32.mrb[241].mxu0  ;;  %v2842_v24 = vpop.f32.mrb[241].mxu1  ;;  %3078 = vst [vmem:[#allocation5 + $0xb0] sm:$0xff] %v3046_v55  ;;  %v3008_v49 = vmul.f32 %v6889_v15, %v2836_v29 }
 0x2f0   :  { %v2841_v13 = vadd.f32 %v2840_v0, %v2616_v20  ;;  %v3047_v3 = vadd.f32 %v6895_v58, %v3008_v49 }
 0x2f1   :  { %v2620_v63 = vpop.f32.mrb[242].mxu0  ;;  %v2845_v7 = vpop.f32.mrb[242].mxu1 }
 0x2f2   :  { %v2621_v42 = vadd.f32 %v2620_v63, %v6871_v45  ;;  %v2622_v46 = vpop.f32.mrb[243].mxu0  ;;  %v2847_v25 = vpop.f32.mrb[243].mxu1  ;;  %3079 = vst [vmem:[#allocation5 + $0xb8] sm:$0xff] %v3047_v3  ;;  %v3009_v57 = vmul.f32 %v6889_v15, %v2841_v13 }
 0x2f4   :  { %v2846_v9 = vadd.f32 %v2845_v7, %v2621_v42  ;;  %v3048_v11 = vadd.f32 %v6895_v58, %v3009_v57 }
 0x2f5   :  { %v2625_v5 = vpop.f32.mrb[244].mxu0  ;;  %v2850_v43 = vpop.f32.mrb[244].mxu1 }
 0x2f6   :  { %v2626_v41 = vadd.f32 %v2625_v5, %v6873_v19  ;;  %v2627_v4 = vpop.f32.mrb[245].mxu0  ;;  %v2852_v50 = vpop.f32.mrb[245].mxu1  ;;  %3080 = vst [vmem:[#allocation5 + $0xc0] sm:$0xff] %v3048_v11  ;;  %v3010_v38 = vmul.f32 %v6889_v15, %v2846_v9 }
 0x2f8   :  { %v2851_v14 = vadd.f32 %v2850_v43, %v2626_v41  ;;  %v3049_v40 = vadd.f32 %v6895_v58, %v3010_v38 }
 0x2f9   :  { %v2630_v45 = vpop.f32.mrb[246].mxu0  ;;  %v2855_v30 = vpop.f32.mrb[246].mxu1 }
 0x2fa   :  { %v2631_v44 = vadd.f32 %v2630_v45, %v6875_v36  ;;  %v2632_v26 = vpop.f32.mrb[247].mxu0  ;;  %v2857_v28 = vpop.f32.mrb[247].mxu1  ;;  %3081 = vst [vmem:[#allocation5 + $0xc8] sm:$0xff] %v3049_v40  ;;  %v3011_v2 = vmul.f32 %v6889_v15, %v2851_v14 }
 0x2fc   :  { %v2856_v52 = vadd.f32 %v2855_v30, %v2631_v44  ;;  %v3050_v60 = vadd.f32 %v6895_v58, %v3011_v2 }
 0x2fd   :  { %v2635_v19 = vpop.f32.mrb[248].mxu0  ;;  %v2860_v8 = vpop.f32.mrb[248].mxu1 }
 0x2fe   :  { %v2636_v39 = vadd.f32 %v2635_v19, %v6877_v17  ;;  %v2637_v34 = vpop.f32.mrb[249].mxu0  ;;  %v2862_v1 = vpop.f32.mrb[249].mxu1  ;;  %3082 = vst [vmem:[#allocation5 + $0xd0] sm:$0xff] %v3050_v60  ;;  %v3012_v32 = vmul.f32 %v6889_v15, %v2856_v52 }
 0x300   :  { %v2861_v54 = vadd.f32 %v2860_v8, %v2636_v39  ;;  %v3051_v33 = vadd.f32 %v6895_v58, %v3012_v32 }
 0x301   :  { %v2640_v36 = vpop.f32.mrb[250].mxu0  ;;  %v2865_v27 = vpop.f32.mrb[250].mxu1 }
 0x302   :  { %v2641_v22 = vadd.f32 %v2640_v36, %v6879_v35  ;;  %v2642_v61 = vpop.f32.mrb[251].mxu0  ;;  %v2867_v62 = vpop.f32.mrb[251].mxu1  ;;  %3083 = vst [vmem:[#allocation5 + $0xd8] sm:$0xff] %v3051_v33  ;;  %v3013_v37 = vmul.f32 %v6889_v15, %v2861_v54 }
 0x304   :  { %v2866_v6 = vadd.f32 %v2865_v27, %v2641_v22  ;;  %v3052_v10 = vadd.f32 %v6895_v58, %v3013_v37 }
 0x305   :  { %v2645_v17 = vpop.f32.mrb[252].mxu0  ;;  %v2870_v18 = vpop.f32.mrb[252].mxu1 }
 0x306   :  { %v2646_v47 = vadd.f32 %v2645_v17, %v6881_v21  ;;  %v2647_v59 = vpop.f32.mrb[253].mxu0  ;;  %v2872_v51 = vpop.f32.mrb[253].mxu1  ;;  %3084 = vst [vmem:[#allocation5 + $0xe0] sm:$0xff] %v3052_v10  ;;  %v3014_v56 = vmul.f32 %v6889_v15, %v2866_v6 }
 0x308   :  { %v2871_v53 = vadd.f32 %v2870_v18, %v2646_v47  ;;  %v3053_v16 = vadd.f32 %v6895_v58, %v3014_v56 }
 0x309   :  { %v2650_v35 = vpop.f32.mrb[254].mxu0  ;;  %v2875_v29 = vpop.f32.mrb[254].mxu1 }
 0x30a   :  { %v2651_v23 = vadd.f32 %v2650_v35, %v6883_v48  ;;  %v2652_v31 = vpop.f32.mrb[255].mxu0  ;;  %v2877_v55 = vpop.f32.mrb[255].mxu1  ;;  %3085 = vst [vmem:[#allocation5 + $0xe8] sm:$0xff] %v3053_v16  ;;  %v3015_v20 = vmul.f32 %v6889_v15, %v2871_v53 }
 0x30c   :  { %v2876_v0 = vadd.f32 %v2875_v29, %v2651_v23  ;;  %v3054_v21 = vadd.f32 %v6895_v58, %v3015_v20 }
 0x30e   :  { %3086 = vst [vmem:[#allocation5 + $0xf0] sm:$0xff] %v3054_v21  ;;  %v3016_v12 = vmul.f32 %v6889_v15, %v2876_v0 }
 0x310   :  { %v3055_v24 = vadd.f32 %v6895_v58, %v3016_v12 }
 0x312   :  { %3087 = vst [vmem:[#allocation5 + $0xf8] sm:$0xff] %v3055_v24 }
 0x313   :  { %3508 = shalt.err (!%p3505_p6)
}
 0x314   :  { %s3509_s29 = scalar_lea.hbm %s7024_s6, 4096 }
 0x315   :  { %p3510_p7 = scmp.ne.s32.totalorder %s7024_s6, %s3509_s29  ;;  %p3513_p8 = scmp.lt.u32.totalorder %s3509_s29, %s7024_s6 }
 0x317   :  { %p3515_p9 = pnand %p3513_p8, %p3510_p7 }
 0x319   :  { %3518 = shalt.err (!%p3515_p9)
}
 0x31a   :  { %3099 = dma.vmem_to_hbm [thread:$0]  %s3094_s26, 4096, %s7024_s6, [#allocation4], %s3526_s11, %s3526_s11, %s3527_s12  }
 0x31b   :  { %3521 = dma.done.wait [#allocation4], 4096  }
 0x31c   :  { %3522 = vsyncadd [#allocation4], 4294963200 }
 0x31d   :  { %3523 = dma.done.wait [#allocation7], 32768  }
 0x31e   :  { %3524 = vsyncadd [#allocation7], 4294934528 }
 0x31f   :  { %3118 = vsyncpa [#allocation3], 1 }
 0x320   :  { %3119 = vsyncpa [#allocation4], 1 }
 0x321   :  { %3120 = vsyncpa [#allocation7], 1 }

</bundles_post_ra>
